<compile_context>
chip_gen: v7x
topology: tpu7x:2x2x1
jax: 0.10.0
libtpu: 0.0.40
codegen_flags: <defaults>
</compile_context>

<pallas_src>
import functools

import jax
import jax.numpy as jnp
from jax.experimental import pallas as pl
from jax.experimental.pallas import tpu as pltpu

CP = 128             # channel padding = one full lane width
NUM_CLASS_PAD = 128  # lane-dense logits; sliced to num_classes in the wrapper


# ----------------------------- parameter packing -----------------------------

def _conv_weight_slab(w_oihw, cp=CP):
    """PyTorch OIHW 3x3 conv weight -> (9*cp, cp) im2col slab (tap-major rows)."""
    cout, cin, kh, kw = w_oihw.shape
    assert (kh, kw) == (3, 3)
    w = jnp.transpose(w_oihw, (2, 3, 1, 0))                        # (3,3,Cin,Cout)
    w = jnp.pad(w, ((0, 0), (0, 0), (0, cp - cin), (0, cp - cout)))
    return w.reshape(9 * cp, cp)


def _bias_row(b, cp=CP):
    return jnp.pad(b, (0, cp - b.shape[0])).reshape(1, cp)


# --------------------------------- kernels -----------------------------------

def _conv3x3_relu(xp, w_slab, b_row, h_out, w_out, stride):
    """xp: (Hin+2, Win+2, CP) padded value -> (h_out*w_out, CP) f32 (bias+ReLU).

    Builds the im2col patch matrix by concatenating the 9 taps along the lane
    axis (each tap is exactly 128 lanes wide), then does ONE MXU matmul with
    K = 9*CP instead of nine tiny K=Cin matmuls.
    """
    cp = xp.shape[-1]
    taps = []
    for kh in range(3):
        for kw in range(3):
            taps.append(
                xp[kh:kh + (h_out - 1) * stride + 1:stride,
                   kw:kw + (w_out - 1) * stride + 1:stride, :])    # (h_out,w_out,cp)
    patches = jnp.concatenate(taps, axis=-1)           # (h_out, w_out, 9*cp)
    patches = patches.reshape(h_out * w_out, 9 * cp)   # lane dim untouched
    acc = jnp.dot(patches, w_slab, preferred_element_type=jnp.float32)
    return jnp.maximum(acc + b_row, 0.0)


def _basic_block_kernel(x_ref, w1_ref, b1_ref, w2_ref, b2_ref, o_ref,
                        pad1_ref, pad2_ref, *,
                        stride, h_in, w_in, h_out, w_out):
    """One batch element of BasicBlock2, fully fused (both convs, both ReLUs)."""
    # In-kernel zero padding for conv1 (no jnp.pad / extra HBM copy).
    # Scratch is re-zeroed every step so this stays correct when the grid is
    # sharded across TensorCores (each core has its own scratch).
    pad1_ref[...] = jnp.zeros_like(pad1_ref)
    pad1_ref[1:h_in + 1, 1:w_in + 1, :] = x_ref[0]

    y1 = _conv3x3_relu(pad1_ref[...], w1_ref[...], b1_ref[...],
                       h_out, w_out, stride)             # (h_out*w_out, CP)

    # Stage the conv1 activation + its 1-px halo in VMEM: the intermediate
    # never touches HBM.
    pad2_ref[...] = jnp.zeros_like(pad2_ref)
    pad2_ref[1:h_out + 1, 1:w_out + 1, :] = (
        y1.reshape(h_out, w_out, y1.shape[-1]).astype(pad2_ref.dtype))

    y2 = _conv3x3_relu(pad2_ref[...], w2_ref[...], b2_ref[...],
                       h_out, w_out, 1)                  # (h_out*w_out, CP)

    o_ref[0] = y2.astype(o_ref.dtype)                    # lane-dense store


def _pool_fc_kernel(x_ref, w_ref, b_ref, o_ref, *, inv_hw):
    """Global average pool over spatial + linear. x_ref: (N, HW, CP)."""
    pooled = jnp.sum(x_ref[...], axis=1) * inv_hw        # (N, CP)
    o_ref[...] = (jnp.dot(pooled, w_ref[...],
                          preferred_element_type=jnp.float32)
                  + b_ref[...]).astype(o_ref.dtype)


# -------------------------------- wrappers -----------------------------------

def basic_block_forward(x_nhwc, params, stride):
    """x_nhwc: (N, H, W, CP) channel-padded NHWC. Returns (N, Hout, Wout, CP)."""
    w1_slab, b1_row, w2_slab, b2_row = params
    n, h_in, w_in, cp = x_nhwc.shape
    h_out = (h_in + 2 - 3) // stride + 1
    w_out = (w_in + 2 - 3) // stride + 1

    kernel = functools.partial(_basic_block_kernel, stride=stride,
                               h_in=h_in, w_in=w_in, h_out=h_out, w_out=w_out)

    # TODO(synk): for real ResNet sizes add spatial tiling (grid=(N, Hout//th))
    # with a +2-row halo in the input BlockSpec instead of one whole image per
    # block, and cast MXU operands to bf16 on v6e/v7x. Weights could also be
    # single-buffered (constant index_map) to save VMEM at large channel counts.
    out = pl.pallas_call(
        kernel,
        out_shape=jax.ShapeDtypeStruct((n, h_out * w_out, cp), x_nhwc.dtype),
        grid_spec=pltpu.PrefetchScalarGridSpec(
            num_scalar_prefetch=0,
            grid=(n,),
            in_specs=[
                pl.BlockSpec((1, h_in, w_in, cp), lambda i: (i, 0, 0, 0)),
                pl.BlockSpec((9 * cp, cp), lambda i: (0, 0)),
                pl.BlockSpec((1, cp), lambda i: (0, 0)),
                pl.BlockSpec((9 * cp, cp), lambda i: (0, 0)),
                pl.BlockSpec((1, cp), lambda i: (0, 0)),
            ],
            out_specs=pl.BlockSpec((1, h_out * w_out, cp),
                                   lambda i: (i, 0, 0)),
            scratch_shapes=[
                pltpu.VMEM((h_in + 2, w_in + 2, cp), jnp.float32),
                pltpu.VMEM((h_out + 2, w_out + 2, cp), jnp.float32),
            ],
        ),
        compiler_params=pltpu.CompilerParams(
            dimension_semantics=("parallel",),
            vmem_limit_bytes=32 * 1024 * 1024),
    )(x_nhwc, w1_slab, b1_row, w2_slab, b2_row)
    # The 4D NHWC reshape is metadata-only at HBM level (kept out of the kernel).
    return out.reshape(n, h_out, w_out, cp)


def pool_fc_forward(x_nhwc, w_fc, b_fc):
    """Global avg pool + FC. x_nhwc: (N, H, W, CP). Returns (N, NUM_CLASS_PAD)."""
    n, h, w, cp = x_nhwc.shape
    kp = w_fc.shape[1]
    x = x_nhwc.reshape(n, h * w, cp)
    kernel = functools.partial(_pool_fc_kernel, inv_hw=1.0 / (h * w))
    return pl.pallas_call(
        kernel,
        out_shape=jax.ShapeDtypeStruct((n, kp), x.dtype),
        grid_spec=pltpu.PrefetchScalarGridSpec(
            num_scalar_prefetch=0,
            grid=(1,),
            in_specs=[
                pl.BlockSpec((n, h * w, cp), lambda i: (0, 0, 0)),
                pl.BlockSpec((cp, kp), lambda i: (0, 0)),
                pl.BlockSpec((1, kp), lambda i: (0, 0)),
            ],
            out_specs=pl.BlockSpec((n, kp), lambda i: (0, 0)),
        ),
        compiler_params=pltpu.CompilerParams(
            dimension_semantics=("arbitrary",)),
    )(x, w_fc, b_fc)


# ---------------------------------- model ------------------------------------

class SimpleResNet2Pallas:
    """JAX/Pallas re-implementation of the PyTorch SimpleResNet2 forward pass."""

    def __init__(self, num_classes=10, key=None):
        if key is None:
            key = jax.random.PRNGKey(0)
        ks = jax.random.split(key, 8)

        def conv_init(k, cout, cin):
            kw_, kb_ = jax.random.split(k)
            w = (jax.random.normal(kw_, (cout, cin, 3, 3), jnp.float32)
                 / jnp.sqrt(cin * 9.0))
            b = jax.random.normal(kb_, (cout,), jnp.float32) * 0.01
            return w, b

        # PyTorch-shaped parameters (OIHW conv weights, (out,in) linear weight).
        self.l1_w1, self.l1_b1 = conv_init(ks[0], 16, 3)
        self.l1_w2, self.l1_b2 = conv_init(ks[1], 16, 16)
        self.l2_w1, self.l2_b1 = conv_init(ks[2], 32, 16)
        self.l2_w2, self.l2_b2 = conv_init(ks[3], 32, 32)
        self.l3_w1, self.l3_b1 = conv_init(ks[4], 64, 32)
        self.l3_w2, self.l3_b2 = conv_init(ks[5], 64, 64)
        self.fc_w = (jax.random.normal(ks[6], (num_classes, 64), jnp.float32)
                     / jnp.sqrt(64.0))
        self.fc_b = jax.random.normal(ks[7], (num_classes,), jnp.float32) * 0.01
        self.num_classes = num_classes

        # Lane-dense (channel-padded) kernel-side parameter layouts.
        def block_params(w1, b1, w2, b2):
            return (_conv_weight_slab(w1), _bias_row(b1),
                    _conv_weight_slab(w2), _bias_row(b2))

        self._l1 = block_params(self.l1_w1, self.l1_b1, self.l1_w2, self.l1_b2)
        self._l2 = block_params(self.l2_w1, self.l2_b1, self.l2_w2, self.l2_b2)
        self._l3 = block_params(self.l3_w1, self.l3_b1, self.l3_w2, self.l3_b2)
        self._fc_w = jnp.pad(self.fc_w.T,
                             ((0, CP - 64), (0, NUM_CLASS_PAD - num_classes)))
        self._fc_b = jnp.pad(self.fc_b,
                             (0, NUM_CLASS_PAD - num_classes)
                             ).reshape(1, NUM_CLASS_PAD)

    def __call__(self, x_nchw):
        n, c, h, w = x_nchw.shape
        # NCHW -> NHWC; pad channels onto the lane axis once at the entry.
        x = jnp.transpose(x_nchw, (0, 2, 3, 1))
        x = jnp.pad(x, ((0, 0), (0, 0), (0, 0), (0, CP - c)))
        x = basic_block_forward(x, self._l1, stride=1)   # (N, 16, 16, CP)
        x = basic_block_forward(x, self._l2, stride=2)   # (N,  8,  8, CP)
        x = basic_block_forward(x, self._l3, stride=2)   # (N,  4,  4, CP)
        logits = pool_fc_forward(x, self._fc_w, self._fc_b)
        return logits[:, :self.num_classes]


# ------------------------------- reference -----------------------------------

def _reference_forward(m, x_nchw):
    """Pure-JAX reference (lax conv) for a correctness sanity check."""
    def conv_relu(x, w, b, stride):
        y = jax.lax.conv_general_dilated(
            x, w, window_strides=(stride, stride), padding=((1, 1), (1, 1)),
            dimension_numbers=("NCHW", "OIHW", "NCHW"))
        return jax.nn.relu(y + b.reshape(1, -1, 1, 1))

    out = conv_relu(x_nchw, m.l1_w1, m.l1_b1, 1)
    out = conv_relu(out, m.l1_w2, m.l1_b2, 1)
    out = conv_relu(out, m.l2_w1, m.l2_b1, 2)
    out = conv_relu(out, m.l2_w2, m.l2_b2, 1)
    out = conv_relu(out, m.l3_w1, m.l3_b1, 2)
    out = conv_relu(out, m.l3_w2, m.l3_b2, 1)
    pooled = jnp.mean(out, axis=(2, 3))                  # (N, 64)
    return pooled @ m.fc_w.T + m.fc_b


if __name__ == "__main__":
    key = jax.random.PRNGKey(0)
    kx, kparam = jax.random.split(key)

    # Small CIFAR-like input: batch=2, 3 channels, 16x16 spatial.
    x = jax.random.normal(kx, (2, 3, 16, 16), jnp.float32)

    model = SimpleResNet2Pallas(num_classes=10, key=kparam)
    y = jax.block_until_ready(model(x))

    y_ref = _reference_forward(model, x)
    assert y.shape == y_ref.shape == (2, 10)
    assert jnp.allclose(y, y_ref, atol=1e-3, rtol=1e-3), \
        float(jnp.max(jnp.abs(y - y_ref)))

    print("KERNEL_OK")
</pallas_src>

<mosaic_0001>
module attributes {stable_mosaic.version = 11 : i64} {
  func.func @_basic_block_kernel(%arg0: i32, %arg1: memref<1x16x16x128xf32, #tpu.memory_space<vmem>>, %arg2: memref<1152x128xf32, #tpu.memory_space<vmem>>, %arg3: memref<1x128xf32, #tpu.memory_space<vmem>>, %arg4: memref<1152x128xf32, #tpu.memory_space<vmem>>, %arg5: memref<1x128xf32, #tpu.memory_space<vmem>>, %arg6: memref<1x256x128xf32, #tpu.memory_space<vmem>>, %arg7: memref<18x18x128xf32, #tpu.memory_space<vmem>>, %arg8: memref<18x18x128xf32, #tpu.memory_space<vmem>>) attributes {dimension_semantics = [#tpu.dimension_semantics<parallel>], iteration_bounds = array<i64: 2>, scalar_prefetch = 0 : i64, scratch_operands = 2 : i64, tpu.core_type = #tpu.core_type<tc>, window_params = [{transform_indices = @transform_0, window_bounds = array<i64: 1, 16, 16, 128>}, {pipeline_mode = #tpu.pipeline_mode<synchronous>, transform_indices = @transform_1, window_bounds = array<i64: 1152, 128>}, {pipeline_mode = #tpu.pipeline_mode<synchronous>, transform_indices = @transform_2, window_bounds = array<i64: 1, 128>}, {pipeline_mode = #tpu.pipeline_mode<synchronous>, transform_indices = @transform_3, window_bounds = array<i64: 1152, 128>}, {pipeline_mode = #tpu.pipeline_mode<synchronous>, transform_indices = @transform_4, window_bounds = array<i64: 1, 128>}, {transform_indices = @transform_5, window_bounds = array<i64: 1, 256, 128>}]} {
    %cst = arith.constant 0.000000e+00 : f32
    %0 = vector.broadcast %cst : f32 to vector<18x18x128xf32>
    %c0 = arith.constant 0 : index
    %c0_0 = arith.constant 0 : index
    %c0_1 = arith.constant 0 : index
    %1 = vector.load %arg7[%c0, %c0_0, %c0_1] : memref<18x18x128xf32, #tpu.memory_space<vmem>>, vector<18x18x128xf32>
    tpu.vector_store %arg7[%c0, %c0_0, %c0_1], %0 {strides = array<i32>} : memref<18x18x128xf32, #tpu.memory_space<vmem>>, vector<18x18x128xf32>,
    %c0_2 = arith.constant 0 : index
    %c0_3 = arith.constant 0 : index
    %c0_4 = arith.constant 0 : index
    %c0_5 = arith.constant 0 : index
    %2 = vector.load %arg1[%c0_2, %c0_3, %c0_4, %c0_5] : memref<1x16x16x128xf32, #tpu.memory_space<vmem>>, vector<1x16x16x128xf32>
    %3 = vector.shape_cast %2 : vector<1x16x16x128xf32> to vector<16x16x128xf32>
    %c1 = arith.constant 1 : index
    %c1_6 = arith.constant 1 : index
    %c0_7 = arith.constant 0 : index
    %4 = vector.load %arg7[%c1, %c1_6, %c0_7] : memref<18x18x128xf32, #tpu.memory_space<vmem>>, vector<16x16x128xf32>
    tpu.vector_store %arg7[%c1, %c1_6, %c0_7], %3 {strides = array<i32>} : memref<18x18x128xf32, #tpu.memory_space<vmem>>, vector<16x16x128xf32>,
    %c0_8 = arith.constant 0 : index
    %c0_9 = arith.constant 0 : index
    %c0_10 = arith.constant 0 : index
    %5 = vector.load %arg7[%c0_8, %c0_9, %c0_10] : memref<18x18x128xf32, #tpu.memory_space<vmem>>, vector<18x18x128xf32>
    %c0_11 = arith.constant 0 : index
    %c0_12 = arith.constant 0 : index
    %6 = vector.load %arg2[%c0_11, %c0_12] : memref<1152x128xf32, #tpu.memory_space<vmem>>, vector<1152x128xf32>
    %c0_13 = arith.constant 0 : index
    %c0_14 = arith.constant 0 : index
    %7 = vector.load %arg3[%c0_13, %c0_14] : memref<1x128xf32, #tpu.memory_space<vmem>>, vector<1x128xf32>
    %8 = vector.extract_strided_slice %5 {offsets = [0, 0, 0], sizes = [16, 16, 128], strides = [1, 1, 1]} : vector<18x18x128xf32> to vector<16x16x128xf32>
    %9 = vector.extract_strided_slice %5 {offsets = [0, 1, 0], sizes = [16, 16, 128], strides = [1, 1, 1]} : vector<18x18x128xf32> to vector<16x16x128xf32>
    %10 = vector.extract_strided_slice %5 {offsets = [0, 2, 0], sizes = [16, 16, 128], strides = [1, 1, 1]} : vector<18x18x128xf32> to vector<16x16x128xf32>
    %11 = vector.extract_strided_slice %5 {offsets = [1, 0, 0], sizes = [16, 16, 128], strides = [1, 1, 1]} : vector<18x18x128xf32> to vector<16x16x128xf32>
    %12 = vector.extract_strided_slice %5 {offsets = [1, 1, 0], sizes = [16, 16, 128], strides = [1, 1, 1]} : vector<18x18x128xf32> to vector<16x16x128xf32>
    %13 = vector.extract_strided_slice %5 {offsets = [1, 2, 0], sizes = [16, 16, 128], strides = [1, 1, 1]} : vector<18x18x128xf32> to vector<16x16x128xf32>
    %14 = vector.extract_strided_slice %5 {offsets = [2, 0, 0], sizes = [16, 16, 128], strides = [1, 1, 1]} : vector<18x18x128xf32> to vector<16x16x128xf32>
    %15 = vector.extract_strided_slice %5 {offsets = [2, 1, 0], sizes = [16, 16, 128], strides = [1, 1, 1]} : vector<18x18x128xf32> to vector<16x16x128xf32>
    %16 = vector.extract_strided_slice %5 {offsets = [2, 2, 0], sizes = [16, 16, 128], strides = [1, 1, 1]} : vector<18x18x128xf32> to vector<16x16x128xf32>
    %17 = tpu.concatenate %8, %9, %10, %11, %12, %13, %14, %15, %16 in 2 : vector<16x16x128xf32>, vector<16x16x128xf32>, vector<16x16x128xf32>, vector<16x16x128xf32>, vector<16x16x128xf32>, vector<16x16x128xf32>, vector<16x16x128xf32>, vector<16x16x128xf32>, vector<16x16x128xf32> -> vector<16x16x1152xf32>
    %18 = vector.shape_cast %17 : vector<16x16x1152xf32> to vector<256x1152xf32>
    %cst_15 = arith.constant dense<0.000000e+00> : vector<256x128xf32>
    %19 = tpu.matmul %18, %6, %cst_15 {dimension_numbers = #tpu.dot_dimension_numbers<[1], [0], [0], [1], [0, 0, 1, 1], [], []>} : vector<256x1152xf32>, vector<1152x128xf32>, vector<256x128xf32> -> vector<256x128xf32>
    %20 = vector.broadcast %7 : vector<1x128xf32> to vector<256x128xf32>
    %21 = arith.addf %19, %20 : vector<256x128xf32>
    %cst_16 = arith.constant 0.000000e+00 : f32
    %22 = vector.broadcast %cst_16 : f32 to vector<256x128xf32>
    %23 = arith.maximumf %21, %22 : vector<256x128xf32>
    %cst_17 = arith.constant 0.000000e+00 : f32
    %24 = vector.broadcast %cst_17 : f32 to vector<18x18x128xf32>
    %c0_18 = arith.constant 0 : index
    %c0_19 = arith.constant 0 : index
    %c0_20 = arith.constant 0 : index
    %25 = vector.load %arg8[%c0_18, %c0_19, %c0_20] : memref<18x18x128xf32, #tpu.memory_space<vmem>>, vector<18x18x128xf32>
    tpu.vector_store %arg8[%c0_18, %c0_19, %c0_20], %24 {strides = array<i32>} : memref<18x18x128xf32, #tpu.memory_space<vmem>>, vector<18x18x128xf32>,
    %26 = vector.shape_cast %23 : vector<256x128xf32> to vector<16x16x128xf32>
    %c1_21 = arith.constant 1 : index
    %c1_22 = arith.constant 1 : index
    %c0_23 = arith.constant 0 : index
    %27 = vector.load %arg8[%c1_21, %c1_22, %c0_23] : memref<18x18x128xf32, #tpu.memory_space<vmem>>, vector<16x16x128xf32>
    tpu.vector_store %arg8[%c1_21, %c1_22, %c0_23], %26 {strides = array<i32>} : memref<18x18x128xf32, #tpu.memory_space<vmem>>, vector<16x16x128xf32>,
    %c0_24 = arith.constant 0 : index
    %c0_25 = arith.constant 0 : index
    %c0_26 = arith.constant 0 : index
    %28 = vector.load %arg8[%c0_24, %c0_25, %c0_26] : memref<18x18x128xf32, #tpu.memory_space<vmem>>, vector<18x18x128xf32>
    %c0_27 = arith.constant 0 : index
    %c0_28 = arith.constant 0 : index
    %29 = vector.load %arg4[%c0_27, %c0_28] : memref<1152x128xf32, #tpu.memory_space<vmem>>, vector<1152x128xf32>
    %c0_29 = arith.constant 0 : index
    %c0_30 = arith.constant 0 : index
    %30 = vector.load %arg5[%c0_29, %c0_30] : memref<1x128xf32, #tpu.memory_space<vmem>>, vector<1x128xf32>
    %31 = vector.extract_strided_slice %28 {offsets = [0, 0, 0], sizes = [16, 16, 128], strides = [1, 1, 1]} : vector<18x18x128xf32> to vector<16x16x128xf32>
    %32 = vector.extract_strided_slice %28 {offsets = [0, 1, 0], sizes = [16, 16, 128], strides = [1, 1, 1]} : vector<18x18x128xf32> to vector<16x16x128xf32>
    %33 = vector.extract_strided_slice %28 {offsets = [0, 2, 0], sizes = [16, 16, 128], strides = [1, 1, 1]} : vector<18x18x128xf32> to vector<16x16x128xf32>
    %34 = vector.extract_strided_slice %28 {offsets = [1, 0, 0], sizes = [16, 16, 128], strides = [1, 1, 1]} : vector<18x18x128xf32> to vector<16x16x128xf32>
    %35 = vector.extract_strided_slice %28 {offsets = [1, 1, 0], sizes = [16, 16, 128], strides = [1, 1, 1]} : vector<18x18x128xf32> to vector<16x16x128xf32>
    %36 = vector.extract_strided_slice %28 {offsets = [1, 2, 0], sizes = [16, 16, 128], strides = [1, 1, 1]} : vector<18x18x128xf32> to vector<16x16x128xf32>
    %37 = vector.extract_strided_slice %28 {offsets = [2, 0, 0], sizes = [16, 16, 128], strides = [1, 1, 1]} : vector<18x18x128xf32> to vector<16x16x128xf32>
    %38 = vector.extract_strided_slice %28 {offsets = [2, 1, 0], sizes = [16, 16, 128], strides = [1, 1, 1]} : vector<18x18x128xf32> to vector<16x16x128xf32>
    %39 = vector.extract_strided_slice %28 {offsets = [2, 2, 0], sizes = [16, 16, 128], strides = [1, 1, 1]} : vector<18x18x128xf32> to vector<16x16x128xf32>
    %40 = tpu.concatenate %31, %32, %33, %34, %35, %36, %37, %38, %39 in 2 : vector<16x16x128xf32>, vector<16x16x128xf32>, vector<16x16x128xf32>, vector<16x16x128xf32>, vector<16x16x128xf32>, vector<16x16x128xf32>, vector<16x16x128xf32>, vector<16x16x128xf32>, vector<16x16x128xf32> -> vector<16x16x1152xf32>
    %41 = vector.shape_cast %40 : vector<16x16x1152xf32> to vector<256x1152xf32>
    %cst_31 = arith.constant dense<0.000000e+00> : vector<256x128xf32>
    %42 = tpu.matmul %41, %29, %cst_31 {dimension_numbers = #tpu.dot_dimension_numbers<[1], [0], [0], [1], [0, 0, 1, 1], [], []>} : vector<256x1152xf32>, vector<1152x128xf32>, vector<256x128xf32> -> vector<256x128xf32>
    %43 = vector.broadcast %30 : vector<1x128xf32> to vector<256x128xf32>
    %44 = arith.addf %42, %43 : vector<256x128xf32>
    %cst_32 = arith.constant 0.000000e+00 : f32
    %45 = vector.broadcast %cst_32 : f32 to vector<256x128xf32>
    %46 = arith.maximumf %44, %45 : vector<256x128xf32>
    %c0_33 = arith.constant 0 : index
    %c0_34 = arith.constant 0 : index
    %c0_35 = arith.constant 0 : index
    %47 = vector.load %arg6[%c0_33, %c0_34, %c0_35] : memref<1x256x128xf32, #tpu.memory_space<vmem>>, vector<1x256x128xf32>
    %48 = vector.shape_cast %47 : vector<1x256x128xf32> to vector<256x128xf32>
    %49 = vector.shape_cast %46 : vector<256x128xf32> to vector<1x256x128xf32>
    tpu.vector_store %arg6[%c0_33, %c0_34, %c0_35], %49 {strides = array<i32>} : memref<1x256x128xf32, #tpu.memory_space<vmem>>, vector<1x256x128xf32>,
    return
  }
  func.func @transform_0(%arg0: i32) -> (i32, i32, i32, i32) {
    %c0_i32 = arith.constant 0 : i32
    %c0_i32_0 = arith.constant 0 : i32
    %c0_i32_1 = arith.constant 0 : i32
    %c0_i32_2 = arith.constant 0 : i32
    return %arg0, %c0_i32, %c0_i32_0, %c0_i32_1 : i32, i32, i32, i32
  }
  func.func @transform_1(%arg0: i32) -> (i32, i32) {
    %c0_i32 = arith.constant 0 : i32
    %c0_i32_0 = arith.constant 0 : i32
    %c0_i32_1 = arith.constant 0 : i32
    return %c0_i32, %c0_i32_0 : i32, i32
  }
  func.func @transform_2(%arg0: i32) -> (i32, i32) {
    %c0_i32 = arith.constant 0 : i32
    %c0_i32_0 = arith.constant 0 : i32
    %c0_i32_1 = arith.constant 0 : i32
    return %c0_i32, %c0_i32_0 : i32, i32
  }
  func.func @transform_3(%arg0: i32) -> (i32, i32) {
    %c0_i32 = arith.constant 0 : i32
    %c0_i32_0 = arith.constant 0 : i32
    %c0_i32_1 = arith.constant 0 : i32
    return %c0_i32, %c0_i32_0 : i32, i32
  }
  func.func @transform_4(%arg0: i32) -> (i32, i32) {
    %c0_i32 = arith.constant 0 : i32
    %c0_i32_0 = arith.constant 0 : i32
    %c0_i32_1 = arith.constant 0 : i32
    return %c0_i32, %c0_i32_0 : i32, i32
  }
  func.func @transform_5(%arg0: i32) -> (i32, i32, i32) {
    %c0_i32 = arith.constant 0 : i32
    %c0_i32_0 = arith.constant 0 : i32
    %c0_i32_1 = arith.constant 0 : i32
    return %arg0, %c0_i32, %c0_i32_0 : i32, i32, i32
  }
}

</mosaic_0001>

<bundles_post_ra>
// kernel: tpu_custom_call.1
= control target key start
LH: loop header
LB: loop body
LE: loop exit
PB: predicated region body
PF: predicated region fallthrough
CT: control target
= control target key end

     0   :  { %10 = vsyncpa [#allocation5], 0  ;;  %s7561_s0 = inlined_call_operand.hbm [shape: f32[2,16,16,128], index: 0, kind: input, shape index: {}]   ;;  %s7562_s1 = inlined_call_operand.hbm [shape: f32[1152,128], index: 1, kind: input, shape index: {}]   ;;  %s7563_s2 = inlined_call_operand.vmem [shape: f32[1,128], index: 2, kind: input, shape index: {}]   ;;  %s7564_s3 = inlined_call_operand.hbm [shape: f32[1152,128], index: 3, kind: input, shape index: {}]   ;;  %s7565_s4 = inlined_call_operand.vmem [shape: f32[1,128], index: 4, kind: input, shape index: {}]   ;;  %s7566_s5 = inlined_call_operand.hbm [shape: f32[2,256,128], index: 5, kind: output, shape index: {}]  }
   0x1   :  { %12 = vsyncpa [#allocation5 + $0x1], 0 }
   0x2   :  { %13 = vsyncpa [#allocation8], 0 }
   0x3   :  { %14 = vsyncpa [#allocation6], 0 }
   0x4   :  { %16 = vsyncpa [#allocation6 + $0x1], 0  ;;  %s5467_s18 = smov 0   ;;  %s5469_s19 = smov 0  }
   0x5   :  { %s5471_s20 = smov 0   ;;  %s5473_s21 = smov 0  }
   0x6 LB: > { %s5488_s22 = sadd.s32 4294967295, %s5425_s21   ;;  %s3954_s23 = sadd.s32 4294967294, %s5425_s21   ;;  %s5425_s21 = sphi %s5473_s21, %s7907_s21   ;;  %s5421_s20 = sphi %s5471_s20, %s7906_s20   ;;  %s5417_s19 = sphi %s5469_s19, %s7905_s19   ;;  %s5413_s18 = sphi %s5467_s18, %s7904_s18  }
   0x7   : > { %p42_p0 = scmp.ne.s32.totalorder %s5417_s19, %s5413_s18  ;;  %p7567_p1 = scmp.eq.s32.totalorder %s5488_s22, 0 }
   0x8   : > { %p156_p3 = scmp.eq.s32.totalorder %s3954_s23, 1  ;;  %p3955_p5 = scmp.ge.s32.totalorder %s5425_s21, 1 }
   0x9   : > { %p5497_p4 = por %p7567_p1, %p42_p0  ;;  %p163_p7 = scmp.lt.s32.totalorder %s5425_s21, 3 }
   0xa   : > { %p5502_p6 = por %p156_p3, %p42_p0  ;;  %s5427_s27 = smov [#allocation7]  }
   0xb   : > { %s7714_s24 = scalar_select %p5497_p4, 1, 0 }
   0xc   : > { %s7715_s25 = scalar_select %p5502_p6, 1, 0 }
   0xd   : > { %p5507_p8 = pnand %p3955_p5, %p163_p7  ;;  %s175_s28 = sshll.u32 %s5427_s27, 4  ;;  %s5511_s28 = int_to_ptr.vmem [resolvable:$true] %s175_s28 }
   0xe   : > { %s5428_s30 = smov [#allocation9]   ;;  %s5269_s9 = scalar_lea.hbm %s7562_s1, 18432 }
   0xf   : > { %p5156_p9 = pneg %p5507_p8  ;;  %s191_s6 = sshll.u32 %s5428_s30, 4  ;;  %s5522_s6 = int_to_ptr.vmem [resolvable:$true] %s191_s6 }
  0x10   : > { %p5270_p12 = scmp.ne.s32.totalorder %s7562_s1, %s5269_s9  ;;  %p5276_p5 = scmp.lt.u32.totalorder %s5269_s9, %s7562_s1 }
  0x11   : > { %p5518_p11 = pnand %p5156_p9, %p7567_p1 }
  0x13   : > { %p5271_p13 = pneg %p5518_p11 }
  0x15   : > { %p5272_p0 = pnand %p5271_p13, %p5270_p12 }
  0x17   : > { %p5273_p3 = pneg %p5272_p0 }
  0x19   : > { %p5278_p7 = pnand %p5276_p5, %p5273_p3 }
  0x1b   : > { %5281 = shalt.err (!%p5278_p7)
}
  0x1c   : > { %s5282_s14 = scalar_lea.vmem %s5511_s28, 18432  ;;  %p5290_p2 = scmp.lt.s32.totalorder %s5511_s28, %s5511_s28 }
  0x1d   : > { %p5283_p9 = scmp.ne.s32.totalorder %s5511_s28, %s5282_s14  ;;  %p5291_p12 = scmp.lt.s32.totalorder %s5282_s14, %s5282_s14 }
  0x1f   : > { %p5285_p10 = pnand %p5283_p9, %p5271_p13  ;;  %p5292_p0 = por %p5291_p12, %p5290_p2 }
  0x21   : > { %p5286_p1 = pneg %p5285_p10 }
  0x23   : > { %p5293_p6 = pnand %p5292_p0, %p5286_p1 }
  0x25   : > { %5296 = shalt.err (!%p5293_p6)
}
  0x26   : > { %s5429_s15 = smov 128   ;;  %s5430_s16 = smov 8  }
  0x27   : > { %5159 = dma.hbm_to_vmem [thread:$0]  (!%p5518_p11), %s7562_s1, 18432, %s5511_s28, [#allocation8], %s5429_s15, %s5429_s15, %s5430_s16  }
  0x28   : > { %s5297_s7 = scalar_lea.hbm %s7564_s3, 18432 }
  0x29   : > { %p5298_p1 = scmp.ne.s32.totalorder %s7564_s3, %s5297_s7  ;;  %p5304_p10 = scmp.lt.u32.totalorder %s5297_s7, %s7564_s3 }
  0x2b   : > { %p5300_p2 = pnand %p5298_p1, %p5271_p13 }
  0x2d   : > { %p5301_p6 = pneg %p5300_p2 }
  0x2f   : > { %p5306_p3 = pnand %p5304_p10, %p5301_p6 }
  0x31   : > { %5309 = shalt.err (!%p5306_p3)
}
  0x32   : > { %s5310_s28 = scalar_lea.vmem %s5522_s6, 18432  ;;  %p5318_p12 = scmp.lt.s32.totalorder %s5522_s6, %s5522_s6 }
  0x33   : > { %p5311_p5 = scmp.ne.s32.totalorder %s5522_s6, %s5310_s28  ;;  %p5319_p0 = scmp.lt.s32.totalorder %s5310_s28, %s5310_s28 }
  0x35   : > { %p5313_p7 = pnand %p5311_p5, %p5271_p13  ;;  %p5320_p1 = por %p5319_p0, %p5318_p12 }
  0x37   : > { %p5314_p9 = pneg %p5313_p7 }
  0x39   : > { %p5321_p2 = pnand %p5320_p1, %p5314_p9 }
  0x3b   : > { %5324 = shalt.err (!%p5321_p2)
}
  0x3c   : > { %5162 = dma.hbm_to_vmem [thread:$0]  (!%p5518_p11), %s7564_s3, 18432, %s5522_s6, [#allocation8], %s5429_s15, %s5429_s15, %s5430_s16  }
  0x3d   : > { %s5583_s29 = sadd.s32 1, %s5425_s21   ;;  %s29_s14 = sadd.s32 1, %s5421_s20 }
  0x3e   : > { %s26_s17 = ssub.s32 %s5425_s21, %s5583_s29  ;;  %p36_p13 = scmp.ne.s32.totalorder %s5421_s20, %s5417_s19 }
  0x3f   : > { %p27_p6 = scmp.eq.s32.totalorder %s26_s17, 0  ;;  %p37_p10 = scmp.eq.s32.totalorder %s5425_s21, 0 }
  0x40   : > { %p7718_p3 = scmp.eq.s32.totalorder %s5488_s22, 1  ;;  %p5173_p7 = scmp.lt.s32.totalorder %s5425_s21, 2 }
  0x41   : > { %s5599_s27 = scalar_select %p27_p6, %s5421_s20, %s29_s14  }
  0x42   : > { %p5593_p5 = por %p7718_p3, %p36_p13  ;;  %p38_p9 = por %p37_p10, %p36_p13 }
  0x43   : > { %s208_s30 = sand.u32 1, %s5421_s20   ;;  %s3974_s6 = sshll.u32 %s5425_s21, 12 }
  0x44   : > { %s7719_s23 = scalar_select %p5593_p5, 1, 0 }
  0x45   : > { %s3959_s7 = sshll.u32 %s208_s30, 8  ;;  %s5606_s10 = scalar_lea.hbm %s7561_s0, %s3974_s6 }
  0x46   : > { %s212_s11 = scalar_lea.vmem [#allocation4], %s3959_s7  ;;  %p5610_p11 = pnand %p5173_p7, %p38_p9 }
  0x47   : > { %s219_s28 = sshll.u32 %s212_s11, 4  ;;  %s5614_s13 = scalar_lea.sflag [#allocation5], %s208_s30  ;;  %s5608_s28 = int_to_ptr.vmem [resolvable:$true] %s219_s28 }
  0x48   : > { %s5325_s14 = scalar_lea.hbm %s5606_s10, 4096  ;;  %p5327_p0 = pneg %p5610_p11 }
  0x49   : > { %p5326_p12 = scmp.ne.s32.totalorder %s5606_s10, %s5325_s14  ;;  %s5330_s6 = scalar_lea.hbm %s7561_s0, 8192 }
  0x4a   : > { %p5331_p13 = scmp.lt.u32.totalorder %s5606_s10, %s7561_s0  ;;  %p5332_p6 = scmp.lt.u32.totalorder %s5330_s6, %s5325_s14 }
  0x4b   : > { %p5328_p1 = pnand %p5327_p0, %p5326_p12  ;;  %p5334_p3 = scmp.lt.u32.totalorder %s5325_s14, %s5606_s10 }
  0x4c   : > { %p5333_p10 = por %p5332_p6, %p5331_p13 }
  0x4d   : > { %p5329_p2 = pneg %p5328_p1 }
  0x4e   : > { %p5335_p7 = por %p5334_p3, %p5333_p10 }
  0x50   : > { %p5336_p9 = pnand %p5335_p7, %p5329_p2 }
  0x52   : > { %5339 = shalt.err (!%p5336_p9)
}
  0x53   : > { %s5340_s30 = scalar_lea.vmem %s5608_s28, 4096  ;;  %s5431_s11 = smov [#allocation4]  }
  0x54   : > { %p5341_p12 = scmp.ne.s32.totalorder %s5608_s28, %s5340_s30  ;;  %s5345_s17 = sshll.u32 %s5431_s11, 4  ;;  %s5346_s17 = int_to_ptr.vmem [resolvable:$false] %s5345_s17 }
  0x55   : > { %s5347_s7 = scalar_lea.vmem %s5346_s17, 8192  ;;  %p5348_p4 = scmp.lt.s32.totalorder %s5608_s28, %s5346_s17 }
  0x56   : > { %p5343_p1 = pnand %p5341_p12, %p5327_p0  ;;  %p5349_p13 = scmp.lt.s32.totalorder %s5347_s7, %s5340_s30 }
  0x58   : > { %p5344_p5 = pneg %p5343_p1  ;;  %p5350_p6 = por %p5349_p13, %p5348_p4 }
  0x5a   : > { %p5351_p10 = pnand %p5350_p6, %p5344_p5 }
  0x5c   : > { %5354 = shalt.err (!%p5351_p10)
}
  0x5d   : > { %5166 = dma.hbm_to_vmem [thread:$0]  (!%p5610_p11), %s5606_s10, 4096, %s5608_s28, %s5614_s13, %s5429_s15, %s5429_s15, %s5430_s16  }
  0x5e   : > { %231 = sbr.rel (%p5507_p8) target bundleno = 1540 (0x604), region = 40 }
  0x65   : > { %s5648_s14 = sand.u32 1, %s5417_s19   ;;  %p7721_p4 = scmp.ne.s32.totalorder %s7714_s24, 0 }
  0x66   : > { %s3963_s6 = sshll.u32 %s5648_s14, 8  ;;  %s234_s8 = scalar_lea.sflag [#allocation5], %s5648_s14 }
  0x67   : > { %s5654_s12 = scalar_lea.vmem [#allocation4], %s3963_s6 }
  0x68   : > { %5400 = dma.done.wait (%p7721_p4), %s234_s8, 4096  }
  0x69   : > { %5402 = vsyncadd (%p7721_p4), %s234_s8, 4294963200  ;;  %p7722_p5 = scmp.eq.s32.totalorder %s5488_s22, 0 }
  0x6b   : > { %5404 = dma.done.wait (%p7722_p5), [#allocation8], 36864   ;;  %p7723_p8 = pmov %p7722_p5 }
  0x6c   : > { %vm638_vm0 = vcmask 1046528   ;;  %v7570_v0 = vmov 0.0|0.0   ;;  %v5433_v1 = vmov 0.0   ;;  %v445_v3 = vld [vmem:[#allocation7] sm:$0xff]  ;;  %v446_v4 = vld [vmem:[#allocation7 + $0x8] sm:$0xff]  ;;  %v447_v5 = vld [vmem:[#allocation7 + $0x10] sm:$0xff] }
  0x6d   : > { %5406 = vsyncadd (%p7723_p8), [#allocation8], 4294930432  ;;  %4232 = vmatprep.subr.bf16.mxu0 %v7570_v0  ;;  %272 = vst [vmem:[#allocation2] sm:$0xff] %v5433_v1  ;;  %v5667_v2 = vrot.slane %v5433_v1, 1  ;;  %v4233_v6 = vpack.c.bf16 %v446_v4, %v445_v3  ;;  %v448_v7 = vld [vmem:[#allocation7 + $0x18] sm:$0xff]  ;;  %v449_v9 = vld [vmem:[#allocation7 + $0x20] sm:$0xff] }
  0x6e   : > { %274 = vst [vmem:[#allocation2 + $0x10] sm:$0x3] %v5433_v1  ;;  %275 = vst [vmem:[#allocation2 + $0x18] sm:$0xff] %v5433_v1  ;;  %v4236_v8 = vpack.c.bf16 %v448_v7, %v447_v5  ;;  %v450_v10 = vld [vmem:[#allocation7 + $0x28] sm:$0xff]  ;;  %v451_v12 = vld [vmem:[#allocation7 + $0x30] sm:$0xff]  ;;  %vm751_vm1 = vcmask 1045504  }
  0x6f   : > { %276 = vst [vmem:[#allocation2 + $0x20] sm:$0xff] %v5433_v1  ;;  %277 = vst [vmem:[#allocation2 + $0x28] sm:$0x3] %v5433_v1  ;;  %968 = vmatprep.mubr.f32.mxu0 %v5667_v2  ;;  %4234 = vmatpush1.bf16.msra.mxu0 %v4233_v6  ;;  %v4239_v11 = vpack.c.bf16 %v450_v10, %v449_v9  ;;  %v452_v13 = vld [vmem:[#allocation7 + $0x38] sm:$0xff]  ;;  %v326_v15 = vld [vmem:[%s5654_s12] sm:$0xff]  ;;  %s7423_s10 = scalar_lea.vmem [#allocation10], %s3963_s6 }
  0x70   : > { %278 = vst [vmem:[#allocation2 + $0x30] sm:$0xff] %v5433_v1  ;;  %279 = vst [vmem:[#allocation2 + $0x38] sm:$0xff] %v5433_v1  ;;  %4235 = vmatprep.subr.bf16.mxu0 %v7570_v0  ;;  %v4242_v14 = vpack.c.bf16 %v452_v13, %v451_v12  ;;  %v453_v16 = vld [vmem:[#allocation7 + $0x40] sm:$0xff]  ;;  %v454_v17 = vld [vmem:[#allocation7 + $0x48] sm:$0xff]  ;;  %s3975_s28 = sshll.u32 %s5488_s22, 12  ;;  %s3862_s13 = sshll.u32 %s7423_s10, 4  ;;  %s7515_s13 = int_to_ptr.vmem [resolvable:$true] %s3862_s13 }
  0x71   : > { %280 = vst [vmem:[#allocation2 + $0x40] sm:$0x3] %v5433_v1  ;;  %281 = vst [vmem:[#allocation2 + $0x48] sm:$0xff] %v5433_v1  ;;  %v327_v18 = vld [vmem:[%s5654_s12 + $0x8] sm:$0xff]  ;;  %v328_v19 = vld [vmem:[%s5654_s12 + $0x10] sm:$0xff]  ;;  %v4245_v23 = vpack.c.bf16 %v454_v17, %v453_v16  ;;  %s7513_s11 = scalar_lea.hbm %s7566_s5, %s3975_s28  ;;  %s3849_s22 = scalar_lea.sflag [#allocation6], %s5648_s14 }
  0x72   : > { %282 = vst [vmem:[#allocation2 + $0x50] sm:$0xff] %v5433_v1  ;;  %283 = vst [vmem:[#allocation2 + $0x58] sm:$0x3] %v5433_v1  ;;  %v329_v20 = vld [vmem:[%s5654_s12 + $0x18] sm:$0xff]  ;;  %v330_v21 = vld [vmem:[%s5654_s12 + $0x20] sm:$0xff]  ;;  %s5355_s17 = scalar_lea.vmem %s7515_s13, 4096 }
  0x73   : > { %284 = vst [vmem:[#allocation2 + $0x60] sm:$0xff] %v5433_v1  ;;  %285 = vst [vmem:[#allocation2 + $0x68] sm:$0xff] %v5433_v1  ;;  %4237 = vmatpush1.bf16.msra.mxu0 %v4236_v8  ;;  %v331_v22 = vld [vmem:[%s5654_s12 + $0x28] sm:$0xff]  ;;  %v332_v24 = vld [vmem:[%s5654_s12 + $0x30] sm:$0xff]  ;;  %p5356_p11 = scmp.ne.s32.totalorder %s7515_s13, %s5355_s17  ;;  %p7901_p0 = scmp.ne.s32.totalorder %s7719_s23, 0 }
  0x74   : > { %286 = vst [vmem:[#allocation2 + $0x70] sm:$0x3] %v5433_v1  ;;  %287 = vst [vmem:[#allocation2 + $0x78] sm:$0xff] %v5433_v1  ;;  %4238 = vmatprep.subr.bf16.mxu0 %v7570_v0  ;;  %v455_v25 = vld [vmem:[#allocation7 + $0x50] sm:$0xff]  ;;  %v456_v26 = vld [vmem:[#allocation7 + $0x58] sm:$0xff]  ;;  %s5434_s7 = smov [#allocation10]  }
  0x75   : > { %288 = vst [vmem:[#allocation2 + $0x80] sm:$0xff] %v5433_v1  ;;  %289 = vst [vmem:[#allocation2 + $0x88] sm:$0x3] %v5433_v1  ;;  %v333_v27 = vld [vmem:[%s5654_s12 + $0x38] sm:$0xff]  ;;  %v334_v28 = vld [vmem:[%s5654_s12 + $0x40] sm:$0xff]  ;;  %v4248_v32 = vpack.c.bf16 %v456_v26, %v455_v25  ;;  %p5357_p2 = pnand %p5356_p11, %p7901_p0  ;;  %s5359_s6 = sshll.u32 %s5434_s7, 4  ;;  %s5360_s6 = int_to_ptr.vmem [resolvable:$false] %s5359_s6 }
  0x76   : > { %290 = vst [vmem:[#allocation2 + $0x90] sm:$0xff] %v5433_v1  ;;  %291 = vst [vmem:[#allocation2 + $0x98] sm:$0xff] %v5433_v1  ;;  %v335_v29 = vld [vmem:[%s5654_s12 + $0x48] sm:$0xff]  ;;  %v336_v30 = vld [vmem:[%s5654_s12 + $0x50] sm:$0xff]  ;;  %s5361_s8 = scalar_lea.vmem %s5360_s6, 8192  ;;  %p5362_p7 = scmp.lt.s32.totalorder %s7515_s13, %s5360_s6 }
  0x77   : > { %292 = vst [vmem:[#allocation2 + $0xa0] sm:$0x3] %v5433_v1  ;;  %293 = vst [vmem:[#allocation2 + $0xa8] sm:$0xff] %v5433_v1  ;;  %4240 = vmatpush1.bf16.msra.mxu0 %v4239_v11  ;;  %v337_v31 = vld [vmem:[%s5654_s12 + $0x58] sm:$0xff]  ;;  %v457_v33 = vld [vmem:[#allocation7 + $0x60] sm:$0xff]  ;;  %p5358_p3 = pneg %p5357_p2  ;;  %p5363_p9 = scmp.lt.s32.totalorder %s5361_s8, %s5355_s17 }
  0x78   : > { %294 = vst [vmem:[#allocation2 + $0xb0] sm:$0xff] %v5433_v1  ;;  %295 = vst [vmem:[#allocation2 + $0xb8] sm:$0x3] %v5433_v1  ;;  %4241 = vmatprep.subr.bf16.mxu0 %v7570_v0  ;;  %v458_v34 = vld [vmem:[#allocation7 + $0x68] sm:$0xff]  ;;  %v338_v35 = vld [vmem:[%s5654_s12 + $0x60] sm:$0xff] }
  0x79   : > { %296 = vst [vmem:[#allocation2 + $0xc0] sm:$0xff] %v5433_v1  ;;  %297 = vst [vmem:[#allocation2 + $0xc8] sm:$0xff] %v5433_v1  ;;  %v339_v36 = vld [vmem:[%s5654_s12 + $0x68] sm:$0xff]  ;;  %v4251_v37 = vpack.c.bf16 %v458_v34, %v457_v33  ;;  %v459_v38 = vld [vmem:[#allocation7 + $0x70] sm:$0xff]  ;;  %p5364_p12 = por %p5363_p9, %p5362_p7 }
  0x7a   : > { %298 = vst [vmem:[#allocation2 + $0xd0] sm:$0x3] %v5433_v1  ;;  %299 = vst [vmem:[#allocation2 + $0xd8] sm:$0xff] %v5433_v1  ;;  %v460_v39 = vld [vmem:[#allocation7 + $0x78] sm:$0xff]  ;;  %v340_v40 = vld [vmem:[%s5654_s12 + $0x70] sm:$0xff] }
  0x7b   : > { %300 = vst [vmem:[#allocation2 + $0xe0] sm:$0xff] %v5433_v1  ;;  %301 = vst [vmem:[#allocation2 + $0xe8] sm:$0x3] %v5433_v1  ;;  %4243 = vmatpush1.bf16.msra.mxu0 %v4242_v14  ;;  %v4254_v41 = vpack.c.bf16 %v460_v39, %v459_v38  ;;  %v341_v42 = vld [vmem:[%s5654_s12 + $0x78] sm:$0xff]  ;;  %v461_v43 = vld [vmem:[#allocation7 + $0x80] sm:$0xff]  ;;  %p5365_p1 = pnand %p5364_p12, %p5358_p3 }
  0x7c   : > { %302 = vst [vmem:[#allocation2 + $0xf0] sm:$0xff] %v5433_v1  ;;  %303 = vst [vmem:[#allocation2 + $0xf8] sm:$0xff] %v5433_v1  ;;  %4244 = vmatprep.subr.bf16.mxu0 %v7570_v0  ;;  %v462_v44 = vld [vmem:[#allocation7 + $0x88] sm:$0xff]  ;;  %v342_v45 = vld [vmem:[%s5654_s12 + $0x80] sm:$0xff] }
  0x7d   : > { %304 = vst [vmem:[#allocation2 + $0x100] sm:$0x3] %v5433_v1  ;;  %305 = vst [vmem:[#allocation2 + $0x108] sm:$0xff] %v5433_v1  ;;  %v343_v46 = vld [vmem:[%s5654_s12 + $0x88] sm:$0xff]  ;;  %v344_v47 = vld [vmem:[%s5654_s12 + $0x90] sm:$0xff]  ;;  %v4257_v48 = vpack.c.bf16 %v462_v44, %v461_v43 }
  0x7e   : > { %306 = vst [vmem:[#allocation2 + $0x110] sm:$0xff] %v5433_v1  ;;  %307 = vst [vmem:[#allocation2 + $0x118] sm:$0x3] %v5433_v1  ;;  %v463_v49 = vld [vmem:[#allocation7 + $0x90] sm:$0xff]  ;;  %v345_v50 = vld [vmem:[%s5654_s12 + $0x98] sm:$0xff] }
  0x7f   : > { %308 = vst [vmem:[#allocation2 + $0x120] sm:$0xff] %v5433_v1  ;;  %309 = vst [vmem:[#allocation2 + $0x128] sm:$0xff] %v5433_v1  ;;  %4246 = vmatpush1.bf16.msra.mxu0 %v4245_v23  ;;  %v464_v51 = vld [vmem:[#allocation7 + $0x98] sm:$0xff]  ;;  %v346_v52 = vld [vmem:[%s5654_s12 + $0xa0] sm:$0xff] }
  0x80   : > { %310 = vst [vmem:[#allocation2 + $0x130] sm:$0x3] %v5433_v1  ;;  %311 = vst [vmem:[#allocation2 + $0x138] sm:$0xff] %v5433_v1  ;;  %4247 = vmatprep.subr.bf16.mxu0 %v7570_v0  ;;  %v347_v53 = vld [vmem:[%s5654_s12 + $0xa8] sm:$0xff]  ;;  %v348_v54 = vld [vmem:[%s5654_s12 + $0xb0] sm:$0xff]  ;;  %v4260_v56 = vpack.c.bf16 %v464_v51, %v463_v49 }
  0x81   : > { %312 = vst [vmem:[#allocation2 + $0x140] sm:$0xff] %v5433_v1  ;;  %313 = vst [vmem:[#allocation2 + $0x148] sm:$0x3] %v5433_v1  ;;  %v349_v55 = vld [vmem:[%s5654_s12 + $0xb8] sm:$0xff]  ;;  %v350_v57 = vld [vmem:[%s5654_s12 + $0xc0] sm:$0xff] }
  0x82   : > { %314 = vst [vmem:[#allocation2 + $0x150] sm:$0xff] %v5433_v1  ;;  %315 = vst [vmem:[#allocation2 + $0x158] sm:$0xff] %v5433_v1  ;;  %v465_v58 = vld [vmem:[#allocation7 + $0xa0] sm:$0xff]  ;;  %v466_v59 = vld [vmem:[#allocation7 + $0xa8] sm:$0xff] }
  0x83   : > { %316 = vst [vmem:[#allocation2 + $0x160] sm:$0x3] %v5433_v1  ;;  %317 = vst [vmem:[#allocation2 + $0x168] sm:$0xff] %v5433_v1  ;;  %4249 = vmatpush1.bf16.msra.mxu0 %v4248_v32  ;;  %v351_v60 = vld [vmem:[%s5654_s12 + $0xc8] sm:$0xff]  ;;  %v352_v61 = vld [vmem:[%s5654_s12 + $0xd0] sm:$0xff]  ;;  %v4263_v63 = vpack.c.bf16 %v466_v59, %v465_v58 }
  0x84   : > { %318 = vst [vmem:[#allocation2 + $0x170] sm:$0xff] %v5433_v1  ;;  %319 = vst [vmem:[#allocation2 + $0x178] sm:$0x3] %v5433_v1  ;;  %4250 = vmatprep.subr.bf16.mxu0 %v7570_v0  ;;  %v353_v62 = vld [vmem:[%s5654_s12 + $0xd8] sm:$0xff]  ;;  %v467_v3 = vld [vmem:[#allocation7 + $0xb0] sm:$0xff] }
  0x85   : > { %320 = vst [vmem:[#allocation2 + $0x180] sm:$0xff] %v5433_v1  ;;  %321 = vst [vmem:[#allocation2 + $0x188] sm:$0xff] %v5433_v1  ;;  %v468_v4 = vld [vmem:[#allocation7 + $0xb8] sm:$0xff]  ;;  %v469_v6 = vld [vmem:[#allocation7 + $0xc0] sm:$0xff] }
  0x86   : > { %322 = vst [vmem:[#allocation2 + $0x190] sm:$0x3] %v5433_v1  ;;  %325 = vst [vmem:[#allocation2 + $0x1a8] sm:$0x3] %v5433_v1  ;;  %v4266_v5 = vpack.c.bf16 %v468_v4, %v467_v3  ;;  %v470_v7 = vld [vmem:[#allocation7 + $0xc8] sm:$0xff]  ;;  %v354_v8 = vld [vmem:[%s5654_s12 + $0xe0] sm:$0xff] }
  0x87   : > { %2063 = vst [vmem:[#allocation3 + $0x10] sm:$0x3] %v5433_v1  ;;  %2064 = vst [vmem:[#allocation3 + $0x18] sm:$0xff] %v5433_v1  ;;  %4252 = vmatpush1.bf16.msra.mxu0 %v4251_v37  ;;  %v355_v9 = vld [vmem:[%s5654_s12 + $0xe8] sm:$0xff]  ;;  %v4269_v10 = vpack.c.bf16 %v470_v7, %v469_v6  ;;  %v471_v11 = vld [vmem:[#allocation7 + $0xd0] sm:$0xff] }
  0x88   : > { %2065 = vst [vmem:[#allocation3 + $0x20] sm:$0xff] %v5433_v1  ;;  %2066 = vst [vmem:[#allocation3 + $0x28] sm:$0x3] %v5433_v1  ;;  %4253 = vmatprep.subr.bf16.mxu0 %v7570_v0  ;;  %v472_v12 = vld [vmem:[#allocation7 + $0xd8] sm:$0xff]  ;;  %v473_v14 = vld [vmem:[#allocation7 + $0xe0] sm:$0xff] }
  0x89   : > { %2067 = vst [vmem:[#allocation3 + $0x30] sm:$0xff] %v5433_v1  ;;  %2068 = vst [vmem:[#allocation3 + $0x38] sm:$0xff] %v5433_v1  ;;  %v4272_v13 = vpack.c.bf16 %v472_v12, %v471_v11  ;;  %v475_v17 = vld [vmem:[#allocation7 + $0xf0] sm:$0xff]  ;;  %v484_v44 = vld [vmem:[#allocation7 + $0x138] sm:$0xff] }
  0x8a   : > { %2069 = vst [vmem:[#allocation3 + $0x40] sm:$0x3] %v5433_v1  ;;  %2070 = vst [vmem:[#allocation3 + $0x48] sm:$0xff] %v5433_v1  ;;  %v483_v43 = vld [vmem:[#allocation7 + $0x130] sm:$0xff]  ;;  %v486_v49 = vld [vmem:[#allocation7 + $0x148] sm:$0xff] }
  0x8b   : > { %2071 = vst [vmem:[#allocation3 + $0x50] sm:$0xff] %v5433_v1  ;;  %2072 = vst [vmem:[#allocation3 + $0x58] sm:$0x3] %v5433_v1  ;;  %4255 = vmatpush1.bf16.msra.mxu0 %v4254_v41  ;;  %v487_v58 = vld [vmem:[#allocation7 + $0x150] sm:$0xff]  ;;  %v488_v59 = vld [vmem:[#allocation7 + $0x158] sm:$0xff] }
  0x8c   : > { %2073 = vst [vmem:[#allocation3 + $0x60] sm:$0xff] %v5433_v1  ;;  %2074 = vst [vmem:[#allocation3 + $0x68] sm:$0xff] %v5433_v1  ;;  %4256 = vmatprep.subr.bf16.mxu0 %v7570_v0  ;;  %v490_v6 = vld [vmem:[#allocation7 + $0x168] sm:$0xff] }
  0x8d   : > { %2075 = vst [vmem:[#allocation3 + $0x70] sm:$0x3] %v5433_v1  ;;  %2076 = vst [vmem:[#allocation3 + $0x78] sm:$0xff] %v5433_v1 }
  0x8e   : > { %2077 = vst [vmem:[#allocation3 + $0x80] sm:$0xff] %v5433_v1  ;;  %2078 = vst [vmem:[#allocation3 + $0x88] sm:$0x3] %v5433_v1 }
  0x8f   : > { %2079 = vst [vmem:[#allocation3 + $0x90] sm:$0xff] %v5433_v1  ;;  %2080 = vst [vmem:[#allocation3 + $0x98] sm:$0xff] %v5433_v1  ;;  %4258 = vmatpush1.bf16.msra.mxu0 %v4257_v48  ;;  %v485_v48 = vld [vmem:[#allocation7 + $0x140] sm:$0xff] }
  0x90   : > { %2081 = vst [vmem:[#allocation3 + $0xa0] sm:$0x3] %v5433_v1  ;;  %2082 = vst [vmem:[#allocation3 + $0xa8] sm:$0xff] %v5433_v1  ;;  %4259 = vmatprep.subr.bf16.mxu0 %v7570_v0 }
  0x91   : > { %2083 = vst [vmem:[#allocation3 + $0xb0] sm:$0xff] %v5433_v1  ;;  %2084 = vst [vmem:[#allocation3 + $0xb8] sm:$0x3] %v5433_v1 }
  0x92   : > { %2085 = vst [vmem:[#allocation3 + $0xc0] sm:$0xff] %v5433_v1  ;;  %2086 = vst [vmem:[#allocation3 + $0xc8] sm:$0xff] %v5433_v1 }
  0x93   : > { %2087 = vst [vmem:[#allocation3 + $0xd0] sm:$0x3] %v5433_v1  ;;  %2088 = vst [vmem:[#allocation3 + $0xd8] sm:$0xff] %v5433_v1  ;;  %4261 = vmatpush1.bf16.msra.mxu0 %v4260_v56 }
  0x94   : > { %2089 = vst [vmem:[#allocation3 + $0xe0] sm:$0xff] %v5433_v1  ;;  %2090 = vst [vmem:[#allocation3 + $0xe8] sm:$0x3] %v5433_v1  ;;  %4262 = vmatprep.subr.bf16.mxu0 %v7570_v0 }
  0x95   : > { %2091 = vst [vmem:[#allocation3 + $0xf0] sm:$0xff] %v5433_v1  ;;  %2092 = vst [vmem:[#allocation3 + $0xf8] sm:$0xff] %v5433_v1 }
  0x96   : > { %2093 = vst [vmem:[#allocation3 + $0x100] sm:$0x3] %v5433_v1  ;;  %2094 = vst [vmem:[#allocation3 + $0x108] sm:$0xff] %v5433_v1 }
  0x97   : > { %2095 = vst [vmem:[#allocation3 + $0x110] sm:$0xff] %v5433_v1  ;;  %2096 = vst [vmem:[#allocation3 + $0x118] sm:$0x3] %v5433_v1  ;;  %4264 = vmatpush1.bf16.msra.mxu0 %v4263_v63 }
  0x98   : > { %2097 = vst [vmem:[#allocation3 + $0x120] sm:$0xff] %v5433_v1  ;;  %2098 = vst [vmem:[#allocation3 + $0x128] sm:$0xff] %v5433_v1  ;;  %4265 = vmatprep.subr.bf16.mxu0 %v7570_v0 }
  0x99   : > { %2099 = vst [vmem:[#allocation3 + $0x130] sm:$0x3] %v5433_v1  ;;  %2100 = vst [vmem:[#allocation3 + $0x138] sm:$0xff] %v5433_v1 }
  0x9a   : > { %2101 = vst [vmem:[#allocation3 + $0x140] sm:$0xff] %v5433_v1  ;;  %2102 = vst [vmem:[#allocation3 + $0x148] sm:$0x3] %v5433_v1 }
  0x9b   : > { %2103 = vst [vmem:[#allocation3 + $0x150] sm:$0xff] %v5433_v1  ;;  %2104 = vst [vmem:[#allocation3 + $0x158] sm:$0xff] %v5433_v1  ;;  %4267 = vmatpush1.bf16.msra.mxu0 %v4266_v5  ;;  %v489_v5 = vld [vmem:[#allocation7 + $0x160] sm:$0xff] }
  0x9c   : > { %2105 = vst [vmem:[#allocation3 + $0x160] sm:$0x3] %v5433_v1  ;;  %2106 = vst [vmem:[#allocation3 + $0x168] sm:$0xff] %v5433_v1  ;;  %4268 = vmatprep.subr.bf16.mxu0 %v7570_v0 }
  0x9d   : > { %2107 = vst [vmem:[#allocation3 + $0x170] sm:$0xff] %v5433_v1  ;;  %2108 = vst [vmem:[#allocation3 + $0x178] sm:$0x3] %v5433_v1 }
  0x9e   : > { %2109 = vst [vmem:[#allocation3 + $0x180] sm:$0xff] %v5433_v1  ;;  %2110 = vst [vmem:[#allocation3 + $0x188] sm:$0xff] %v5433_v1 }
  0x9f   : > { %2111 = vst [vmem:[#allocation3 + $0x190] sm:$0x3] %v5433_v1  ;;  %2114 = vst [vmem:[#allocation3 + $0x1a8] sm:$0x3] %v5433_v1  ;;  %4270 = vmatpush1.bf16.msra.mxu0 %v4269_v10  ;;  %v4299_v10 = vpack.c.bf16 %v490_v6, %v489_v5 }
  0xa0   : > { %359 = vst [vmem:[#allocation2 + $0x19] sm:$0xff] %v326_v15  ;;  %360 = vst [vmem:[#allocation2 + $0x21] sm:$0xff] %v327_v18  ;;  %4271 = vmatprep.subr.bf16.mxu0 %v7570_v0  ;;  %v474_v15 = vld [vmem:[#allocation7 + $0xe8] sm:$0xff]  ;;  %v476_v18 = vld [vmem:[#allocation7 + $0xf8] sm:$0xff] }
  0xa1   : > { %361 = vst [vmem:[#allocation2 + $0x31] sm:$0xff] %v328_v19  ;;  %362 = vst [vmem:[#allocation2 + $0x39] sm:$0xff] %v329_v20  ;;  %v4275_v16 = vpack.c.bf16 %v474_v15, %v473_v14  ;;  %v5814_v19 = vld [vmem:[#allocation2 + $0x10] sm:$0x3]  ;;  %v4278_v20 = vpack.c.bf16 %v476_v18, %v475_v17  ;;  %v492_v15 = vld [vmem:[#allocation7 + $0x178] sm:$0xff] }
  0xa2   : > { %363 = vst [vmem:[#allocation2 + $0x49] sm:$0xff] %v330_v21  ;;  %364 = vst [vmem:[#allocation2 + $0x51] sm:$0xff] %v331_v22  ;;  %v477_v21 = vld [vmem:[#allocation7 + $0x100] sm:$0xff]  ;;  %v478_v22 = vld [vmem:[#allocation7 + $0x108] sm:$0xff]  ;;  %v642_v23 = vrot.slane %v5814_v19, 1 }
  0xa3   : > { %365 = vst [vmem:[#allocation2 + $0x61] sm:$0xff] %v332_v24  ;;  %366 = vst [vmem:[#allocation2 + $0x69] sm:$0xff] %v333_v27  ;;  %4273 = vmatpush1.bf16.msra.mxu0 %v4272_v13  ;;  %v4281_v26 = vpack.c.bf16 %v478_v22, %v477_v21  ;;  %v491_v14 = vld [vmem:[#allocation7 + $0x170] sm:$0xff]  ;;  %v493_v21 = vld [vmem:[#allocation7 + $0x180] sm:$0xff] }
  0xa4   : > { %367 = vst [vmem:[#allocation2 + $0x79] sm:$0xff] %v334_v28  ;;  %368 = vst [vmem:[#allocation2 + $0x81] sm:$0xff] %v335_v29  ;;  %4274 = vmatprep.subr.bf16.mxu0 %v7570_v0  ;;  %v643_v27 = vsel %vm638_vm0, %v5667_v2, %v642_v23  ;;  %v4302_v17 = vpack.c.bf16 %v492_v15, %v491_v14  ;;  %v494_v22 = vld [vmem:[#allocation7 + $0x188] sm:$0xff] }
  0xa5   : > { %369 = vst [vmem:[#allocation2 + $0x91] sm:$0xff] %v336_v30  ;;  %370 = vst [vmem:[#allocation2 + $0x99] sm:$0xff] %v337_v31  ;;  %v479_v30 = vld [vmem:[#allocation7 + $0x110] sm:$0xff]  ;;  %v480_v31 = vld [vmem:[#allocation7 + $0x118] sm:$0xff] }
  0xa6   : > { %371 = vst [vmem:[#allocation2 + $0xa9] sm:$0xff] %v338_v35  ;;  %372 = vst [vmem:[#allocation2 + $0xb1] sm:$0xff] %v339_v36  ;;  %v4284_v33 = vpack.c.bf16 %v480_v31, %v479_v30  ;;  %v481_v35 = vld [vmem:[#allocation7 + $0x120] sm:$0xff]  ;;  %v482_v36 = vld [vmem:[#allocation7 + $0x128] sm:$0xff] }
  0xa7   : > { %373 = vst [vmem:[#allocation2 + $0xc1] sm:$0xff] %v340_v40  ;;  %374 = vst [vmem:[#allocation2 + $0xc9] sm:$0xff] %v341_v42  ;;  %4276 = vmatpush1.bf16.msra.mxu0 %v4275_v16  ;;  %v5818_v24 = vld [vmem:[#allocation2 + $0x18] sm:$0xff]  ;;  %v5820_v25 = vld [vmem:[#allocation2 + $0x20] sm:$0xff]  ;;  %v4287_v39 = vpack.c.bf16 %v482_v36, %v481_v35 }
  0xa8   : > { %375 = vst [vmem:[#allocation2 + $0xd9] sm:$0xff] %v342_v45  ;;  %376 = vst [vmem:[#allocation2 + $0xe1] sm:$0xff] %v343_v46  ;;  %4277 = vmatprep.subr.bf16.mxu0 %v7570_v0  ;;  %v644_v28 = vrot.slane %v5818_v24, 1  ;;  %v645_v29 = vrot.slane %v5820_v25, 1  ;;  %v5827_v32 = vld [vmem:[#allocation2 + $0x28] sm:$0x3] }
  0xa9   : > { %377 = vst [vmem:[#allocation2 + $0xf1] sm:$0xff] %v344_v47  ;;  %378 = vst [vmem:[#allocation2 + $0xf9] sm:$0xff] %v345_v50  ;;  %v647_v2 = vrot.slane %v5827_v32, 1  ;;  %v5835_v37 = vld [vmem:[#allocation2 + $0x30] sm:$0xff]  ;;  %v5837_v38 = vld [vmem:[#allocation2 + $0x38] sm:$0xff] }
  0xaa   : > { %379 = vst [vmem:[#allocation2 + $0x109] sm:$0xff] %v346_v52  ;;  %380 = vst [vmem:[#allocation2 + $0x111] sm:$0xff] %v347_v53  ;;  %v5831_v34 = vsel %vm638_vm0, %v644_v28, %v645_v29  ;;  %v649_v41 = vrot.slane %v5835_v37, 1  ;;  %v650_v42 = vrot.slane %v5837_v38, 1  ;;  %v399_v45 = vld [vmem:[#allocation2 + $0x40] sm:$0x3]  ;;  %v4293_v52 = vpack.c.bf16 %v486_v49, %v485_v48 }
  0xab   : > { %381 = vst [vmem:[#allocation2 + $0x121] sm:$0xff] %v348_v54  ;;  %382 = vst [vmem:[#allocation2 + $0x129] sm:$0xff] %v349_v55  ;;  %4279 = vmatpush1.bf16.msra.mxu0 %v4278_v20  ;;  %v5842_v40 = vsel %vm638_vm0, %v645_v29, %v647_v2  ;;  %v652_v47 = vrot.slane %v399_v45, 1  ;;  %v5853_v50 = vld [vmem:[#allocation2 + $0x48] sm:$0xff]  ;;  %v5855_v51 = vld [vmem:[#allocation2 + $0x50] sm:$0xff]  ;;  %v762_v53 = vrot.slane %v5835_v37, 2 }
  0xac   : > { %383 = vst [vmem:[#allocation2 + $0x139] sm:$0xff] %v350_v57  ;;  %384 = vst [vmem:[#allocation2 + $0x141] sm:$0xff] %v351_v60  ;;  %4280 = vmatprep.subr.bf16.mxu0 %v7570_v0  ;;  %v5850_v46 = vsel %vm638_vm0, %v649_v41, %v650_v42  ;;  %v763_v54 = vrot.slane %v5837_v38, 2  ;;  %v654_v56 = vrot.slane %v5853_v50, 1  ;;  %v655_v57 = vrot.slane %v5855_v51, 1  ;;  %v5880_v7 = vld [vmem:[#allocation2 + $0x60] sm:$0xff] }
  0xad   : > { %385 = vst [vmem:[#allocation2 + $0x151] sm:$0xff] %v352_v61  ;;  %386 = vst [vmem:[#allocation2 + $0x159] sm:$0xff] %v353_v62  ;;  %v5862_v55 = vsel %vm638_vm0, %v650_v42, %v652_v47  ;;  %v5867_v60 = vld [vmem:[#allocation2 + $0x58] sm:$0x3]  ;;  %v4296_v62 = vpack.c.bf16 %v488_v59, %v487_v58  ;;  %v765_v63 = vrot.slane %v399_v45, 2  ;;  %v659_v12 = vrot.slane %v5880_v7, 1 }
  0xae   : > { %387 = vst [vmem:[#allocation2 + $0x169] sm:$0xff] %v354_v8  ;;  %388 = vst [vmem:[#allocation2 + $0x171] sm:$0xff] %v355_v9  ;;  %969 = vmatmul.mubr.f32.vlgmr.msra.gmra.mrb[0].mxu0 %v5433_v1  ;;  %v5870_v61 = vsel %vm751_vm1, %v762_v53, %v763_v54  ;;  %v5876_v3 = vsel %vm638_vm0, %v654_v56, %v655_v57  ;;  %v657_v4 = vrot.slane %v5867_v60, 1  ;;  %v5882_v8 = vld [vmem:[#allocation2 + $0x68] sm:$0xff]  ;;  %v5895_v16 = vld [vmem:[#allocation2 + $0x70] sm:$0x3] }
  0xaf   : > { %4282 = vmatpush1.bf16.msra.mxu0 %v4281_v26  ;;  %973 = vmatprep.mubr.f32.mxu0 %v643_v27  ;;  %7724 = vst [vmem:[#allocation14_spill] sm:$0xff] %v5876_v3  ;;  %v5885_v9 = vsel %vm751_vm1, %v763_v54, %v765_v63  ;;  %v660_v13 = vrot.slane %v5882_v8, 1  ;;  %v662_v20 = vrot.slane %v5895_v16, 1  ;;  %v5904_v23 = vld [vmem:[#allocation2 + $0x78] sm:$0xff]  ;;  %v5906_v26 = vld [vmem:[#allocation2 + $0x80] sm:$0xff]  ;;  %v4305_v27 = vpack.c.bf16 %v494_v22, %v493_v21  ;;  %v495_v31 = vld [vmem:[#allocation7 + $0x190] sm:$0xff] }
  0xb0   : > { %4283 = vmatprep.subr.bf16.mxu0 %v7570_v0  ;;  %4104 = vmatprep.mubr.f32.mxu1 %v5870_v61  ;;  %v5890_v11 = vsel %vm638_vm0, %v655_v57, %v657_v4  ;;  %v664_v29 = vrot.slane %v5904_v23, 1  ;;  %v665_v30 = vrot.slane %v5906_v26, 1  ;;  %v5916_v2 = vld [vmem:[#allocation2 + $0x88] sm:$0x3]  ;;  %v497_v41 = vld [vmem:[#allocation7 + $0x1a0] sm:$0xff]  ;;  %v499_v49 = vld [vmem:[#allocation7 + $0x1b0] sm:$0xff] }
  0xb1   : > { %7725 = vst [vmem:[#allocation15_spill] sm:$0xff] %v5890_v11  ;;  %v5900_v18 = vsel %vm638_vm0, %v659_v12, %v660_v13  ;;  %v5911_v28 = vsel %vm638_vm0, %v660_v13, %v662_v20  ;;  %v498_v42 = vld [vmem:[#allocation7 + $0x1a8] sm:$0xff]  ;;  %v5937_v53 = vld [vmem:[#allocation2 + $0xa0] sm:$0x3]  ;;  %v5948_v63 = vld [vmem:[#allocation2 + $0xb0] sm:$0xff] }
  0xb2   : > { %974 = vmatmul.mubr.f32.gmra.mrb[2].mxu0 %v5433_v1  ;;  %v4290_v1 = vpack.c.bf16 %v484_v44, %v483_v43  ;;  %7726 = vst [vmem:[#allocation16_spill] sm:$0xff] %v5900_v18  ;;  %7727 = vst [vmem:[#allocation17_spill] sm:$0xff] %v5911_v28  ;;  %v5921_v36 = vsel %vm638_vm0, %v664_v29, %v665_v30  ;;  %v5925_v43 = vld [vmem:[#allocation2 + $0x90] sm:$0xff]  ;;  %v5927_v44 = vld [vmem:[#allocation2 + $0x98] sm:$0xff]  ;;  %v4311_v45 = vpack.c.bf16 %v498_v42, %v497_v41 }
  0xb3   : > { %978 = vmatprep.mubr.f32.mxu0 %v5831_v34  ;;  %4285 = vmatpush1.bf16.msra.mxu0 %v4284_v33  ;;  %v496_v33 = vld [vmem:[#allocation7 + $0x198] sm:$0xff]  ;;  %7728 = vst [vmem:[#allocation18_spill] sm:$0xff] %v5921_v36  ;;  %v669_v47 = vrot.slane %v5925_v43, 1  ;;  %v670_v48 = vrot.slane %v5927_v44, 1  ;;  %v672_v57 = vrot.slane %v5937_v53, 1  ;;  %v501_v58 = vld [vmem:[#allocation7 + $0x1c0] sm:$0xff] }
  0xb4   : > { %4286 = vmatprep.subr.bf16.mxu0 %v7570_v0  ;;  %v4308_v35 = vpack.c.bf16 %v496_v33, %v495_v31  ;;  %v502_v59 = vld [vmem:[#allocation7 + $0x1c8] sm:$0xff]  ;;  %v503_v12 = vld [vmem:[#allocation7 + $0x1d0] sm:$0xff]  ;;  %v504_v13 = vld [vmem:[#allocation7 + $0x1d8] sm:$0xff] }
  0xb5   : > { %v5942_v56 = vsel %vm638_vm0, %v669_v47, %v670_v48  ;;  %v4317_v4 = vpack.c.bf16 %v502_v59, %v501_v58  ;;  %v5953_v5 = vsel %vm638_vm0, %v670_v48, %v672_v57  ;;  %v5958_v14 = vld [vmem:[#allocation2 + $0xb8] sm:$0x3]  ;;  %v4320_v15 = vpack.c.bf16 %v504_v13, %v503_v12  ;;  %v505_v21 = vld [vmem:[#allocation7 + $0x1e0] sm:$0xff]  ;;  %v506_v22 = vld [vmem:[#allocation7 + $0x1e8] sm:$0xff] }
  0xb6   : > { %979 = vmatmul.mubr.f32.gmra.mrb[4].mxu0 %v5818_v24  ;;  %7730 = vst [vmem:[#allocation20_spill] sm:$0xff] %v5942_v56  ;;  %7731 = vst [vmem:[#allocation21_spill] sm:$0xff] %v5953_v5  ;;  %v677_v20 = vrot.slane %v5958_v14, 1  ;;  %v5969_v29 = vld [vmem:[#allocation2 + $0xc8] sm:$0xff]  ;;  %v508_v41 = vld [vmem:[#allocation7 + $0x1f8] sm:$0xff] }
  0xb7   : > { %983 = vmatprep.mubr.f32.mxu0 %v5842_v40  ;;  %4288 = vmatpush1.bf16.msra.mxu0 %v4287_v39  ;;  %v667_v39 = vrot.slane %v5916_v2, 1  ;;  %v5979_v42 = vld [vmem:[#allocation2 + $0xd0] sm:$0x3]  ;;  %v6000_v59 = vld [vmem:[#allocation2 + $0xe8] sm:$0x3]  ;;  %v6010_v12 = vld [vmem:[#allocation2 + $0xf8] sm:$0xff] }
  0xb8   : > { %4289 = vmatprep.subr.bf16.mxu0 %v7570_v0  ;;  %v682_v48 = vrot.slane %v5979_v42, 1 }
  0xba   : > { %984 = vmatmul.mubr.f32.gmra.mrb[6].mxu0 %v5820_v25 }
  0xbb   : > { %988 = vmatprep.mubr.f32.mxu0 %v5850_v46  ;;  %4291 = vmatpush1.bf16.msra.mxu0 %v4290_v1  ;;  %v5932_v1 = vsel %vm638_vm0, %v665_v30, %v667_v39  ;;  %v4323_v30 = vpack.c.bf16 %v506_v22, %v505_v21  ;;  %v507_v39 = vld [vmem:[#allocation7 + $0x1f0] sm:$0xff]  ;;  %v6019_v21 = vld [vmem:[#allocation2 + $0x100] sm:$0x3] }
  0xbc   : > { %4292 = vmatprep.subr.bf16.mxu0 %v7570_v0  ;;  %7729 = vst [vmem:[#allocation19_spill] sm:$0xff] %v5932_v1 }
  0xbe   : > { %989 = vmatmul.mubr.f32.gmra.mrb[8].mxu0 %v5835_v37 }
  0xbf   : > { %993 = vmatprep.mubr.f32.mxu0 %v5862_v55  ;;  %4294 = vmatpush1.bf16.msra.mxu0 %v4293_v52  ;;  %v500_v52 = vld [vmem:[#allocation7 + $0x1b8] sm:$0xff] }
  0xc0   : > { %4295 = vmatprep.subr.bf16.mxu0 %v7570_v0  ;;  %v4314_v54 = vpack.c.bf16 %v500_v52, %v499_v49  ;;  %v5988_v49 = vld [vmem:[#allocation2 + $0xd8] sm:$0xff]  ;;  %v5990_v52 = vld [vmem:[#allocation2 + $0xe0] sm:$0xff] }
  0xc1   : > { %v684_v57 = vrot.slane %v5988_v49, 1  ;;  %v685_v58 = vrot.slane %v5990_v52, 1 }
  0xc2   : > { %994 = vmatmul.mubr.f32.gmra.mrb[10].mxu0 %v5837_v38 }
  0xc3   : > { %998 = vmatprep.mubr.f32.mxu0 %v5876_v3  ;;  %4297 = vmatpush1.bf16.msra.mxu0 %v4296_v62  ;;  %v5946_v62 = vld [vmem:[#allocation2 + $0xa8] sm:$0xff] }
  0xc4   : > { %4298 = vmatprep.subr.bf16.mxu0 %v7570_v0  ;;  %v674_v6 = vrot.slane %v5946_v62, 1 }
  0xc6   : > { %999 = vmatmul.mubr.f32.gmra.mrb[12].mxu0 %v5853_v50 }
  0xc7   : > { %1003 = vmatprep.mubr.f32.mxu0 %v5890_v11  ;;  %4300 = vmatpush1.bf16.msra.mxu0 %v4299_v10  ;;  %v675_v10 = vrot.slane %v5948_v63, 1  ;;  %v7751_v11 = vmov 0.0|0.0  }
  0xc8   : > { %4301 = vmatprep.subr.bf16.mxu0 %v7570_v0 }
  0xc9   : > { %v5974_v31 = vsel %vm638_vm0, %v675_v10, %v677_v20  ;;  %v690_v20 = vrot.slane %v6010_v12, 1 }
  0xca   : > { %1004 = vmatmul.mubr.f32.gmra.mrb[14].mxu0 %v5855_v51  ;;  %7733 = vst [vmem:[#allocation23_spill] sm:$0xff] %v5974_v31 }
  0xcb   : > { %1008 = vmatprep.mubr.f32.mxu0 %v5900_v18  ;;  %4303 = vmatpush1.bf16.msra.mxu0 %v4302_v17  ;;  %v5963_v17 = vsel %vm638_vm0, %v674_v6, %v675_v10  ;;  %v687_v6 = vrot.slane %v6000_v59, 1  ;;  %v6008_v10 = vld [vmem:[#allocation2 + $0xf0] sm:$0xff] }
  0xcc   : > { %4304 = vmatprep.subr.bf16.mxu0 %v7570_v0  ;;  %7732 = vst [vmem:[#allocation22_spill] sm:$0xff] %v5963_v17 }
  0xcd   : > { %v6015_v13 = vsel %vm638_vm0, %v685_v58, %v687_v6  ;;  %v6046_v6 = vld [vmem:[#allocation2 + $0x120] sm:$0xff] }
  0xce   : > { %1009 = vmatmul.mubr.f32.gmra.mrb[16].mxu0 %v5880_v7  ;;  %7737 = vst [vmem:[#allocation27_spill] sm:$0xff] %v6015_v13 }
  0xcf   : > { %1013 = vmatprep.mubr.f32.mxu0 %v5911_v28  ;;  %4306 = vmatpush1.bf16.msra.mxu0 %v4305_v27  ;;  %v5967_v27 = vld [vmem:[#allocation2 + $0xc0] sm:$0xff]  ;;  %v758_v28 = vrot.slane %v5820_v25, 2 }
  0xd0   : > { %4307 = vmatprep.subr.bf16.mxu0 %v7570_v0  ;;  %v679_v33 = vrot.slane %v5967_v27, 1 }
  0xd2   : > { %1014 = vmatmul.mubr.f32.gmra.mrb[18].mxu0 %v5882_v8 }
  0xd3   : > { %1018 = vmatprep.mubr.f32.mxu0 %v5921_v36  ;;  %4309 = vmatpush1.bf16.msra.mxu0 %v4308_v35  ;;  %v680_v35 = vrot.slane %v5969_v29, 1  ;;  %v357_v36 = vld [vmem:[%s5654_s12 + $0xf8] sm:$0xff] }
  0xd4   : > { %4310 = vmatprep.subr.bf16.mxu0 %v7570_v0  ;;  %390 = vst [vmem:[#allocation2 + $0x189] sm:$0xff] %v357_v36 }
  0xd5   : > { %v5984_v47 = vsel %vm638_vm0, %v679_v33, %v680_v35  ;;  %v6027_v33 = vld [vmem:[#allocation2 + $0x108] sm:$0xff] }
  0xd6   : > { %1019 = vmatmul.mubr.f32.gmra.mrb[20].mxu0 %v5904_v23  ;;  %7734 = vst [vmem:[#allocation24_spill] sm:$0xff] %v5984_v47 }
  0xd7   : > { %1023 = vmatprep.mubr.f32.mxu0 %v5932_v1  ;;  %4312 = vmatpush1.bf16.msra.mxu0 %v4311_v45  ;;  %v4326_v45 = vpack.c.bf16 %v508_v41, %v507_v39  ;;  %v694_v41 = vrot.slane %v6027_v33, 1 }
  0xd8   : > { %4313 = vmatprep.subr.bf16.mxu0 %v7570_v0 }
  0xda   : > { %1024 = vmatmul.mubr.f32.gmra.mrb[22].mxu0 %v5906_v26 }
  0xdb   : > { %1028 = vmatprep.mubr.f32.mxu0 %v5942_v56  ;;  %4315 = vmatpush1.bf16.msra.mxu0 %v4314_v54  ;;  %v5995_v54 = vsel %vm638_vm0, %v680_v35, %v682_v48  ;;  %v6029_v35 = vld [vmem:[#allocation2 + $0x110] sm:$0xff]  ;;  %v6038_v48 = vld [vmem:[#allocation2 + $0x118] sm:$0x3] }
  0xdc   : > { %4316 = vmatprep.subr.bf16.mxu0 %v7570_v0  ;;  %7735 = vst [vmem:[#allocation25_spill] sm:$0xff] %v5995_v54  ;;  %v6115_v56 = vld [vmem:[#allocation2 + $0x178] sm:$0x3] }
  0xde   : > { %1029 = vmatmul.mubr.f32.gmra.mrb[24].mxu0 %v5925_v43 }
  0xdf   : > { %1033 = vmatprep.mubr.f32.mxu0 %v5953_v5  ;;  %4318 = vmatpush1.bf16.msra.mxu0 %v4317_v4  ;;  %v6005_v4 = vsel %vm638_vm0, %v684_v57, %v685_v58  ;;  %v697_v58 = vrot.slane %v6038_v48, 1 }
  0xe0   : > { %4319 = vmatprep.subr.bf16.mxu0 %v7570_v0  ;;  %7736 = vst [vmem:[#allocation26_spill] sm:$0xff] %v6005_v4 }
  0xe2   : > { %1034 = vmatmul.mubr.f32.gmra.mrb[26].mxu0 %v5927_v44 }
  0xe3   : > { %1038 = vmatprep.mubr.f32.mxu0 %v5963_v17  ;;  %4321 = vmatpush1.bf16.msra.mxu0 %v4320_v15  ;;  %v689_v15 = vrot.slane %v6008_v10, 1  ;;  %v6103_v17 = vld [vmem:[#allocation2 + $0x168] sm:$0xff] }
  0xe4   : > { %4322 = vmatprep.subr.bf16.mxu0 %v7570_v0  ;;  %v714_v5 = vrot.slane %v6103_v17, 1 }
  0xe5   : > { %v6024_v22 = vsel %vm638_vm0, %v689_v15, %v690_v20  ;;  %v6048_v15 = vld [vmem:[#allocation2 + $0x128] sm:$0xff] }
  0xe6   : > { %1039 = vmatmul.mubr.f32.gmra.mrb[28].mxu0 %v5946_v62  ;;  %7738 = vst [vmem:[#allocation28_spill] sm:$0xff] %v6024_v22 }
  0xe7   : > { %1043 = vmatprep.mubr.f32.mxu0 %v5974_v31  ;;  %4324 = vmatpush1.bf16.msra.mxu0 %v4323_v30  ;;  %v692_v30 = vrot.slane %v6019_v21, 1 }
  0xe8   : > { %4325 = vmatprep.subr.bf16.mxu0 %v7570_v0 }
  0xe9   : > { %v6034_v39 = vsel %vm638_vm0, %v690_v20, %v692_v30  ;;  %v699_v30 = vrot.slane %v6046_v6, 1 }
  0xea   : > { %1044 = vmatmul.mubr.f32.gmra.mrb[30].mxu0 %v5948_v63  ;;  %7739 = vst [vmem:[#allocation29_spill] sm:$0xff] %v6034_v39 }
  0xeb   : > { %1048 = vmatprep.mubr.f32.mxu0 %v5984_v47  ;;  %4327 = vmatpush1.bf16.msra.mxu0 %v4326_v45  ;;  %v695_v45 = vrot.slane %v6029_v35, 1  ;;  %v6084_v47 = vld [vmem:[#allocation2 + $0x150] sm:$0xff] }
  0xec   : > { %4328 = vmatprep.subr.bf16.mxu0 %v7570_v0  ;;  %v700_v0 = vrot.slane %v6048_v15, 1 }
  0xed   : > { %v6043_v57 = vsel %vm638_vm0, %v694_v41, %v695_v45  ;;  %v6053_v20 = vsel %vm638_vm0, %v695_v45, %v697_v58 }
  0xee   : > { %1049 = vmatmul.mubr.f32.gmra.mrb[32].mxu0 %v5967_v27  ;;  %7740 = vst [vmem:[#allocation30_spill] sm:$0xff] %v6043_v57  ;;  %7741 = vst [vmem:[#allocation31_spill] sm:$0xff] %v6053_v20  ;;  %v6062_v41 = vsel %vm638_vm0, %v699_v30, %v700_v0 }
  0xef   : > { %1053 = vmatprep.mubr.f32.mxu0 %v5995_v54  ;;  %7742 = vst [vmem:[#allocation32_spill] sm:$0xff] %v6062_v41 }
  0xf2   : > { %1054 = vmatmul.mubr.f32.gmra.mrb[34].mxu0 %v5969_v29 }
  0xf3   : > { %1058 = vmatprep.mubr.f32.mxu0 %v6005_v4  ;;  %v6076_v4 = vld [vmem:[#allocation2 + $0x148] sm:$0x3] }
  0xf4   : > { %v707_v54 = vrot.slane %v6076_v4, 1 }
  0xf6   : > { %1059 = vmatmul.mubr.f32.gmra.mrb[36].mxu0 %v5988_v49 }
  0xf7   : > { %1063 = vmatprep.mubr.f32.mxu0 %v6015_v13  ;;  %v6065_v13 = vld [vmem:[#allocation2 + $0x138] sm:$0xff] }
  0xf8   : > { %v704_v58 = vrot.slane %v6065_v13, 1 }
  0xfa   : > { %1064 = vmatmul.mubr.f32.gmra.mrb[38].mxu0 %v5990_v52 }
  0xfb   : > { %1068 = vmatprep.mubr.f32.mxu0 %v6024_v22 }
  0xfe   : > { %1069 = vmatmul.mubr.f32.gmra.mrb[40].mxu0 %v6008_v10 }
  0xff   : > { %1073 = vmatprep.mubr.f32.mxu0 %v6034_v39  ;;  %v6057_v39 = vld [vmem:[#allocation2 + $0x130] sm:$0x3] }
 0x100   : > { %v702_v22 = vrot.slane %v6057_v39, 1 }
 0x102   : > { %1074 = vmatmul.mubr.f32.gmra.mrb[42].mxu0 %v6010_v12  ;;  %v6072_v45 = vsel %vm638_vm0, %v700_v0, %v702_v22  ;;  %v709_v22 = vrot.slane %v6084_v47, 1 }
 0x103   : > { %1078 = vmatprep.mubr.f32.mxu0 %v6043_v57  ;;  %v6067_v57 = vld [vmem:[#allocation2 + $0x140] sm:$0xff]  ;;  %7743 = vst [vmem:[#allocation33_spill] sm:$0xff] %v6072_v45 }
 0x106   : > { %1079 = vmatmul.mubr.f32.gmra.mrb[44].mxu0 %v6027_v33 }
 0x107   : > { %1083 = vmatprep.mubr.f32.mxu0 %v6053_v20  ;;  %v705_v20 = vrot.slane %v6067_v57, 1 }
 0x109   : > { %v6081_v30 = vsel %vm638_vm0, %v704_v58, %v705_v20  ;;  %v6091_v0 = vsel %vm638_vm0, %v705_v20, %v707_v54  ;;  %v6095_v58 = vld [vmem:[#allocation2 + $0x160] sm:$0x3]  ;;  %v6105_v54 = vld [vmem:[#allocation2 + $0x170] sm:$0xff] }
 0x10a   : > { %1084 = vmatmul.mubr.f32.gmra.mrb[46].mxu0 %v6029_v35  ;;  %7744 = vst [vmem:[#allocation34_spill] sm:$0xff] %v6081_v30  ;;  %7745 = vst [vmem:[#allocation35_spill] sm:$0xff] %v6091_v0 }
 0x10b   : > { %1088 = vmatprep.mubr.f32.mxu0 %v6062_v41  ;;  %v6086_v41 = vld [vmem:[#allocation2 + $0x158] sm:$0xff] }
 0x10e   : > { %1089 = vmatmul.mubr.f32.gmra.mrb[48].mxu0 %v6046_v6 }
 0x10f   : > { %1093 = vmatprep.mubr.f32.mxu0 %v6072_v45  ;;  %v710_v45 = vrot.slane %v6086_v41, 1 }
 0x111   : > { %v6100_v31 = vsel %vm638_vm0, %v709_v22, %v710_v45  ;;  %v356_v22 = vld [vmem:[%s5654_s12 + $0xf0] sm:$0xff] }
 0x112   : > { %1094 = vmatmul.mubr.f32.gmra.mrb[50].mxu0 %v6048_v15  ;;  %7746 = vst [vmem:[#allocation36_spill] sm:$0xff] %v6100_v31  ;;  %389 = vst [vmem:[#allocation2 + $0x181] sm:$0xff] %v356_v22 }
 0x113   : > { %1098 = vmatprep.mubr.f32.mxu0 %v6081_v30  ;;  %v712_v30 = vrot.slane %v6095_v58, 1 }
 0x115   : > { %v6110_v20 = vsel %vm638_vm0, %v710_v45, %v712_v30  ;;  %v6130_v30 = vld [vmem:[#allocation2] sm:$0xff] }
 0x116   : > { %1099 = vmatmul.mubr.f32.gmra.mrb[52].mxu0 %v6065_v13  ;;  %7747 = vst [vmem:[#allocation37_spill] sm:$0xff] %v6110_v20  ;;  %7750 = vst [vmem:[#allocation40_spill] sm:$0xff] %v6130_v30  ;;  %v6133_v22 = vrot.slane %v6130_v30, 2 }
 0x117   : > { %1103 = vmatprep.mubr.f32.mxu0 %v6091_v0  ;;  %v715_v0 = vrot.slane %v6105_v54, 1 }
 0x119   : > { %v6120_v1 = vsel %vm638_vm0, %v714_v5, %v715_v0  ;;  %v509_v5 = vld [vmem:[#allocation7 + $0x200] sm:$0xff] }
 0x11a   : > { %1104 = vmatmul.mubr.f32.gmra.mrb[54].mxu0 %v6067_v57  ;;  %7748 = vst [vmem:[#allocation38_spill] sm:$0xff] %v6120_v1 }
 0x11b   : > { %1108 = vmatprep.mubr.f32.mxu0 %v6100_v31  ;;  %v717_v31 = vrot.slane %v6115_v56, 1 }
 0x11d   : > { %v6127_v45 = vsel %vm638_vm0, %v715_v0, %v717_v31  ;;  %v511_v31 = vld [vmem:[#allocation7 + $0x210] sm:$0xff]  ;;  %v512_v0 = vld [vmem:[#allocation7 + $0x218] sm:$0xff] }
 0x11e   : > { %1109 = vmatmul.mubr.f32.gmra.mrb[56].mxu0 %v6084_v47  ;;  %7749 = vst [vmem:[#allocation39_spill] sm:$0xff] %v6127_v45  ;;  %v4332_v18 = vpack.c.bf16 %v512_v0, %v511_v31  ;;  %v520_v31 = vld [vmem:[#allocation7 + $0x258] sm:$0xff]  ;;  %v521_v0 = vld [vmem:[#allocation7 + $0x260] sm:$0xff] }
 0x11f   : > { %1113 = vmatprep.mubr.f32.mxu0 %v6110_v20  ;;  %v510_v20 = vld [vmem:[#allocation7 + $0x208] sm:$0xff] }
 0x120   : > { %v4329_v36 = vpack.c.bf16 %v510_v20, %v509_v5  ;;  %v513_v20 = vld [vmem:[#allocation7 + $0x220] sm:$0xff]  ;;  %v514_v5 = vld [vmem:[#allocation7 + $0x228] sm:$0xff] }
 0x121   : > { %v4335_v3 = vpack.c.bf16 %v514_v5, %v513_v20  ;;  %v522_v20 = vld [vmem:[#allocation7 + $0x268] sm:$0xff] }
 0x122   : > { %1114 = vmatmul.mubr.f32.gmra.mrb[58].mxu0 %v6086_v41 }
 0x123   : > { %1118 = vmatprep.mubr.f32.mxu0 %v6120_v1  ;;  %v755_v1 = vrot.slane %v5814_v19, 2 }
 0x125   : > { %v756_v30 = vsel %vm751_vm1, %v6133_v22, %v755_v1  ;;  %v516_v1 = vld [vmem:[#allocation7 + $0x238] sm:$0xff] }
 0x126   : > { %1119 = vmatmul.mubr.f32.gmra.mrb[60].mxu0 %v6103_v17 }
 0x127   : > { %1123 = vmatprep.mubr.f32.mxu0 %v6127_v45  ;;  %v757_v45 = vrot.slane %v5818_v24, 2 }
 0x129   : > { %v6148_v19 = vsel %vm751_vm1, %v757_v45, %v758_v28  ;;  %v517_v45 = vld [vmem:[#allocation7 + $0x240] sm:$0xff] }
 0x12a   : > { %1124 = vmatmul.mubr.f32.gmra.mrb[62].mxu0 %v6105_v54 }
 0x12b   : > { %1193 = vmatprep.mubr.f32.mxu0 %v5818_v24  ;;  %v515_v24 = vld [vmem:[#allocation7 + $0x230] sm:$0xff] }
 0x12e   : > { %1194 = vmatmul.mubr.f32.vlgmr.msra.gmra.mrb[0].mxu0 %v6133_v22 }
 0x12f   : > { %4330 = vmatpush1.bf16.msra.mxu0 %v4329_v36  ;;  %1198 = vmatprep.mubr.f32.mxu0 %v5820_v25  ;;  %v760_v36 = vrot.slane %v5827_v32, 2 }
 0x130   : > { %4331 = vmatprep.subr.bf16.mxu0 %v7751_v11 }
 0x131   : > { %v6155_v25 = vsel %vm751_vm1, %v758_v28, %v760_v36  ;;  %v770_v36 = vrot.slane %v5867_v60, 2  ;;  %v525_v60 = vld [vmem:[#allocation7 + $0x280] sm:$0xff] }
 0x132   : > { %1199 = vmatmul.mubr.f32.gmra.mrb[2].mxu0 %v756_v30  ;;  %v519_v30 = vld [vmem:[#allocation7 + $0x250] sm:$0xff] }
 0x133   : > { %1203 = vmatprep.mubr.f32.mxu0 %v5835_v37  ;;  %4333 = vmatpush1.bf16.msra.mxu0 %v4332_v18  ;;  %v4338_v37 = vpack.c.bf16 %v516_v1, %v515_v24  ;;  %v518_v18 = vld [vmem:[#allocation7 + $0x248] sm:$0xff]  ;;  %v4344_v28 = vpack.c.bf16 %v520_v31, %v519_v30  ;;  %v4347_v24 = vpack.c.bf16 %v522_v20, %v521_v0  ;;  %v775_v31 = vrot.slane %v5895_v16, 2  ;;  %v529_v16 = vld [vmem:[#allocation7 + $0x2a0] sm:$0xff] }
 0x134   : > { %4334 = vmatprep.subr.bf16.mxu0 %v7751_v11  ;;  %v4341_v32 = vpack.c.bf16 %v518_v18, %v517_v45  ;;  %v773_v45 = vrot.slane %v5882_v8, 2  ;;  %v778_v0 = vrot.slane %v5906_v26, 2 }
 0x136   : > { %1204 = vmatmul.mubr.f32.gmra.mrb[4].mxu0 %v6148_v19 }
 0x137   : > { %1208 = vmatprep.mubr.f32.mxu0 %v5837_v38  ;;  %4336 = vmatpush1.bf16.msra.mxu0 %v4335_v3  ;;  %v767_v38 = vrot.slane %v5853_v50, 2  ;;  %v768_v3 = vrot.slane %v5855_v51, 2 }
 0x138   : > { %4337 = vmatprep.subr.bf16.mxu0 %v7751_v11 }
 0x139   : > { %v6169_v5 = vsel %vm751_vm1, %v767_v38, %v768_v3  ;;  %v6176_v1 = vsel %vm751_vm1, %v768_v3, %v770_v36  ;;  %v6191_v3 = vsel %vm751_vm1, %v773_v45, %v775_v31  ;;  %v530_v36 = vld [vmem:[#allocation7 + $0x2a8] sm:$0xff] }
 0x13a   : > { %1209 = vmatmul.mubr.f32.gmra.mrb[6].mxu0 %v6155_v25 }
 0x13b   : > { %1213 = vmatprep.mubr.f32.mxu0 %v5853_v50  ;;  %4339 = vmatpush1.bf16.msra.mxu0 %v4338_v37  ;;  %v523_v50 = vld [vmem:[#allocation7 + $0x270] sm:$0xff]  ;;  %v772_v37 = vrot.slane %v5880_v7, 2 }
 0x13c   : > { %4340 = vmatprep.subr.bf16.mxu0 %v7751_v11 }
 0x13d   : > { %v6184_v30 = vsel %vm751_vm1, %v772_v37, %v773_v45  ;;  %v782_v45 = vrot.slane %v5925_v43, 2 }
 0x13e   : > { %1214 = vmatmul.mubr.f32.gmra.mrb[8].mxu0 %v5870_v61 }
 0x13f   : > { %1218 = vmatprep.mubr.f32.mxu0 %v5855_v51  ;;  %4342 = vmatpush1.bf16.msra.mxu0 %v4341_v32  ;;  %v524_v51 = vld [vmem:[#allocation7 + $0x278] sm:$0xff]  ;;  %v526_v32 = vld [vmem:[#allocation7 + $0x288] sm:$0xff] }
 0x140   : > { %4343 = vmatprep.subr.bf16.mxu0 %v7751_v11  ;;  %v4350_v18 = vpack.c.bf16 %v524_v51, %v523_v50  ;;  %v4353_v38 = vpack.c.bf16 %v526_v32, %v525_v60  ;;  %v780_v50 = vrot.slane %v5916_v2, 2  ;;  %v4359_v51 = vpack.c.bf16 %v530_v36, %v529_v16  ;;  %v533_v2 = vld [vmem:[#allocation7 + $0x2c0] sm:$0xff]  ;;  %v534_v32 = vld [vmem:[#allocation7 + $0x2c8] sm:$0xff] }
 0x141   : > { %v538_v16 = vld [vmem:[#allocation7 + $0x2e8] sm:$0xff] }
 0x142   : > { %1219 = vmatmul.mubr.f32.gmra.mrb[10].mxu0 %v5885_v9  ;;  %v6206_v37 = vsel %vm751_vm1, %v778_v0, %v780_v50  ;;  %v790_v50 = vrot.slane %v5958_v14, 2 }
 0x143   : > { %1223 = vmatprep.mubr.f32.mxu0 %v5880_v7  ;;  %4345 = vmatpush1.bf16.msra.mxu0 %v4344_v28  ;;  %v527_v7 = vld [vmem:[#allocation7 + $0x290] sm:$0xff]  ;;  %v777_v28 = vrot.slane %v5904_v23, 2 }
 0x144   : > { %4346 = vmatprep.subr.bf16.mxu0 %v7751_v11 }
 0x146   : > { %1224 = vmatmul.mubr.f32.gmra.mrb[12].mxu0 %v6169_v5 }
 0x147   : > { %1228 = vmatprep.mubr.f32.mxu0 %v5882_v8  ;;  %4348 = vmatpush1.bf16.msra.mxu0 %v4347_v24  ;;  %v528_v8 = vld [vmem:[#allocation7 + $0x298] sm:$0xff]  ;;  %v6199_v24 = vsel %vm751_vm1, %v777_v28, %v778_v0  ;;  %v787_v28 = vrot.slane %v5946_v62, 2  ;;  %v788_v0 = vrot.slane %v5948_v63, 2 }
 0x148   : > { %4349 = vmatprep.subr.bf16.mxu0 %v7751_v11  ;;  %v4356_v20 = vpack.c.bf16 %v528_v8, %v527_v7  ;;  %v4365_v7 = vpack.c.bf16 %v534_v32, %v533_v2  ;;  %v798_v2 = vrot.slane %v5990_v52, 2  ;;  %v800_v32 = vrot.slane %v6000_v59, 2 }
 0x149   : > { %v6229_v36 = vsel %vm751_vm1, %v787_v28, %v788_v0  ;;  %v805_v59 = vrot.slane %v6019_v21, 2  ;;  %v810_v21 = vrot.slane %v6038_v48, 2  ;;  %v815_v48 = vrot.slane %v6057_v39, 2 }
 0x14a   : > { %1229 = vmatmul.mubr.f32.gmra.mrb[14].mxu0 %v6176_v1 }
 0x14b   : > { %1233 = vmatprep.mubr.f32.mxu0 %v5904_v23  ;;  %4351 = vmatpush1.bf16.msra.mxu0 %v4350_v18  ;;  %v531_v23 = vld [vmem:[#allocation7 + $0x2b0] sm:$0xff]  ;;  %v783_v18 = vrot.slane %v5927_v44, 2 }
 0x14c   : > { %4352 = vmatprep.subr.bf16.mxu0 %v7751_v11 }
 0x14d   : > { %v6214_v31 = vsel %vm751_vm1, %v782_v45, %v783_v18  ;;  %v793_v45 = vrot.slane %v5969_v29, 2 }
 0x14e   : > { %1234 = vmatmul.mubr.f32.gmra.mrb[16].mxu0 %v6184_v30 }
 0x14f   : > { %1238 = vmatprep.mubr.f32.mxu0 %v5906_v26  ;;  %4354 = vmatpush1.bf16.msra.mxu0 %v4353_v38  ;;  %v532_v26 = vld [vmem:[#allocation7 + $0x2b8] sm:$0xff]  ;;  %v785_v38 = vrot.slane %v5937_v53, 2  ;;  %v537_v53 = vld [vmem:[#allocation7 + $0x2e0] sm:$0xff] }
 0x150   : > { %4355 = vmatprep.subr.bf16.mxu0 %v7751_v11  ;;  %v4362_v60 = vpack.c.bf16 %v532_v26, %v531_v23  ;;  %v6236_v23 = vsel %vm751_vm1, %v788_v0, %v790_v50  ;;  %v792_v26 = vrot.slane %v5967_v27, 2  ;;  %v818_v50 = vrot.slane %v6067_v57, 2 }
 0x151   : > { %v6221_v8 = vsel %vm751_vm1, %v783_v18, %v785_v38  ;;  %v6264_v38 = vsel %vm751_vm1, %v798_v2, %v800_v32 }
 0x152   : > { %1239 = vmatmul.mubr.f32.gmra.mrb[18].mxu0 %v6191_v3  ;;  %v6244_v14 = vsel %vm751_vm1, %v792_v26, %v793_v45  ;;  %v820_v26 = vrot.slane %v6076_v4, 2  ;;  %v580_v4 = vld [vmem:[#allocation7 + $0x438] sm:$0xff] }
 0x153   : > { %1243 = vmatprep.mubr.f32.mxu0 %v5925_v43  ;;  %4357 = vmatpush1.bf16.msra.mxu0 %v4356_v20  ;;  %v535_v43 = vld [vmem:[#allocation7 + $0x2d0] sm:$0xff] }
 0x154   : > { %4358 = vmatprep.subr.bf16.mxu0 %v7751_v11 }
 0x156   : > { %1244 = vmatmul.mubr.f32.gmra.mrb[20].mxu0 %v6199_v24 }
 0x157   : > { %1248 = vmatprep.mubr.f32.mxu0 %v5927_v44  ;;  %4360 = vmatpush1.bf16.msra.mxu0 %v4359_v51  ;;  %v536_v44 = vld [vmem:[#allocation7 + $0x2d8] sm:$0xff]  ;;  %v4371_v51 = vpack.c.bf16 %v538_v16, %v537_v53  ;;  %v574_v53 = vld [vmem:[#allocation7 + $0x408] sm:$0xff] }
 0x158   : > { %4361 = vmatprep.subr.bf16.mxu0 %v7751_v11  ;;  %v4368_v20 = vpack.c.bf16 %v536_v44, %v535_v43 }
 0x15a   : > { %1249 = vmatmul.mubr.f32.gmra.mrb[22].mxu0 %v6206_v37 }
 0x15b   : > { %1253 = vmatprep.mubr.f32.mxu0 %v5946_v62  ;;  %4363 = vmatpush1.bf16.msra.mxu0 %v4362_v60  ;;  %v539_v62 = vld [vmem:[#allocation7 + $0x2f0] sm:$0xff]  ;;  %v795_v60 = vrot.slane %v5979_v42, 2 }
 0x15c   : > { %4364 = vmatprep.subr.bf16.mxu0 %v7751_v11 }
 0x15e   : > { %1254 = vmatmul.mubr.f32.gmra.mrb[24].mxu0 %v6214_v31 }
 0x15f   : > { %1258 = vmatprep.mubr.f32.mxu0 %v5948_v63  ;;  %4366 = vmatpush1.bf16.msra.mxu0 %v4365_v7  ;;  %v540_v63 = vld [vmem:[#allocation7 + $0x2f8] sm:$0xff] }
 0x160   : > { %4367 = vmatprep.subr.bf16.mxu0 %v7751_v11  ;;  %v4374_v18 = vpack.c.bf16 %v540_v63, %v539_v62  ;;  %v576_v62 = vld [vmem:[#allocation7 + $0x418] sm:$0xff] }
 0x162   : > { %1259 = vmatmul.mubr.f32.gmra.mrb[26].mxu0 %v6221_v8 }
 0x163   : > { %1263 = vmatprep.mubr.f32.mxu0 %v5967_v27  ;;  %4369 = vmatpush1.bf16.msra.mxu0 %v4368_v20  ;;  %v6251_v27 = vsel %vm751_vm1, %v793_v45, %v795_v60  ;;  %v573_v20 = vld [vmem:[#allocation7 + $0x400] sm:$0xff]  ;;  %v822_v60 = vrot.slane %v6084_v47, 2 }
 0x164   : > { %4370 = vmatprep.subr.bf16.mxu0 %v7751_v11  ;;  %v4424_v16 = vpack.c.bf16 %v574_v53, %v573_v20  ;;  %v577_v45 = vld [vmem:[#allocation7 + $0x420] sm:$0xff]  ;;  %v830_v53 = vrot.slane %v6115_v56, 2  ;;  %v588_v56 = vld [vmem:[#allocation7 + $0x478] sm:$0xff] }
 0x166   : > { %1264 = vmatmul.mubr.f32.gmra.mrb[28].mxu0 %v6229_v36  ;;  %4425 = vmatprep.subr.bf16.mxu1 %v4424_v16 }
 0x167   : > { %1268 = vmatprep.mubr.f32.mxu0 %v5969_v29  ;;  %4372 = vmatpush1.bf16.msra.mxu0 %v4371_v51  ;;  %v797_v29 = vrot.slane %v5988_v49, 2  ;;  %v575_v51 = vld [vmem:[#allocation7 + $0x410] sm:$0xff] }
 0x168   : > { %4373 = vmatprep.subr.bf16.mxu0 %v7751_v11  ;;  %4427 = vmatpush3.bf16.msra.mxu1 %v4424_v16  ;;  %v4428_v63 = vpack.c.bf16 %v576_v62, %v575_v51  ;;  %v586_v16 = vld [vmem:[#allocation7 + $0x468] sm:$0xff]  ;;  %v541_v51 = vld [vmem:[#allocation7 + $0x300] sm:$0xff] }
 0x169   : > { %v6258_v42 = vsel %vm751_vm1, %v797_v29, %v798_v2  ;;  %v823_v29 = vrot.slane %v6086_v41, 2  ;;  %v579_v2 = vld [vmem:[#allocation7 + $0x430] sm:$0xff]  ;;  %v542_v62 = vld [vmem:[#allocation7 + $0x308] sm:$0xff] }
 0x16a   : > { %1269 = vmatmul.mubr.f32.gmra.mrb[30].mxu0 %v6236_v23  ;;  %4429 = vmatprep.subr.bf16.mxu1 %v4428_v63  ;;  %v4436_v32 = vpack.c.bf16 %v580_v4, %v579_v2  ;;  %v546_v2 = vld [vmem:[#allocation7 + $0x328] sm:$0xff]  ;;  %v548_v4 = vld [vmem:[#allocation7 + $0x338] sm:$0xff] }
 0x16b   : > { %1273 = vmatprep.mubr.f32.mxu0 %v5988_v49  ;;  %4375 = vmatpush1.bf16.msra.mxu0 %v4374_v18  ;;  %v802_v49 = vrot.slane %v6008_v10, 2 }
 0x16c   : > { %4376 = vmatprep.subr.bf16.mxu0 %v7751_v11  ;;  %4431 = vmatpush3.bf16.msra.mxu1 %v4428_v63  ;;  %v587_v63 = vld [vmem:[#allocation7 + $0x470] sm:$0xff] }
 0x16e   : > { %1274 = vmatmul.mubr.f32.gmra.mrb[32].mxu0 %v6244_v14 }
 0x16f   : > { %1278 = vmatprep.mubr.f32.mxu0 %v5990_v52  ;;  %v803_v52 = vrot.slane %v6010_v12, 2 }
 0x171   : > { %v6271_v7 = vsel %vm751_vm1, %v802_v49, %v803_v52  ;;  %v6277_v43 = vsel %vm751_vm1, %v803_v52, %v805_v59  ;;  %v6323_v49 = vsel %vm751_vm1, %v822_v60, %v823_v29  ;;  %v825_v52 = vrot.slane %v6095_v58, 2  ;;  %v581_v59 = vld [vmem:[#allocation7 + $0x440] sm:$0xff]  ;;  %v583_v58 = vld [vmem:[#allocation7 + $0x450] sm:$0xff] }
 0x172   : > { %1279 = vmatmul.mubr.f32.gmra.mrb[34].mxu0 %v6251_v27 }
 0x173   : > { %1283 = vmatprep.mubr.f32.mxu0 %v6008_v10  ;;  %v807_v10 = vrot.slane %v6027_v33, 2 }
 0x176   : > { %1284 = vmatmul.mubr.f32.gmra.mrb[36].mxu0 %v6258_v42 }
 0x177   : > { %1288 = vmatprep.mubr.f32.mxu0 %v6010_v12  ;;  %v808_v12 = vrot.slane %v6029_v35, 2 }
 0x179   : > { %v6284_v44 = vsel %vm751_vm1, %v807_v10, %v808_v12  ;;  %v6290_v28 = vsel %vm751_vm1, %v808_v12, %v810_v21  ;;  %v827_v12 = vrot.slane %v6103_v17, 2  ;;  %v828_v21 = vrot.slane %v6105_v54, 2 }
 0x17a   : > { %1289 = vmatmul.mubr.f32.gmra.mrb[38].mxu0 %v6264_v38 }
 0x17b   : > { %1293 = vmatprep.mubr.f32.mxu0 %v6027_v33  ;;  %v812_v33 = vrot.slane %v6046_v6, 2  ;;  %v6338_v20 = vsel %vm751_vm1, %v827_v12, %v828_v21  ;;  %v7753_v12 = vld [vmem:[#allocation15_spill] sm:$0xff] }
 0x17e   : > { %1294 = vmatmul.mubr.f32.gmra.mrb[40].mxu0 %v6271_v7 }
 0x17f   : > { %1298 = vmatprep.mubr.f32.mxu0 %v6029_v35  ;;  %v813_v35 = vrot.slane %v6048_v15, 2 }
 0x181   : > { %v6297_v0 = vsel %vm751_vm1, %v812_v33, %v813_v35  ;;  %v6333_v33 = vld [vmem:[#allocation2 + $0x180] sm:$0xff] }
 0x182   : > { %1299 = vmatmul.mubr.f32.gmra.mrb[42].mxu0 %v6277_v43 }
 0x183   : > { %1303 = vmatprep.mubr.f32.mxu0 %v6046_v6  ;;  %v6303_v6 = vsel %vm751_vm1, %v813_v35, %v815_v48  ;;  %v584_v35 = vld [vmem:[#allocation7 + $0x458] sm:$0xff] }
 0x184   : > { %v4444_v48 = vpack.c.bf16 %v584_v35, %v583_v58  ;;  %v555_v58 = vld [vmem:[#allocation7 + $0x370] sm:$0xff] }
 0x185   : > { %v7754_v35 = vld [vmem:[#allocation16_spill] sm:$0xff] }
 0x186   : > { %1304 = vmatmul.mubr.f32.gmra.mrb[44].mxu0 %v6284_v44 }
 0x187   : > { %1308 = vmatprep.mubr.f32.mxu0 %v6048_v15  ;;  %v817_v15 = vrot.slane %v6065_v13, 2 }
 0x189   : > { %v6310_v39 = vsel %vm751_vm1, %v817_v15, %v818_v50 }
 0x18a   : > { %1309 = vmatmul.mubr.f32.gmra.mrb[46].mxu0 %v6290_v28 }
 0x18b   : > { %1313 = vmatprep.mubr.f32.mxu0 %v6065_v13  ;;  %v578_v13 = vld [vmem:[#allocation7 + $0x428] sm:$0xff] }
 0x18c   : > { %v4432_v18 = vpack.c.bf16 %v578_v13, %v577_v45  ;;  %v4377_v45 = vpack.c.bf16 %v542_v62, %v541_v51  ;;  %v543_v13 = vld [vmem:[#allocation7 + $0x310] sm:$0xff]  ;;  %v7756_v51 = vld [vmem:[#allocation18_spill] sm:$0xff] }
 0x18e   : > { %1314 = vmatmul.mubr.f32.gmra.mrb[48].mxu0 %v6297_v0  ;;  %4433 = vmatprep.subr.bf16.mxu1 %v4432_v18 }
 0x18f   : > { %1318 = vmatprep.mubr.f32.mxu0 %v6067_v57  ;;  %v6316_v57 = vsel %vm751_vm1, %v818_v50, %v820_v26  ;;  %4435 = vmatpush3.bf16.msra.mxu1 %v4432_v18  ;;  %v6346_v50 = vsel %vm751_vm1, %v828_v21, %v830_v53  ;;  %v4452_v26 = vpack.c.bf16 %v588_v56, %v587_v63  ;;  %v544_v18 = vld [vmem:[#allocation7 + $0x318] sm:$0xff]  ;;  %v557_v53 = vld [vmem:[#allocation7 + $0x380] sm:$0xff]  ;;  %v7757_v56 = vld [vmem:[#allocation19_spill] sm:$0xff] }
 0x190   : > { %4437 = vmatprep.subr.bf16.mxu1 %v4436_v32  ;;  %v4380_v60 = vpack.c.bf16 %v544_v18, %v543_v13  ;;  %v561_v63 = vld [vmem:[#allocation7 + $0x3a0] sm:$0xff]  ;;  %v7758_v13 = vld [vmem:[#allocation20_spill] sm:$0xff] }
 0x192   : > { %1319 = vmatmul.mubr.f32.gmra.mrb[50].mxu0 %v6303_v6 }
 0x193   : > { %1323 = vmatprep.mubr.f32.mxu0 %v6084_v47  ;;  %4439 = vmatpush3.bf16.msra.mxu1 %v4436_v32  ;;  %v582_v47 = vld [vmem:[#allocation7 + $0x448] sm:$0xff] }
 0x194   : > { %v4440_v10 = vpack.c.bf16 %v582_v47, %v581_v59  ;;  %v7752_v59 = vld [vmem:[#allocation14_spill] sm:$0xff] }
 0x196   : > { %1324 = vmatmul.mubr.f32.gmra.mrb[52].mxu0 %v6310_v39  ;;  %4441 = vmatprep.subr.bf16.mxu1 %v4440_v10 }
 0x197   : > { %1328 = vmatprep.mubr.f32.mxu0 %v6086_v41  ;;  %v6329_v41 = vsel %vm751_vm1, %v823_v29, %v825_v52  ;;  %4443 = vmatpush3.bf16.msra.mxu1 %v4440_v10  ;;  %v545_v29 = vld [vmem:[#allocation7 + $0x320] sm:$0xff]  ;;  %v551_v52 = vld [vmem:[#allocation7 + $0x350] sm:$0xff] }
 0x198   : > { %4445 = vmatprep.subr.bf16.mxu1 %v4444_v48  ;;  %v553_v10 = vld [vmem:[#allocation7 + $0x360] sm:$0xff] }
 0x19a   : > { %1329 = vmatmul.mubr.f32.gmra.mrb[54].mxu0 %v6316_v57 }
 0x19b   : > { %1333 = vmatprep.mubr.f32.mxu0 %v6103_v17  ;;  %v6341_v17 = vld [vmem:[#allocation2 + $0x188] sm:$0xff]  ;;  %4447 = vmatpush3.bf16.msra.mxu1 %v4444_v48 }
 0x19e   : > { %1334 = vmatmul.mubr.f32.gmra.mrb[56].mxu0 %v6323_v49 }
 0x19f   : > { %1338 = vmatprep.mubr.f32.mxu0 %v6105_v54  ;;  %v585_v54 = vld [vmem:[#allocation7 + $0x460] sm:$0xff] }
 0x1a0   : > { %v4448_v15 = vpack.c.bf16 %v586_v16, %v585_v54  ;;  %v7755_v54 = vld [vmem:[#allocation17_spill] sm:$0xff] }
 0x1a2   : > { %1339 = vmatmul.mubr.f32.gmra.mrb[58].mxu0 %v6329_v41  ;;  %4449 = vmatprep.subr.bf16.mxu1 %v4448_v15 }
 0x1a3   : > { %1343 = vmatprep.mubr.f32.mxu0 %v6333_v33  ;;  %4451 = vmatpush3.bf16.msra.mxu1 %v4448_v15  ;;  %v559_v15 = vld [vmem:[#allocation7 + $0x390] sm:$0xff] }
 0x1a4   : > { %4453 = vmatprep.subr.bf16.mxu1 %v4452_v26 }
 0x1a6   : > { %1344 = vmatmul.mubr.f32.gmra.mrb[60].mxu0 %v6338_v20 }
 0x1a7   : > { %1348 = vmatprep.mubr.f32.mxu0 %v6341_v17  ;;  %4455 = vmatpush3.bf16.msra.mxu1 %v4452_v26 }
 0x1a8   : > { %4456 = vmatprep.subr.bf16.mxu1 %v7751_v11 }
 0x1aa   : > { %1349 = vmatmul.mubr.f32.gmra.mrb[62].mxu0 %v6346_v50  ;;  %4105 = vmatmul.mubr.f32.vlgmr.msra.gmra.mrb[0].mxu1 %v5885_v9 }
 0x1ab   : > { %1418 = vmatprep.mubr.f32.mxu0 %v6148_v19  ;;  %4107 = vmatprep.mubr.f32.mxu1 %v6169_v5  ;;  %v4383_v19 = vpack.c.bf16 %v546_v2, %v545_v29  ;;  %v7759_v29 = vld [vmem:[#allocation21_spill] sm:$0xff] }
 0x1ae   : > { %1419 = vmatmul.mubr.f32.vlgmr.msra.gmra.mrb[0].mxu0 %v5831_v34  ;;  %v547_v34 = vld [vmem:[#allocation7 + $0x330] sm:$0xff]  ;;  %4108 = vmatmul.mubr.f32.gmra.mrb[2].mxu1 %v6176_v1 }
 0x1af   : > { %4378 = vmatpush1.bf16.msra.mxu0 %v4377_v45  ;;  %1423 = vmatprep.mubr.f32.mxu0 %v6155_v25  ;;  %v4386_v25 = vpack.c.bf16 %v548_v4, %v547_v34  ;;  %v563_v45 = vld [vmem:[#allocation7 + $0x3b0] sm:$0xff]  ;;  %v7760_v34 = vld [vmem:[#allocation22_spill] sm:$0xff] }
 0x1b0   : > { %4379 = vmatprep.subr.bf16.mxu0 %v7751_v11  ;;  %4110 = vmatprep.mubr.f32.mxu1 %v6184_v30 }
 0x1b2   : > { %1424 = vmatmul.mubr.f32.gmra.mrb[2].mxu0 %v5842_v40  ;;  %v549_v40 = vld [vmem:[#allocation7 + $0x340] sm:$0xff]  ;;  %4111 = vmatmul.mubr.f32.gmra.mrb[4].mxu1 %v6191_v3 }
 0x1b3   : > { %1428 = vmatprep.mubr.f32.mxu0 %v5870_v61  ;;  %4381 = vmatpush1.bf16.msra.mxu0 %v4380_v60  ;;  %v550_v61 = vld [vmem:[#allocation7 + $0x348] sm:$0xff]  ;;  %v565_v60 = vld [vmem:[#allocation7 + $0x3c0] sm:$0xff] }
 0x1b4   : > { %4382 = vmatprep.subr.bf16.mxu0 %v7751_v11  ;;  %4113 = vmatprep.mubr.f32.mxu1 %v6199_v24  ;;  %v4389_v32 = vpack.c.bf16 %v550_v61, %v549_v40  ;;  %v874_v40 = vrot.slane %v6333_v33, 2  ;;  %v875_v61 = vrot.slane %v6341_v17, 2 }
 0x1b6   : > { %1429 = vmatmul.mubr.f32.gmra.mrb[4].mxu0 %v5850_v46  ;;  %4114 = vmatmul.mubr.f32.gmra.mrb[6].mxu1 %v6206_v37 }
 0x1b7   : > { %1433 = vmatprep.mubr.f32.mxu0 %v5885_v9  ;;  %4384 = vmatpush1.bf16.msra.mxu0 %v4383_v19  ;;  %v552_v9 = vld [vmem:[#allocation7 + $0x358] sm:$0xff]  ;;  %v567_v19 = vld [vmem:[#allocation7 + $0x3d0] sm:$0xff] }
 0x1b8   : > { %4385 = vmatprep.subr.bf16.mxu0 %v7751_v11  ;;  %4116 = vmatprep.mubr.f32.mxu1 %v6214_v31  ;;  %v4392_v47 = vpack.c.bf16 %v552_v9, %v551_v52  ;;  %v7761_v52 = vld [vmem:[#allocation23_spill] sm:$0xff] }
 0x1ba   : > { %1434 = vmatmul.mubr.f32.gmra.mrb[6].mxu0 %v5862_v55  ;;  %4117 = vmatmul.mubr.f32.gmra.mrb[8].mxu1 %v6221_v8 }
 0x1bb   : > { %1438 = vmatprep.mubr.f32.mxu0 %v6169_v5  ;;  %4387 = vmatpush1.bf16.msra.mxu0 %v4386_v25  ;;  %v554_v5 = vld [vmem:[#allocation7 + $0x368] sm:$0xff]  ;;  %v569_v25 = vld [vmem:[#allocation7 + $0x3e0] sm:$0xff] }
 0x1bc   : > { %4388 = vmatprep.subr.bf16.mxu0 %v7751_v11  ;;  %4119 = vmatprep.mubr.f32.mxu1 %v6229_v36  ;;  %v4395_v21 = vpack.c.bf16 %v554_v5, %v553_v10  ;;  %v571_v10 = vld [vmem:[#allocation7 + $0x3f0] sm:$0xff]  ;;  %v572_v5 = vld [vmem:[#allocation7 + $0x3f8] sm:$0xff] }
 0x1be   : > { %1439 = vmatmul.mubr.f32.gmra.mrb[8].mxu0 %v7752_v59  ;;  %4120 = vmatmul.mubr.f32.gmra.mrb[10].mxu1 %v6236_v23 }
 0x1bf   : > { %1443 = vmatprep.mubr.f32.mxu0 %v6176_v1  ;;  %4390 = vmatpush1.bf16.msra.mxu0 %v4389_v32  ;;  %v556_v1 = vld [vmem:[#allocation7 + $0x378] sm:$0xff]  ;;  %v6416_v32 = vld [vmem:[#allocation2 + $0x190] sm:$0x3] }
 0x1c0   : > { %4391 = vmatprep.subr.bf16.mxu0 %v7751_v11  ;;  %4122 = vmatprep.mubr.f32.mxu1 %v6244_v14  ;;  %v4398_v48 = vpack.c.bf16 %v556_v1, %v555_v58  ;;  %v877_v9 = vrot.slane %v6416_v32, 2  ;;  %v4422_v58 = vpack.c.bf16 %v572_v5, %v571_v10  ;;  %v7763_v1 = vld [vmem:[#allocation25_spill] sm:$0xff]  ;;  %v5221_v10 = vld [vmem:[#allocation2 + $0x50] sm:$0xff] }
 0x1c1   : > { %v2213_v5 = vld [vmem:[#allocation9 + $0x58] sm:$0xff] }
 0x1c2   : > { %1444 = vmatmul.mubr.f32.gmra.mrb[10].mxu0 %v7753_v12  ;;  %4123 = vmatmul.mubr.f32.gmra.mrb[12].mxu1 %v6251_v27 }
 0x1c3   : > { %1448 = vmatprep.mubr.f32.mxu0 %v6184_v30  ;;  %4393 = vmatpush1.bf16.msra.mxu0 %v4392_v47  ;;  %v558_v30 = vld [vmem:[#allocation7 + $0x388] sm:$0xff]  ;;  %v876_v47 = vsel %vm751_vm1, %v874_v40, %v875_v61 }
 0x1c4   : > { %4394 = vmatprep.subr.bf16.mxu0 %v7751_v11  ;;  %4125 = vmatprep.mubr.f32.mxu1 %v6258_v42  ;;  %v4401_v16 = vpack.c.bf16 %v558_v30, %v557_v53  ;;  %v7765_v53 = vld [vmem:[#allocation27_spill] sm:$0xff]  ;;  %v7767_v30 = vld [vmem:[#allocation29_spill] sm:$0xff] }
 0x1c5   : > { %v2331_v40 = vld [vmem:[#allocation9 + $0x408] sm:$0xff] }
 0x1c6   : > { %1449 = vmatmul.mubr.f32.gmra.mrb[12].mxu0 %v7754_v35  ;;  %4126 = vmatmul.mubr.f32.gmra.mrb[14].mxu1 %v6264_v38 }
 0x1c7   : > { %1453 = vmatprep.mubr.f32.mxu0 %v6191_v3  ;;  %4396 = vmatpush1.bf16.msra.mxu0 %v4395_v21  ;;  %v560_v3 = vld [vmem:[#allocation7 + $0x398] sm:$0xff]  ;;  %v7762_v21 = vld [vmem:[#allocation24_spill] sm:$0xff] }
 0x1c8   : > { %4397 = vmatprep.subr.bf16.mxu0 %v7751_v11  ;;  %4128 = vmatprep.mubr.f32.mxu1 %v6271_v7  ;;  %v4404_v62 = vpack.c.bf16 %v560_v3, %v559_v15  ;;  %v7777_v15 = vld [vmem:[#allocation39_spill] sm:$0xff]  ;;  %v7778_v3 = vld [vmem:[#allocation40_spill] sm:$0xff] }
 0x1ca   : > { %1454 = vmatmul.mubr.f32.gmra.mrb[14].mxu0 %v7755_v54  ;;  %4129 = vmatmul.mubr.f32.gmra.mrb[16].mxu1 %v6277_v43 }
 0x1cb   : > { %1458 = vmatprep.mubr.f32.mxu0 %v6199_v24  ;;  %4399 = vmatpush1.bf16.msra.mxu0 %v4398_v48  ;;  %v562_v24 = vld [vmem:[#allocation7 + $0x3a8] sm:$0xff]  ;;  %v7764_v48 = vld [vmem:[#allocation26_spill] sm:$0xff] }
 0x1cc   : > { %4400 = vmatprep.subr.bf16.mxu0 %v7751_v11  ;;  %4131 = vmatprep.mubr.f32.mxu1 %v6284_v44  ;;  %v4407_v26 = vpack.c.bf16 %v562_v24, %v561_v63 }
 0x1ce   : > { %1459 = vmatmul.mubr.f32.gmra.mrb[16].mxu0 %v7756_v51  ;;  %4132 = vmatmul.mubr.f32.gmra.mrb[18].mxu1 %v6290_v28 }
 0x1cf   : > { %1463 = vmatprep.mubr.f32.mxu0 %v6206_v37  ;;  %4402 = vmatpush1.bf16.msra.mxu0 %v4401_v16  ;;  %v564_v37 = vld [vmem:[#allocation7 + $0x3b8] sm:$0xff]  ;;  %v7768_v16 = vld [vmem:[#allocation30_spill] sm:$0xff] }
 0x1d0   : > { %4403 = vmatprep.subr.bf16.mxu0 %v7751_v11  ;;  %4134 = vmatprep.mubr.f32.mxu1 %v6297_v0  ;;  %v4410_v18 = vpack.c.bf16 %v564_v37, %v563_v45  ;;  %v2203_v45 = vld [vmem:[#allocation9 + $0x8] sm:$0xff]  ;;  %v2204_v37 = vld [vmem:[#allocation9 + $0x10] sm:$0xff] }
 0x1d2   : > { %1464 = vmatmul.mubr.f32.gmra.mrb[18].mxu0 %v7757_v56  ;;  %4135 = vmatmul.mubr.f32.gmra.mrb[20].mxu1 %v6303_v6 }
 0x1d3   : > { %1468 = vmatprep.mubr.f32.mxu0 %v6214_v31  ;;  %4405 = vmatpush1.bf16.msra.mxu0 %v4404_v62  ;;  %v566_v31 = vld [vmem:[#allocation7 + $0x3c8] sm:$0xff]  ;;  %v6466_v62 = vrot.slane %v7778_v3, 1  ;;  %v2216_v3 = vld [vmem:[#allocation9 + $0x70] sm:$0xff] }
 0x1d4   : > { %4406 = vmatprep.subr.bf16.mxu0 %v7751_v11  ;;  %4137 = vmatprep.mubr.f32.mxu1 %v6310_v39  ;;  %v4413_v2 = vpack.c.bf16 %v566_v31, %v565_v60  ;;  %v2205_v60 = vld [vmem:[#allocation9 + $0x18] sm:$0xff] }
 0x1d5   : > { %v4460_v31 = vpack.c.bf16 %v2205_v60, %v2204_v37  ;;  %v5225_v37 = vld [vmem:[#allocation2 + $0x80] sm:$0xff]  ;;  %v2221_v60 = vld [vmem:[#allocation9 + $0x98] sm:$0xff] }
 0x1d6   : > { %1469 = vmatmul.mubr.f32.gmra.mrb[20].mxu0 %v7758_v13  ;;  %4138 = vmatmul.mubr.f32.gmra.mrb[22].mxu1 %v6316_v57 }
 0x1d7   : > { %1473 = vmatprep.mubr.f32.mxu0 %v6221_v8  ;;  %4408 = vmatpush1.bf16.msra.mxu0 %v4407_v26  ;;  %v568_v8 = vld [vmem:[#allocation7 + $0x3d8] sm:$0xff]  ;;  %v2202_v26 = vld [vmem:[#allocation9] sm:$0xff] }
 0x1d8   : > { %4409 = vmatprep.subr.bf16.mxu0 %v7751_v11  ;;  %4140 = vmatprep.mubr.f32.mxu1 %v6323_v49  ;;  %v4416_v4 = vpack.c.bf16 %v568_v8, %v567_v19  ;;  %v2207_v19 = vld [vmem:[#allocation9 + $0x28] sm:$0xff] }
 0x1da   : > { %1474 = vmatmul.mubr.f32.gmra.mrb[22].mxu0 %v7759_v29  ;;  %4141 = vmatmul.mubr.f32.gmra.mrb[24].mxu1 %v6329_v41 }
 0x1db   : > { %1478 = vmatprep.mubr.f32.mxu0 %v6229_v36  ;;  %4411 = vmatpush1.bf16.msra.mxu0 %v4410_v18  ;;  %v570_v36 = vld [vmem:[#allocation7 + $0x3e8] sm:$0xff]  ;;  %v4457_v18 = vpack.c.bf16 %v2203_v45, %v2202_v26  ;;  %v2218_v26 = vld [vmem:[#allocation9 + $0x80] sm:$0xff] }
 0x1dc   : > { %4412 = vmatprep.subr.bf16.mxu0 %v7751_v11  ;;  %4143 = vmatprep.mubr.f32.mxu1 %v6338_v20  ;;  %v2219_v45 = vld [vmem:[#allocation9 + $0x88] sm:$0xff] }
 0x1dd   : > { %4458 = vmatpush1.bf16.msra.mxu1 %v4457_v18  ;;  %v2220_v18 = vld [vmem:[#allocation9 + $0x90] sm:$0xff] }
 0x1de   : > { %1479 = vmatmul.mubr.f32.gmra.mrb[24].mxu0 %v7760_v34  ;;  %4144 = vmatmul.mubr.f32.gmra.mrb[26].mxu1 %v6346_v50 }
 0x1df   : > { %1483 = vmatprep.mubr.f32.mxu0 %v6236_v23  ;;  %4414 = vmatpush1.bf16.msra.mxu0 %v4413_v2  ;;  %v4419_v23 = vpack.c.bf16 %v570_v36, %v569_v25  ;;  %v5218_v2 = vld [vmem:[#allocation2 + $0x30] sm:$0xff]  ;;  %v5219_v25 = vld [vmem:[#allocation2 + $0x38] sm:$0xff]  ;;  %v2330_v36 = vld [vmem:[#allocation9 + $0x400] sm:$0xff] }
 0x1e0   : > { %4415 = vmatprep.subr.bf16.mxu0 %v7751_v11  ;;  %4146 = vmatprep.mubr.f32.mxu1 %v876_v47 }
 0x1e1   : > { %4459 = vmatprep.subr.bf16.mxu1 %v7751_v11 }
 0x1e2   : > { %1484 = vmatmul.mubr.f32.gmra.mrb[26].mxu0 %v7761_v52  ;;  %4461 = vmatpush1.bf16.msra.mxu1 %v4460_v31  ;;  %v5226_v31 = vld [vmem:[#allocation2 + $0x90] sm:$0xff] }
 0x1e3   : > { %1488 = vmatprep.mubr.f32.mxu0 %v6244_v14  ;;  %4417 = vmatpush1.bf16.msra.mxu0 %v4416_v4  ;;  %v878_v14 = vsel %vm751_vm1, %v875_v61, %v877_v9  ;;  %v2208_v4 = vld [vmem:[#allocation9 + $0x30] sm:$0xff]  ;;  %v6485_v61 = vpack.c.bf16 %v2331_v40, %v2330_v36  ;;  %v2211_v9 = vld [vmem:[#allocation9 + $0x48] sm:$0xff]  ;;  %v5232_v36 = vld [vmem:[#allocation2 + $0xd8] sm:$0xff] }
 0x1e4   : > { %4418 = vmatprep.subr.bf16.mxu0 %v7751_v11  ;;  %4147 = vmatmul.mubr.f32.gmra.mrb[28].mxu1 %v878_v14  ;;  %v5234_v40 = vld [vmem:[#allocation2 + $0xf0] sm:$0xff] }
 0x1e5   : > { %4149 = vmatprep.mubr.f32.mxu1 %v6133_v22  ;;  %4462 = vmatprep.subr.bf16.mxu1 %v7751_v11  ;;  %7779 = vst [vmem:[#allocation14_spill] sm:$0xff] %v6485_v61 }
 0x1e6   : > { %1489 = vmatmul.mubr.f32.gmra.mrb[28].mxu0 %v7762_v21 }
 0x1e7   : > { %1493 = vmatprep.mubr.f32.mxu0 %v6251_v27  ;;  %4420 = vmatpush1.bf16.msra.mxu0 %v4419_v23  ;;  %v7766_v27 = vld [vmem:[#allocation28_spill] sm:$0xff]  ;;  %v5220_v23 = vld [vmem:[#allocation2 + $0x48] sm:$0xff] }
 0x1e8   : > { %4421 = vmatprep.subr.bf16.mxu0 %v7751_v11 }
 0x1ea   : > { %1494 = vmatmul.mubr.f32.gmra.mrb[30].mxu0 %v7763_v1 }
 0x1eb   : > { %1498 = vmatprep.mubr.f32.mxu0 %v6258_v42  ;;  %4423 = vmatpush1.bf16.msra.mxu0 %v4422_v58  ;;  %v7769_v42 = vld [vmem:[#allocation31_spill] sm:$0xff] }
 0x1ec   : > { %4649 = vmatprep.subr.bf16.mxu0 %v6485_v61 }
 0x1ee   : > { %1499 = vmatmul.mubr.f32.gmra.mrb[32].mxu0 %v7764_v48 }
 0x1ef   : > { %1503 = vmatprep.mubr.f32.mxu0 %v6264_v38  ;;  %v7770_v38 = vld [vmem:[#allocation32_spill] sm:$0xff] }
 0x1f2   : > { %1504 = vmatmul.mubr.f32.gmra.mrb[34].mxu0 %v7765_v53 }
 0x1f3   : > { %1508 = vmatprep.mubr.f32.mxu0 %v6271_v7  ;;  %v7771_v7 = vld [vmem:[#allocation33_spill] sm:$0xff] }
 0x1f6   : > { %1509 = vmatmul.mubr.f32.gmra.mrb[36].mxu0 %v7766_v27 }
 0x1f7   : > { %1513 = vmatprep.mubr.f32.mxu0 %v6277_v43  ;;  %v7772_v43 = vld [vmem:[#allocation34_spill] sm:$0xff] }
 0x1fa   : > { %1514 = vmatmul.mubr.f32.gmra.mrb[38].mxu0 %v7767_v30 }
 0x1fb   : > { %1518 = vmatprep.mubr.f32.mxu0 %v6284_v44  ;;  %v7773_v44 = vld [vmem:[#allocation35_spill] sm:$0xff] }
 0x1fe   : > { %1519 = vmatmul.mubr.f32.gmra.mrb[40].mxu0 %v7768_v16 }
 0x1ff   : > { %1523 = vmatprep.mubr.f32.mxu0 %v6290_v28  ;;  %v7774_v28 = vld [vmem:[#allocation36_spill] sm:$0xff] }
 0x202   : > { %1524 = vmatmul.mubr.f32.gmra.mrb[42].mxu0 %v7769_v42 }
 0x203   : > { %1528 = vmatprep.mubr.f32.mxu0 %v6297_v0  ;;  %v7775_v0 = vld [vmem:[#allocation37_spill] sm:$0xff] }
 0x206   : > { %1529 = vmatmul.mubr.f32.gmra.mrb[44].mxu0 %v7770_v38 }
 0x207   : > { %1533 = vmatprep.mubr.f32.mxu0 %v6303_v6  ;;  %v7776_v6 = vld [vmem:[#allocation38_spill] sm:$0xff] }
 0x20a   : > { %1534 = vmatmul.mubr.f32.gmra.mrb[46].mxu0 %v7771_v7 }
 0x20b   : > { %1538 = vmatprep.mubr.f32.mxu0 %v6310_v39  ;;  %v867_v39 = vrot.slane %v6333_v33, 1 }
 0x20e   : > { %1539 = vmatmul.mubr.f32.gmra.mrb[48].mxu0 %v7772_v43 }
 0x20f   : > { %1543 = vmatprep.mubr.f32.mxu0 %v6316_v57  ;;  %v868_v57 = vrot.slane %v6341_v17, 1 }
 0x212   : > { %1544 = vmatmul.mubr.f32.gmra.mrb[50].mxu0 %v7773_v44 }
 0x213   : > { %1548 = vmatprep.mubr.f32.mxu0 %v6323_v49  ;;  %v6462_v49 = vsel %vm638_vm0, %v867_v39, %v868_v57  ;;  %v2214_v39 = vld [vmem:[#allocation9 + $0x60] sm:$0xff] }
 0x216   : > { %1549 = vmatmul.mubr.f32.gmra.mrb[52].mxu0 %v7774_v28 }
 0x217   : > { %1553 = vmatprep.mubr.f32.mxu0 %v6329_v41  ;;  %v870_v41 = vrot.slane %v6416_v32, 1 }
 0x219   : > { %v6476_v24 = vsel %vm638_vm0, %v868_v57, %v870_v41  ;;  %v5223_v41 = vld [vmem:[#allocation2 + $0x68] sm:$0xff] }
 0x21a   : > { %1554 = vmatmul.mubr.f32.gmra.mrb[54].mxu0 %v7775_v0 }
 0x21b   : > { %1558 = vmatprep.mubr.f32.mxu0 %v6338_v20  ;;  %v6468_v20 = vld [vmem:[#allocation2 + $0x1a8] sm:$0x3] }
 0x21c   : > { %v894_v63 = vrot.slane %v6468_v20, 2 }
 0x21e   : > { %1559 = vmatmul.mubr.f32.gmra.mrb[56].mxu0 %v7776_v6 }
 0x21f   : > { %1563 = vmatprep.mubr.f32.mxu0 %v6346_v50  ;;  %v895_v50 = vsel %vm751_vm1, %v6133_v22, %v894_v63  ;;  %v2206_v22 = vld [vmem:[#allocation9 + $0x20] sm:$0xff]  ;;  %v2217_v63 = vld [vmem:[#allocation9 + $0x78] sm:$0xff] }
 0x220   : > { %4150 = vmatmul.mubr.f32.gmra.mrb[30].mxu1 %v895_v50  ;;  %v4463_v8 = vpack.c.bf16 %v2207_v19, %v2206_v22  ;;  %v5224_v50 = vld [vmem:[#allocation2 + $0x78] sm:$0xff]  ;;  %v2223_v22 = vld [vmem:[#allocation9 + $0xa8] sm:$0xff] }
 0x221   : > { %2723 = vmatprep.mubr.f32.mxu1 %v6466_v62  ;;  %v5227_v19 = vld [vmem:[#allocation2 + $0x98] sm:$0xff] }
 0x222   : > { %1564 = vmatmul.mubr.f32.gmra.mrb[58].mxu0 %v7777_v15  ;;  %4464 = vmatpush1.bf16.msra.mxu1 %v4463_v8  ;;  %v2224_v8 = vld [vmem:[#allocation9 + $0xb0] sm:$0xff] }
 0x223   : > { %1568 = vmatprep.mubr.f32.mxu0 %v876_v47  ;;  %4465 = vmatprep.subr.bf16.mxu1 %v7751_v11 }
 0x226   : > { %1569 = vmatmul.mubr.f32.gmra.mrb[60].mxu0 %v6462_v49 }
 0x227   : > { %1573 = vmatprep.mubr.f32.mxu0 %v878_v14  ;;  %v5222_v14 = vld [vmem:[#allocation2 + $0x60] sm:$0xff] }
 0x22a   : > { %1574 = vmatmul.mubr.f32.gmra.mrb[62].mxu0 %v6476_v24 }
 0x22b   : > { %1643 = vmatprep.mubr.f32.mxu0 %v5850_v46  ;;  %v2209_v46 = vld [vmem:[#allocation9 + $0x38] sm:$0xff] }
 0x22c   : > { %v4466_v32 = vpack.c.bf16 %v2209_v46, %v2208_v4  ;;  %v2225_v4 = vld [vmem:[#allocation9 + $0xb8] sm:$0xff]  ;;  %v5230_v46 = vld [vmem:[#allocation2 + $0xc0] sm:$0xff] }
 0x22e   : > { %1644 = vmatmul.mubr.f32.vlgmr.msra.gmra.mrb[0].mxu0 %v5218_v2  ;;  %4467 = vmatpush1.bf16.msra.mxu1 %v4466_v32  ;;  %v2222_v2 = vld [vmem:[#allocation9 + $0xa0] sm:$0xff] }
 0x22f   : > { %1648 = vmatprep.mubr.f32.mxu0 %v5862_v55  ;;  %v2210_v55 = vld [vmem:[#allocation9 + $0x40] sm:$0xff]  ;;  %4651 = vmatpush3.bf16.msra.mxu0 %v6485_v61 }
 0x230   : > { %v4469_v47 = vpack.c.bf16 %v2211_v9, %v2210_v55  ;;  %4468 = vmatprep.subr.bf16.mxu1 %v7751_v11  ;;  %v2226_v32 = vld [vmem:[#allocation9 + $0xc0] sm:$0xff]  ;;  %v2333_v55 = vld [vmem:[#allocation9 + $0x418] sm:$0xff]  ;;  %v5239_v9 = vld [vmem:[#allocation2 + $0x128] sm:$0xff] }
 0x232   : > { %1649 = vmatmul.mubr.f32.gmra.mrb[2].mxu0 %v5219_v25  ;;  %4470 = vmatpush1.bf16.msra.mxu1 %v4469_v47  ;;  %v5228_v25 = vld [vmem:[#allocation2 + $0xa8] sm:$0xff]  ;;  %v2229_v47 = vld [vmem:[#allocation9 + $0xd8] sm:$0xff] }
 0x233   : > { %1653 = vmatprep.mubr.f32.mxu0 %v7752_v59  ;;  %v2212_v59 = vld [vmem:[#allocation9 + $0x50] sm:$0xff]  ;;  %4471 = vmatprep.subr.bf16.mxu1 %v7751_v11 }
 0x234   : > { %v4472_v58 = vpack.c.bf16 %v2213_v5, %v2212_v59  ;;  %v2335_v5 = vld [vmem:[#allocation9 + $0x428] sm:$0xff] }
 0x236   : > { %1654 = vmatmul.mubr.f32.gmra.mrb[4].mxu0 %v5220_v23  ;;  %4473 = vmatpush1.bf16.msra.mxu1 %v4472_v58  ;;  %v5240_v58 = vld [vmem:[#allocation2 + $0x138] sm:$0xff] }
 0x237   : > { %1658 = vmatprep.mubr.f32.mxu0 %v7753_v12  ;;  %v2215_v12 = vld [vmem:[#allocation9 + $0x68] sm:$0xff]  ;;  %4474 = vmatprep.subr.bf16.mxu1 %v7751_v11 }
 0x238   : > { %v4475_v57 = vpack.c.bf16 %v2215_v12, %v2214_v39  ;;  %v2230_v39 = vld [vmem:[#allocation9 + $0xe0] sm:$0xff] }
 0x23a   : > { %1659 = vmatmul.mubr.f32.gmra.mrb[6].mxu0 %v5221_v10  ;;  %4476 = vmatpush1.bf16.msra.mxu1 %v4475_v57  ;;  %v2336_v57 = vld [vmem:[#allocation9 + $0x430] sm:$0xff] }
 0x23b   : > { %1663 = vmatprep.mubr.f32.mxu0 %v7754_v35  ;;  %v4478_v35 = vpack.c.bf16 %v2217_v63, %v2216_v3  ;;  %4477 = vmatprep.subr.bf16.mxu1 %v7751_v11  ;;  %v5241_v3 = vld [vmem:[#allocation2 + $0x140] sm:$0xff] }
 0x23e   : > { %1664 = vmatmul.mubr.f32.gmra.mrb[8].mxu0 %v5222_v14  ;;  %4479 = vmatpush1.bf16.msra.mxu1 %v4478_v35 }
 0x23f   : > { %1668 = vmatprep.mubr.f32.mxu0 %v7755_v54  ;;  %v4481_v54 = vpack.c.bf16 %v2219_v45, %v2218_v26  ;;  %4480 = vmatprep.subr.bf16.mxu1 %v7751_v11  ;;  %v2233_v26 = vld [vmem:[#allocation9 + $0xf8] sm:$0xff] }
 0x242   : > { %1669 = vmatmul.mubr.f32.gmra.mrb[10].mxu0 %v5223_v41  ;;  %4482 = vmatpush1.bf16.msra.mxu1 %v4481_v54  ;;  %v2337_v41 = vld [vmem:[#allocation9 + $0x438] sm:$0xff]  ;;  %v2338_v54 = vld [vmem:[#allocation9 + $0x440] sm:$0xff] }
 0x243   : > { %1673 = vmatprep.mubr.f32.mxu0 %v7756_v51  ;;  %v4484_v51 = vpack.c.bf16 %v2221_v60, %v2220_v18  ;;  %4483 = vmatprep.subr.bf16.mxu1 %v7751_v11  ;;  %v6537_v35 = vpack.c.bf16 %v2337_v41, %v2336_v57  ;;  %v5242_v18 = vld [vmem:[#allocation2 + $0x150] sm:$0xff]  ;;  %v2245_v57 = vld [vmem:[#allocation9 + $0x158] sm:$0xff] }
 0x245   : > { %7782 = vst [vmem:[#allocation17_spill] sm:$0xff] %v6537_v35 }
 0x246   : > { %1674 = vmatmul.mubr.f32.gmra.mrb[12].mxu0 %v5224_v50  ;;  %4485 = vmatpush1.bf16.msra.mxu1 %v4484_v51  ;;  %v2232_v50 = vld [vmem:[#allocation9 + $0xf0] sm:$0xff]  ;;  %v2150_v51 = vld [vmem:[#allocation3 + $0x10] sm:$0x3] }
 0x247   : > { %1678 = vmatprep.mubr.f32.mxu0 %v7757_v56  ;;  %v4487_v56 = vpack.c.bf16 %v2223_v22, %v2222_v2  ;;  %4486 = vmatprep.subr.bf16.mxu1 %v7751_v11  ;;  %v4502_v45 = vpack.c.bf16 %v2233_v26, %v2232_v50  ;;  %v2340_v2 = vld [vmem:[#allocation9 + $0x450] sm:$0xff]  ;;  %v2341_v22 = vld [vmem:[#allocation9 + $0x458] sm:$0xff]  ;;  %v2246_v26 = vld [vmem:[#allocation9 + $0x160] sm:$0xff] }
 0x24a   : > { %1679 = vmatmul.mubr.f32.gmra.mrb[14].mxu0 %v5225_v37  ;;  %4488 = vmatpush1.bf16.msra.mxu1 %v4487_v56  ;;  %v2339_v37 = vld [vmem:[#allocation9 + $0x448] sm:$0xff]  ;;  %v5244_v56 = vld [vmem:[#allocation2 + $0x158] sm:$0xff] }
 0x24b   : > { %1683 = vmatprep.mubr.f32.mxu0 %v7758_v13  ;;  %v4490_v13 = vpack.c.bf16 %v2225_v4, %v2224_v8  ;;  %4489 = vmatprep.subr.bf16.mxu1 %v7751_v11  ;;  %v6545_v60 = vpack.c.bf16 %v2339_v37, %v2338_v54  ;;  %v6554_v4 = vpack.c.bf16 %v2341_v22, %v2340_v2 }
 0x24d   : > { %7783 = vst [vmem:[#allocation18_spill] sm:$0xff] %v6545_v60  ;;  %7784 = vst [vmem:[#allocation19_spill] sm:$0xff] %v6554_v4 }
 0x24e   : > { %1684 = vmatmul.mubr.f32.gmra.mrb[16].mxu0 %v5226_v31  ;;  %4491 = vmatpush1.bf16.msra.mxu1 %v4490_v13  ;;  %v2398_v31 = vrot.slane %v2150_v51, 1  ;;  %v2234_v13 = vld [vmem:[#allocation9 + $0x100] sm:$0xff]  ;;  %v2248_v51 = vld [vmem:[#allocation9 + $0x170] sm:$0xff] }
 0x24f   : > { %1688 = vmatprep.mubr.f32.mxu0 %v7759_v29  ;;  %v5229_v29 = vld [vmem:[#allocation2 + $0xb0] sm:$0xff]  ;;  %4492 = vmatprep.subr.bf16.mxu1 %v7751_v11 }
 0x250   : > { %v2399_v8 = vsel %vm638_vm0, %v6466_v62, %v2398_v31 }
 0x252   : > { %1689 = vmatmul.mubr.f32.gmra.mrb[18].mxu0 %v5227_v19 }
 0x253   : > { %1693 = vmatprep.mubr.f32.mxu0 %v7760_v34  ;;  %v5231_v34 = vld [vmem:[#allocation2 + $0xc8] sm:$0xff] }
 0x256   : > { %1694 = vmatmul.mubr.f32.gmra.mrb[20].mxu0 %v5228_v25  ;;  %v2235_v25 = vld [vmem:[#allocation9 + $0x108] sm:$0xff] }
 0x257   : > { %1698 = vmatprep.mubr.f32.mxu0 %v7761_v52  ;;  %v5233_v52 = vld [vmem:[#allocation2 + $0xe0] sm:$0xff] }
 0x25a   : > { %1699 = vmatmul.mubr.f32.gmra.mrb[22].mxu0 %v5229_v29  ;;  %v4505_v29 = vpack.c.bf16 %v2235_v25, %v2234_v13 }
 0x25b   : > { %1703 = vmatprep.mubr.f32.mxu0 %v7762_v21  ;;  %v5235_v21 = vld [vmem:[#allocation2 + $0xf8] sm:$0xff] }
 0x25e   : > { %1704 = vmatmul.mubr.f32.gmra.mrb[24].mxu0 %v5230_v46  ;;  %v2342_v46 = vld [vmem:[#allocation9 + $0x460] sm:$0xff] }
 0x25f   : > { %1708 = vmatprep.mubr.f32.mxu0 %v7763_v1  ;;  %v5236_v1 = vld [vmem:[#allocation2 + $0x108] sm:$0xff] }
 0x262   : > { %1709 = vmatmul.mubr.f32.gmra.mrb[26].mxu0 %v5231_v34  ;;  %v2343_v34 = vld [vmem:[#allocation9 + $0x468] sm:$0xff] }
 0x263   : > { %1713 = vmatprep.mubr.f32.mxu0 %v7764_v48  ;;  %v5237_v48 = vld [vmem:[#allocation2 + $0x110] sm:$0xff] }
 0x266   : > { %1714 = vmatmul.mubr.f32.gmra.mrb[28].mxu0 %v5232_v36  ;;  %v5245_v36 = vld [vmem:[#allocation2 + $0x168] sm:$0xff] }
 0x267   : > { %1718 = vmatprep.mubr.f32.mxu0 %v7765_v53  ;;  %v5238_v53 = vld [vmem:[#allocation2 + $0x120] sm:$0xff] }
 0x26a   : > { %1719 = vmatmul.mubr.f32.gmra.mrb[30].mxu0 %v5233_v52  ;;  %v6561_v52 = vpack.c.bf16 %v2343_v34, %v2342_v46  ;;  %v2252_v46 = vld [vmem:[#allocation9 + $0x190] sm:$0xff]  ;;  %v2253_v34 = vld [vmem:[#allocation9 + $0x198] sm:$0xff] }
 0x26b   : > { %1723 = vmatprep.mubr.f32.mxu0 %v7766_v27  ;;  %v2227_v27 = vld [vmem:[#allocation9 + $0xc8] sm:$0xff] }
 0x26c   : > { %v4493_v23 = vpack.c.bf16 %v2227_v27, %v2226_v32  ;;  %7785 = vst [vmem:[#allocation20_spill] sm:$0xff] %v6561_v52  ;;  %v2237_v32 = vld [vmem:[#allocation9 + $0x118] sm:$0xff] }
 0x26e   : > { %1724 = vmatmul.mubr.f32.gmra.mrb[32].mxu0 %v5234_v40  ;;  %4494 = vmatpush1.bf16.msra.mxu1 %v4493_v23  ;;  %v2345_v40 = vld [vmem:[#allocation9 + $0x478] sm:$0xff]  ;;  %v887_v23 = vrot.slane %v6468_v20, 1 }
 0x26f   : > { %1728 = vmatprep.mubr.f32.mxu0 %v7767_v30  ;;  %v2332_v30 = vld [vmem:[#allocation9 + $0x410] sm:$0xff]  ;;  %4495 = vmatprep.subr.bf16.mxu1 %v7751_v11 }
 0x272   : > { %1729 = vmatmul.mubr.f32.gmra.mrb[34].mxu0 %v5235_v21  ;;  %v5246_v21 = vld [vmem:[#allocation2 + $0x170] sm:$0xff] }
 0x273   : > { %1733 = vmatprep.mubr.f32.mxu0 %v7768_v16  ;;  %v6519_v16 = vpack.c.bf16 %v2333_v55, %v2332_v30  ;;  %v888_v30 = vsel %vm638_vm0, %v6466_v62, %v887_v23  ;;  %v2238_v55 = vld [vmem:[#allocation9 + $0x120] sm:$0xff] }
 0x275   : > { %7780 = vst [vmem:[#allocation15_spill] sm:$0xff] %v6519_v16  ;;  %4653 = vmatprep.subr.bf16.mxu0 %v6519_v16 }
 0x276   : > { %1734 = vmatmul.mubr.f32.gmra.mrb[36].mxu0 %v5236_v1 }
 0x277   : > { %1738 = vmatprep.mubr.f32.mxu0 %v7769_v42  ;;  %v2228_v42 = vld [vmem:[#allocation9 + $0xd0] sm:$0xff]  ;;  %4655 = vmatpush3.bf16.msra.mxu0 %v6519_v16 }
 0x278   : > { %v4496_v10 = vpack.c.bf16 %v2229_v47, %v2228_v42 }
 0x27a   : > { %1739 = vmatmul.mubr.f32.gmra.mrb[38].mxu0 %v5237_v48  ;;  %4497 = vmatpush1.bf16.msra.mxu1 %v4496_v10 }
 0x27b   : > { %1743 = vmatprep.mubr.f32.mxu0 %v7770_v38  ;;  %4498 = vmatprep.subr.bf16.mxu1 %v7751_v11 }
 0x27d   : > { %v6522_v38 = vpop.f32.mrb[0].mxu1 }
 0x27e   : > { %1744 = vmatmul.mubr.f32.gmra.mrb[40].mxu0 %v5238_v53  ;;  %v6524_v59 = vpop.f32.mrb[1].mxu1 }
 0x27f   : > { %1748 = vmatprep.mubr.f32.mxu0 %v7771_v7  ;;  %v2334_v7 = vld [vmem:[#allocation9 + $0x420] sm:$0xff] }
 0x280   : > { %v6529_v14 = vpack.c.bf16 %v2335_v5, %v2334_v7  ;;  %v2242_v7 = vld [vmem:[#allocation9 + $0x140] sm:$0xff]  ;;  %v2243_v5 = vld [vmem:[#allocation9 + $0x148] sm:$0xff] }
 0x281   : > { %v6534_v63 = vpop.f32.mrb[2].mxu1 }
 0x282   : > { %1749 = vmatmul.mubr.f32.gmra.mrb[42].mxu0 %v5239_v9  ;;  %7781 = vst [vmem:[#allocation16_spill] sm:$0xff] %v6529_v14  ;;  %4657 = vmatprep.subr.bf16.mxu0 %v6529_v14  ;;  %v2239_v9 = vld [vmem:[#allocation9 + $0x128] sm:$0xff] }
 0x283   : > { %1753 = vmatprep.mubr.f32.mxu0 %v7772_v43  ;;  %v2231_v43 = vld [vmem:[#allocation9 + $0xe8] sm:$0xff]  ;;  %4659 = vmatpush3.bf16.msra.mxu0 %v6529_v14 }
 0x284   : > { %v4499_v12 = vpack.c.bf16 %v2231_v43, %v2230_v39  ;;  %4661 = vmatprep.subr.bf16.mxu0 %v6537_v35  ;;  %v4517_v39 = vpack.c.bf16 %v2243_v5, %v2242_v7 }
 0x286   : > { %1754 = vmatmul.mubr.f32.gmra.mrb[44].mxu0 %v5240_v58  ;;  %4500 = vmatpush1.bf16.msra.mxu1 %v4499_v12  ;;  %v2244_v12 = vld [vmem:[#allocation9 + $0x150] sm:$0xff] }
 0x287   : > { %1758 = vmatprep.mubr.f32.mxu0 %v7773_v44  ;;  %4501 = vmatprep.subr.bf16.mxu1 %v7751_v11  ;;  %v6540_v44 = vpop.f32.mrb[3].mxu1 }
 0x288   : > { %4663 = vmatpush3.bf16.msra.mxu0 %v6537_v35  ;;  %v6550_v19 = vpop.f32.mrb[4].mxu1 }
 0x289   : > { %4665 = vmatprep.subr.bf16.mxu0 %v6545_v60 }
 0x28a   : > { %1759 = vmatmul.mubr.f32.gmra.mrb[46].mxu0 %v5241_v3  ;;  %4503 = vmatpush1.bf16.msra.mxu1 %v4502_v45  ;;  %v4520_v3 = vpack.c.bf16 %v2245_v57, %v2244_v12  ;;  %v2247_v45 = vld [vmem:[#allocation9 + $0x168] sm:$0xff]  ;;  %v2260_v12 = vld [vmem:[#allocation9 + $0x1d0] sm:$0xff]  ;;  %v2261_v57 = vld [vmem:[#allocation9 + $0x1d8] sm:$0xff] }
 0x28b   : > { %1763 = vmatprep.mubr.f32.mxu0 %v7774_v28  ;;  %4504 = vmatprep.subr.bf16.mxu1 %v7751_v11  ;;  %v5243_v28 = vld [vmem:[#allocation2] sm:$0xff]  ;;  %v4523_v37 = vpack.c.bf16 %v2247_v45, %v2246_v26  ;;  %v4544_v26 = vpack.c.bf16 %v2261_v57, %v2260_v12 }
 0x28c   : > { %4667 = vmatpush3.bf16.msra.mxu0 %v6545_v60  ;;  %v6646_v45 = vld [vmem:[%s7563_s2] ss:$0 sm:$0xff] }
 0x28d   : > { %2724 = vmatmul.mubr.f32.vlgmr.msra.gmra.mrb[32].mxu1 %v5243_v28  ;;  %4669 = vmatprep.subr.bf16.mxu0 %v6554_v4 }
 0x28e   : > { %1764 = vmatmul.mubr.f32.gmra.mrb[48].mxu0 %v5242_v18  ;;  %2728 = vmatprep.mubr.f32.mxu1 %v2399_v8  ;;  %v2251_v8 = vld [vmem:[#allocation9 + $0x188] sm:$0xff] }
 0x28f   : > { %1768 = vmatprep.mubr.f32.mxu0 %v7775_v0  ;;  %v6557_v0 = vpop.f32.mrb[5].mxu1  ;;  %4506 = vmatpush1.bf16.msra.mxu1 %v4505_v29 }
 0x290   : > { %4671 = vmatpush3.bf16.msra.mxu0 %v6554_v4  ;;  %4507 = vmatprep.subr.bf16.mxu1 %v7751_v11  ;;  %v6567_v1 = vpop.f32.mrb[6].mxu1 }
 0x291   : > { %2729 = vmatmul.mubr.f32.gmra.mrb[34].mxu1 %v5243_v28  ;;  %4673 = vmatprep.subr.bf16.mxu0 %v6561_v52  ;;  %v6572_v53 = vpop.f32.mrb[7].mxu1 }
 0x292   : > { %1769 = vmatmul.mubr.f32.gmra.mrb[50].mxu0 %v5244_v56  ;;  %v2250_v56 = vld [vmem:[#allocation9 + $0x180] sm:$0xff] }
 0x293   : > { %1773 = vmatprep.mubr.f32.mxu0 %v7776_v6  ;;  %v2344_v6 = vld [vmem:[#allocation9 + $0x470] sm:$0xff]  ;;  %v4529_v25 = vpack.c.bf16 %v2251_v8, %v2250_v56  ;;  %v2262_v56 = vld [vmem:[#allocation9 + $0x1e0] sm:$0xff]  ;;  %v2263_v8 = vld [vmem:[#allocation9 + $0x1e8] sm:$0xff] }
 0x294   : > { %4675 = vmatpush3.bf16.msra.mxu0 %v6561_v52  ;;  %v6569_v48 = vpack.c.bf16 %v2345_v40, %v2344_v6  ;;  %v4532_v6 = vpack.c.bf16 %v2253_v34, %v2252_v46  ;;  %v4547_v46 = vpack.c.bf16 %v2263_v8, %v2262_v56 }
 0x296   : > { %1774 = vmatmul.mubr.f32.gmra.mrb[52].mxu0 %v5245_v36  ;;  %7786 = vst [vmem:[#allocation21_spill] sm:$0xff] %v6569_v48  ;;  %4677 = vmatprep.subr.bf16.mxu0 %v6569_v48 }
 0x297   : > { %1778 = vmatprep.mubr.f32.mxu0 %v7777_v15  ;;  %v2236_v15 = vld [vmem:[#allocation9 + $0x110] sm:$0xff] }
 0x298   : > { %v4508_v27 = vpack.c.bf16 %v2237_v32, %v2236_v15  ;;  %4679 = vmatpush3.bf16.msra.mxu0 %v6569_v48  ;;  %v2255_v15 = vld [vmem:[#allocation9 + $0x1a8] sm:$0xff] }
 0x29a   : > { %1779 = vmatmul.mubr.f32.gmra.mrb[54].mxu0 %v5246_v21  ;;  %4509 = vmatpush1.bf16.msra.mxu1 %v4508_v27  ;;  %v2254_v21 = vld [vmem:[#allocation9 + $0x1a0] sm:$0xff] }
 0x29b   : > { %1783 = vmatprep.mubr.f32.mxu0 %v6462_v49  ;;  %4510 = vmatprep.subr.bf16.mxu1 %v7751_v11  ;;  %v6582_v49 = vpop.f32.mrb[8].mxu1  ;;  %v4535_v27 = vpack.c.bf16 %v2255_v15, %v2254_v21 }
 0x29c   : > { %v6586_v42 = vpop.f32.mrb[9].mxu1 }
 0x29d   : > { %v6589_v20 = vpop.f32.mrb[10].mxu1 }
 0x29e   : > { %1784 = vmatmul.mubr.f32.gmra.mrb[56].mxu0 %v6333_v33  ;;  %v4511_v33 = vpack.c.bf16 %v2239_v9, %v2238_v55  ;;  %v6591_v47 = vpop.f32.mrb[11].mxu1  ;;  %v2257_v55 = vld [vmem:[#allocation9 + $0x1b8] sm:$0xff] }
 0x29f   : > { %1788 = vmatprep.mubr.f32.mxu0 %v6476_v24  ;;  %v2241_v24 = vld [vmem:[#allocation9 + $0x138] sm:$0xff] }
 0x2a0   : > { %4512 = vmatpush1.bf16.msra.mxu1 %v4511_v33 }
 0x2a1   : > { %4513 = vmatprep.subr.bf16.mxu1 %v7751_v11 }
 0x2a2   : > { %1789 = vmatmul.mubr.f32.gmra.mrb[58].mxu0 %v6341_v17  ;;  %v2240_v17 = vld [vmem:[#allocation9 + $0x130] sm:$0xff] }
 0x2a3   : > { %1793 = vmatprep.mubr.f32.mxu0 %v6466_v62  ;;  %v4514_v10 = vpack.c.bf16 %v2241_v24, %v2240_v17  ;;  %v6594_v62 = vpop.f32.mrb[12].mxu1  ;;  %v2258_v24 = vld [vmem:[#allocation9 + $0x1c0] sm:$0xff] }
 0x2a4   : > { %v6596_v58 = vpop.f32.mrb[13].mxu1 }
 0x2a5   : > { %4515 = vmatpush1.bf16.msra.mxu1 %v4514_v10  ;;  %v6599_v43 = vpop.f32.mrb[14].mxu1  ;;  %v2259_v10 = vld [vmem:[#allocation9 + $0x1c8] sm:$0xff] }
 0x2a6   : > { %1794 = vmatmul.mubr.f32.gmra.mrb[60].mxu0 %v5243_v28  ;;  %4516 = vmatprep.subr.bf16.mxu1 %v7751_v11  ;;  %v6601_v41 = vpop.f32.mrb[15].mxu1  ;;  %v4541_v5 = vpack.c.bf16 %v2259_v10, %v2258_v24 }
 0x2a7   : > { %1798 = vmatprep.mubr.f32.mxu0 %v888_v30  ;;  %v6604_v50 = vpop.f32.mrb[16].mxu1  ;;  %v2256_v30 = vld [vmem:[#allocation9 + $0x1b0] sm:$0xff] }
 0x2a8   : > { %v6606_v54 = vpop.f32.mrb[17].mxu1  ;;  %v4538_v33 = vpack.c.bf16 %v2257_v55, %v2256_v30  ;;  %v2264_v30 = vld [vmem:[#allocation9 + $0x1f0] sm:$0xff]  ;;  %v2265_v55 = vld [vmem:[#allocation9 + $0x1f8] sm:$0xff] }
 0x2a9   : > { %4518 = vmatpush1.bf16.msra.mxu1 %v4517_v39  ;;  %v6609_v18 = vpop.f32.mrb[18].mxu1  ;;  %v4550_v10 = vpack.c.bf16 %v2265_v55, %v2264_v30 }
 0x2aa   : > { %1799 = vmatmul.mubr.f32.gmra.mrb[62].mxu0 %v5243_v28  ;;  %4519 = vmatprep.subr.bf16.mxu1 %v7751_v11  ;;  %v2249_v28 = vld [vmem:[#allocation9 + $0x178] sm:$0xff]  ;;  %v6611_v31 = vpop.f32.mrb[19].mxu1 }
 0x2ab   : > { %v4526_v2 = vpack.c.bf16 %v2249_v28, %v2248_v51  ;;  %v6614_v22 = vpop.f32.mrb[20].mxu1 }
 0x2ac   : > { %v6616_v13 = vpop.f32.mrb[21].mxu1 }
 0x2ad   : > { %4521 = vmatpush1.bf16.msra.mxu1 %v4520_v3  ;;  %v6619_v29 = vpop.f32.mrb[22].mxu1 }
 0x2ae   : > { %4522 = vmatprep.subr.bf16.mxu1 %v7751_v11  ;;  %v6621_v36 = vpop.f32.mrb[23].mxu1 }
 0x2af   : > { %v6624_v40 = vpop.f32.mrb[24].mxu1 }
 0x2b0   : > { %v6626_v32 = vpop.f32.mrb[25].mxu1 }
 0x2b1   : > { %4524 = vmatpush1.bf16.msra.mxu1 %v4523_v37  ;;  %v6629_v23 = vpop.f32.mrb[26].mxu1 }
 0x2b2   : > { %4525 = vmatprep.subr.bf16.mxu1 %v7751_v11  ;;  %v6631_v9 = vpop.f32.mrb[27].mxu1 }
 0x2b5   : > { %4527 = vmatpush1.bf16.msra.mxu1 %v4526_v2 }
 0x2b6   : > { %4528 = vmatprep.subr.bf16.mxu1 %v7751_v11 }
 0x2b7   : > { %v6634_v17 = vpop.f32.mrb[28].mxu1 }
 0x2b8   : > { %v6636_v7 = vpop.f32.mrb[29].mxu1 }
 0x2b9   : > { %4530 = vmatpush1.bf16.msra.mxu1 %v4529_v25 }
 0x2ba   : > { %4531 = vmatprep.subr.bf16.mxu1 %v7751_v11 }
 0x2bd   : > { %4533 = vmatpush1.bf16.msra.mxu1 %v4532_v6 }
 0x2be   : > { %4534 = vmatprep.subr.bf16.mxu1 %v7751_v11 }
 0x2c1   : > { %4536 = vmatpush1.bf16.msra.mxu1 %v4535_v27 }
 0x2c2   : > { %4537 = vmatprep.subr.bf16.mxu1 %v7751_v11 }
 0x2c5   : > { %4539 = vmatpush1.bf16.msra.mxu1 %v4538_v33 }
 0x2c6   : > { %4540 = vmatprep.subr.bf16.mxu1 %v7751_v11 }
 0x2c9   : > { %4542 = vmatpush1.bf16.msra.mxu1 %v4541_v5 }
 0x2ca   : > { %4543 = vmatprep.subr.bf16.mxu1 %v7751_v11 }
 0x2cd   : > { %4545 = vmatpush1.bf16.msra.mxu1 %v4544_v26 }
 0x2ce   : > { %4546 = vmatprep.subr.bf16.mxu1 %v7751_v11 }
 0x2d1   : > { %4548 = vmatpush1.bf16.msra.mxu1 %v4547_v46 }
 0x2d2   : > { %4549 = vmatprep.subr.bf16.mxu1 %v7751_v11 }
 0x2d5   : > { %4551 = vmatpush1.bf16.msra.mxu1 %v4550_v10 }
 0x2d6   : > { %4552 = vmatprep.subr.bf16.mxu1 %v7751_v11 }
 0x2f3   : > { %v6639_v39 = vpop.f32.mrb[30].mxu1 }
 0x2f4   : > { %v6641_v3 = vpop.f32.mrb[31].mxu1 }
 0x301   : > { %v1645_v37 = vpop.f32.mrb[0].mxu0 }
 0x302   : > { %v4696_v51 = vadd.f32 %v6646_v45, %v1645_v37  ;;  %v1647_v28 = vpop.f32.mrb[1].mxu0 }
 0x304   : > { %v1871_v2 = vadd.f32 %v4696_v51, %v6524_v59 }
 0x305   : > { %v1650_v25 = vpop.f32.mrb[2].mxu0 }
 0x306   : > { %v2029_v34 = vmax.f32 %v1871_v2, 0.0  ;;  %v4697_v6 = vadd.f32 %v6646_v45, %v1650_v25  ;;  %v1652_v21 = vpop.f32.mrb[3].mxu0 }
 0x308   : > { %2116 = vst [vmem:[#allocation3 + $0x19] sm:$0xff] %v2029_v34  ;;  %v1876_v15 = vadd.f32 %v4697_v6, %v6522_v38 }
 0x309   : > { %v1655_v27 = vpop.f32.mrb[4].mxu0 }
 0x30a   : > { %v2030_v33 = vmax.f32 %v1876_v15, 0.0  ;;  %v4698_v59 = vadd.f32 %v6646_v45, %v1655_v27  ;;  %v1657_v24 = vpop.f32.mrb[5].mxu0 }
 0x30c   : > { %2117 = vst [vmem:[#allocation3 + $0x21] sm:$0xff] %v2030_v33  ;;  %v1881_v5 = vadd.f32 %v4698_v59, %v6540_v44 }
 0x30d   : > { %v1660_v12 = vpop.f32.mrb[6].mxu0 }
 0x30e   : > { %v2031_v57 = vmax.f32 %v1881_v5, 0.0  ;;  %v4699_v38 = vadd.f32 %v6646_v45, %v1660_v12  ;;  %v1662_v26 = vpop.f32.mrb[7].mxu0 }
 0x30f   : > { %v6659_v28 = vld [vmem:[#allocation3 + $0x18] sm:$0xff] }
 0x310   : > { %2118 = vst [vmem:[#allocation3 + $0x31] sm:$0xff] %v2031_v57  ;;  %v1886_v37 = vadd.f32 %v4699_v38, %v6534_v63  ;;  %v2400_v34 = vrot.slane %v6659_v28, 1 }
 0x311   : > { %v1665_v51 = vpop.f32.mrb[8].mxu0 }
 0x312   : > { %v2032_v2 = vmax.f32 %v1886_v37, 0.0  ;;  %v4700_v56 = vadd.f32 %v6646_v45, %v1665_v51  ;;  %v1667_v8 = vpop.f32.mrb[9].mxu0 }
 0x313   : > { %v6662_v25 = vld [vmem:[#allocation3 + $0x20] sm:$0xff]  ;;  %v6664_v44 = vld [vmem:[#allocation3 + $0x28] sm:$0x3] }
 0x314   : > { %2119 = vst [vmem:[#allocation3 + $0x39] sm:$0xff] %v2032_v2  ;;  %v1891_v46 = vadd.f32 %v4700_v56, %v6557_v0  ;;  %v2401_v6 = vrot.slane %v6662_v25, 1  ;;  %v2403_v63 = vrot.slane %v6664_v44, 1 }
 0x315   : > { %v1670_v21 = vpop.f32.mrb[10].mxu0 }
 0x316   : > { %v2033_v15 = vmax.f32 %v1891_v46, 0.0  ;;  %v4701_v27 = vadd.f32 %v6646_v45, %v1670_v21  ;;  %v1672_v30 = vpop.f32.mrb[11].mxu0  ;;  %v6672_v55 = vsel %vm638_vm0, %v2400_v34, %v2401_v6  ;;  %v6678_v0 = vsel %vm638_vm0, %v2401_v6, %v2403_v63 }
 0x317   : > { %7787 = vst [vmem:[#allocation22_spill] sm:$0xff] %v6672_v55  ;;  %2733 = vmatprep.mubr.f32.mxu1 %v6672_v55  ;;  %7788 = vst [vmem:[#allocation23_spill] sm:$0xff] %v6678_v0  ;;  %v6680_v59 = vld [vmem:[#allocation3 + $0x30] sm:$0xff] }
 0x318   : > { %2120 = vst [vmem:[#allocation3 + $0x49] sm:$0xff] %v2033_v15  ;;  %v1896_v33 = vadd.f32 %v4701_v27, %v6550_v19  ;;  %2734 = vmatmul.mubr.f32.gmra.mrb[36].mxu1 %v6659_v28  ;;  %v2405_v38 = vrot.slane %v6680_v59, 1  ;;  %v2517_v19 = vrot.slane %v6680_v59, 2 }
 0x319   : > { %v1675_v24 = vpop.f32.mrb[12].mxu0  ;;  %2738 = vmatprep.mubr.f32.mxu1 %v6678_v0 }
 0x31a   : > { %v2034_v10 = vmax.f32 %v1896_v33, 0.0  ;;  %v4702_v5 = vadd.f32 %v6646_v45, %v1675_v24  ;;  %v1677_v12 = vpop.f32.mrb[13].mxu0 }
 0x31b   : > { %v6684_v57 = vld [vmem:[#allocation3 + $0x38] sm:$0xff]  ;;  %v2156_v26 = vld [vmem:[#allocation3 + $0x40] sm:$0x3] }
 0x31c   : > { %2121 = vst [vmem:[#allocation3 + $0x51] sm:$0xff] %v2034_v10  ;;  %v1901_v37 = vadd.f32 %v4702_v5, %v6572_v53  ;;  %2739 = vmatmul.mubr.f32.gmra.mrb[38].mxu1 %v6662_v25  ;;  %v2406_v51 = vrot.slane %v6684_v57, 1  ;;  %v2518_v2 = vrot.slane %v6684_v57, 2  ;;  %v2520_v56 = vrot.slane %v2156_v26, 2 }
 0x31d   : > { %v1680_v8 = vpop.f32.mrb[14].mxu0  ;;  %v2408_v46 = vrot.slane %v2156_v26, 1 }
 0x31e   : > { %v2035_v34 = vmax.f32 %v1901_v37, 0.0  ;;  %v4703_v6 = vadd.f32 %v6646_v45, %v1680_v8  ;;  %v1682_v63 = vpop.f32.mrb[15].mxu0  ;;  %v6694_v21 = vsel %vm638_vm0, %v2405_v38, %v2406_v51  ;;  %v6697_v15 = vsel %vm751_vm1, %v2517_v19, %v2518_v2 }
 0x31f   : > { %7789 = vst [vmem:[#allocation24_spill] sm:$0xff] %v6694_v21  ;;  %2743 = vmatprep.mubr.f32.mxu1 %v6694_v21  ;;  %4184 = vmatprep.mubr.f32.mxu0 %v6697_v15  ;;  %v6702_v53 = vsel %vm751_vm1, %v2518_v2, %v2520_v56  ;;  %v6708_v30 = vsel %vm638_vm0, %v2406_v51, %v2408_v46  ;;  %v6710_v33 = vld [vmem:[#allocation3 + $0x48] sm:$0xff] }
 0x320   : > { %2122 = vst [vmem:[#allocation3 + $0x61] sm:$0xff] %v2035_v34  ;;  %v1906_v27 = vadd.f32 %v4703_v6, %v6567_v1  ;;  %2744 = vmatmul.mubr.f32.gmra.mrb[40].mxu1 %v6680_v59  ;;  %4185 = vmatmul.mubr.f32.vlgmr.msra.gmra.mrb[64].mxu0 %v6702_v53  ;;  %7790 = vst [vmem:[#allocation25_spill] sm:$0xff] %v6708_v30  ;;  %v2410_v1 = vrot.slane %v6710_v33, 1  ;;  %v2522_v19 = vrot.slane %v6710_v33, 2 }
 0x321   : > { %v1685_v24 = vpop.f32.mrb[16].mxu0  ;;  %2748 = vmatprep.mubr.f32.mxu1 %v6708_v30 }
 0x322   : > { %v2036_v10 = vmax.f32 %v1906_v27, 0.0  ;;  %v4704_v5 = vadd.f32 %v6646_v45, %v1685_v24  ;;  %v1687_v12 = vpop.f32.mrb[17].mxu0 }
 0x323   : > { %v6714_v38 = vld [vmem:[#allocation3 + $0x50] sm:$0xff]  ;;  %v2159_v26 = vld [vmem:[#allocation3 + $0x58] sm:$0x3] }
 0x324   : > { %2123 = vst [vmem:[#allocation3 + $0x69] sm:$0xff] %v2036_v10  ;;  %v1911_v37 = vadd.f32 %v4704_v5, %v6586_v42  ;;  %2749 = vmatmul.mubr.f32.gmra.mrb[42].mxu1 %v6684_v57  ;;  %v2411_v51 = vrot.slane %v6714_v38, 1  ;;  %v2523_v2 = vrot.slane %v6714_v38, 2  ;;  %v2525_v56 = vrot.slane %v2159_v26, 2 }
 0x325   : > { %v1690_v8 = vpop.f32.mrb[18].mxu0  ;;  %v2413_v46 = vrot.slane %v2159_v26, 1 }
 0x326   : > { %v2037_v34 = vmax.f32 %v1911_v37, 0.0  ;;  %v4705_v6 = vadd.f32 %v6646_v45, %v1690_v8  ;;  %v1692_v63 = vpop.f32.mrb[19].mxu0  ;;  %v6724_v27 = vsel %vm638_vm0, %v2410_v1, %v2411_v51  ;;  %v6727_v24 = vsel %vm751_vm1, %v2522_v19, %v2523_v2 }
 0x327   : > { %7791 = vst [vmem:[#allocation26_spill] sm:$0xff] %v6724_v27  ;;  %2753 = vmatprep.mubr.f32.mxu1 %v6724_v27  ;;  %4187 = vmatprep.mubr.f32.mxu0 %v6727_v24  ;;  %v6732_v42 = vsel %vm751_vm1, %v2523_v2, %v2525_v56  ;;  %v6738_v5 = vsel %vm638_vm0, %v2411_v51, %v2413_v46  ;;  %v6740_v12 = vld [vmem:[#allocation3 + $0x60] sm:$0xff] }
 0x328   : > { %2124 = vst [vmem:[#allocation3 + $0x79] sm:$0xff] %v2037_v34  ;;  %v1916_v10 = vadd.f32 %v4705_v6, %v6582_v49  ;;  %2754 = vmatmul.mubr.f32.gmra.mrb[44].mxu1 %v6710_v33  ;;  %4188 = vmatmul.mubr.f32.gmra.mrb[66].mxu0 %v6732_v42  ;;  %7792 = vst [vmem:[#allocation27_spill] sm:$0xff] %v6738_v5  ;;  %v2415_v49 = vrot.slane %v6740_v12, 1  ;;  %v2527_v56 = vrot.slane %v6740_v12, 2 }
 0x329   : > { %v1695_v1 = vpop.f32.mrb[20].mxu0  ;;  %2758 = vmatprep.mubr.f32.mxu1 %v6738_v5 }
 0x32a   : > { %v2038_v19 = vmax.f32 %v1916_v10, 0.0  ;;  %v4706_v26 = vadd.f32 %v6646_v45, %v1695_v1  ;;  %v1697_v37 = vpop.f32.mrb[21].mxu0 }
 0x32b   : > { %v6744_v2 = vld [vmem:[#allocation3 + $0x68] sm:$0xff]  ;;  %v2162_v8 = vld [vmem:[#allocation3 + $0x70] sm:$0x3] }
 0x32c   : > { %2125 = vst [vmem:[#allocation3 + $0x81] sm:$0xff] %v2038_v19  ;;  %v1921_v51 = vadd.f32 %v4706_v26, %v6591_v47  ;;  %2759 = vmatmul.mubr.f32.gmra.mrb[46].mxu1 %v6714_v38  ;;  %v2416_v46 = vrot.slane %v6744_v2, 1  ;;  %v2528_v34 = vrot.slane %v6744_v2, 2  ;;  %v2530_v6 = vrot.slane %v2162_v8, 2 }
 0x32d   : > { %v1700_v63 = vpop.f32.mrb[22].mxu0  ;;  %v2418_v10 = vrot.slane %v2162_v8, 1 }
 0x32e   : > { %v2039_v1 = vmax.f32 %v1921_v51, 0.0  ;;  %v4707_v37 = vadd.f32 %v6646_v45, %v1700_v63  ;;  %v1702_v48 = vpop.f32.mrb[23].mxu0  ;;  %v6754_v52 = vsel %vm638_vm0, %v2415_v49, %v2416_v46  ;;  %v6757_v19 = vsel %vm751_vm1, %v2527_v56, %v2528_v34 }
 0x32f   : > { %7793 = vst [vmem:[#allocation28_spill] sm:$0xff] %v6754_v52  ;;  %2763 = vmatprep.mubr.f32.mxu1 %v6754_v52  ;;  %4190 = vmatprep.mubr.f32.mxu0 %v6757_v19  ;;  %v6762_v47 = vsel %vm751_vm1, %v2528_v34, %v2530_v6  ;;  %v6768_v48 = vsel %vm638_vm0, %v2416_v46, %v2418_v10  ;;  %v6770_v49 = vld [vmem:[#allocation3 + $0x78] sm:$0xff] }
 0x330   : > { %2126 = vst [vmem:[#allocation3 + $0x91] sm:$0xff] %v2039_v1  ;;  %v1926_v26 = vadd.f32 %v4707_v37, %v6589_v20  ;;  %2764 = vmatmul.mubr.f32.gmra.mrb[48].mxu1 %v6740_v12  ;;  %4191 = vmatmul.mubr.f32.gmra.mrb[68].mxu0 %v6762_v47  ;;  %7794 = vst [vmem:[#allocation29_spill] sm:$0xff] %v6768_v48  ;;  %v2420_v20 = vrot.slane %v6770_v49, 1  ;;  %v2532_v63 = vrot.slane %v6770_v49, 2 }
 0x331   : > { %v1705_v56 = vpop.f32.mrb[24].mxu0  ;;  %2768 = vmatprep.mubr.f32.mxu1 %v6768_v48 }
 0x332   : > { %v2040_v8 = vmax.f32 %v1926_v26, 0.0  ;;  %v4708_v51 = vadd.f32 %v6646_v45, %v1705_v56  ;;  %v1707_v34 = vpop.f32.mrb[25].mxu0 }
 0x333   : > { %v6774_v6 = vld [vmem:[#allocation3 + $0x80] sm:$0xff]  ;;  %v2165_v1 = vld [vmem:[#allocation3 + $0x88] sm:$0x3] }
 0x334   : > { %2127 = vst [vmem:[#allocation3 + $0x99] sm:$0xff] %v2040_v8  ;;  %v1931_v46 = vadd.f32 %v4708_v51, %v6596_v58  ;;  %2769 = vmatmul.mubr.f32.gmra.mrb[50].mxu1 %v6744_v2  ;;  %v2421_v10 = vrot.slane %v6774_v6, 1  ;;  %v2533_v37 = vrot.slane %v6774_v6, 2  ;;  %v2535_v26 = vrot.slane %v2165_v1, 2 }
 0x335   : > { %v1710_v4 = vpop.f32.mrb[26].mxu0  ;;  %v2423_v56 = vrot.slane %v2165_v1, 1 }
 0x336   : > { %v2041_v34 = vmax.f32 %v1931_v46, 0.0  ;;  %v4709_v60 = vadd.f32 %v6646_v45, %v1710_v4  ;;  %v1712_v35 = vpop.f32.mrb[27].mxu0  ;;  %v6784_v14 = vsel %vm638_vm0, %v2420_v20, %v2421_v10  ;;  %v6787_v8 = vsel %vm751_vm1, %v2532_v63, %v2533_v37 }
 0x337   : > { %7795 = vst [vmem:[#allocation30_spill] sm:$0xff] %v6784_v14  ;;  %2773 = vmatprep.mubr.f32.mxu1 %v6784_v14  ;;  %4193 = vmatprep.mubr.f32.mxu0 %v6787_v8  ;;  %v6792_v58 = vsel %vm751_vm1, %v2533_v37, %v2535_v26  ;;  %v6798_v35 = vsel %vm638_vm0, %v2421_v10, %v2423_v56  ;;  %v6800_v4 = vld [vmem:[#allocation3 + $0x90] sm:$0xff] }
 0x338   : > { %2128 = vst [vmem:[#allocation3 + $0xa9] sm:$0xff] %v2041_v34  ;;  %v1936_v51 = vadd.f32 %v4709_v60, %v6594_v62  ;;  %2774 = vmatmul.mubr.f32.gmra.mrb[52].mxu1 %v6770_v49  ;;  %4194 = vmatmul.mubr.f32.gmra.mrb[70].mxu0 %v6792_v58  ;;  %7796 = vst [vmem:[#allocation31_spill] sm:$0xff] %v6798_v35  ;;  %v2425_v60 = vrot.slane %v6800_v4, 1  ;;  %v2537_v62 = vrot.slane %v6800_v4, 2 }
 0x339   : > { %v1715_v20 = vpop.f32.mrb[28].mxu0  ;;  %2778 = vmatprep.mubr.f32.mxu1 %v6798_v35 }
 0x33a   : > { %v2042_v63 = vmax.f32 %v1936_v51, 0.0  ;;  %v4710_v1 = vadd.f32 %v6646_v45, %v1715_v20  ;;  %v1717_v46 = vpop.f32.mrb[29].mxu0 }
 0x33b   : > { %v6804_v37 = vld [vmem:[#allocation3 + $0x98] sm:$0xff]  ;;  %v2168_v26 = vld [vmem:[#allocation3 + $0xa0] sm:$0x3] }
 0x33c   : > { %2129 = vst [vmem:[#allocation3 + $0xb1] sm:$0xff] %v2042_v63  ;;  %v1941_v10 = vadd.f32 %v4710_v1, %v6601_v41  ;;  %2779 = vmatmul.mubr.f32.gmra.mrb[54].mxu1 %v6774_v6  ;;  %v2426_v56 = vrot.slane %v6804_v37, 1  ;;  %v2538_v34 = vrot.slane %v6804_v37, 2  ;;  %v2540_v51 = vrot.slane %v2168_v26, 2 }
 0x33d   : > { %v1720_v16 = vpop.f32.mrb[30].mxu0  ;;  %v2428_v20 = vrot.slane %v2168_v26, 1 }
 0x33e   : > { %v2043_v46 = vmax.f32 %v1941_v10, 0.0  ;;  %v4711_v61 = vadd.f32 %v6646_v45, %v1720_v16  ;;  %v1722_v35 = vpop.f32.mrb[31].mxu0  ;;  %v6814_v14 = vsel %vm638_vm0, %v2425_v60, %v2426_v56  ;;  %v6817_v63 = vsel %vm751_vm1, %v2537_v62, %v2538_v34 }
 0x33f   : > { %7797 = vst [vmem:[#allocation32_spill] sm:$0xff] %v6814_v14  ;;  %2783 = vmatprep.mubr.f32.mxu1 %v6814_v14  ;;  %4196 = vmatprep.mubr.f32.mxu0 %v6817_v63  ;;  %v6822_v41 = vsel %vm751_vm1, %v2538_v34, %v2540_v51  ;;  %v6828_v16 = vsel %vm638_vm0, %v2426_v56, %v2428_v20  ;;  %v6830_v35 = vld [vmem:[#allocation3 + $0xa8] sm:$0xff] }
 0x340   : > { %2130 = vst [vmem:[#allocation3 + $0xc1] sm:$0xff] %v2043_v46  ;;  %v1946_v1 = vadd.f32 %v4711_v61, %v6599_v43  ;;  %2784 = vmatmul.mubr.f32.gmra.mrb[56].mxu1 %v6800_v4  ;;  %4197 = vmatmul.mubr.f32.gmra.mrb[72].mxu0 %v6822_v41  ;;  %7798 = vst [vmem:[#allocation33_spill] sm:$0xff] %v6828_v16  ;;  %v2430_v61 = vrot.slane %v6830_v35, 1  ;;  %v2542_v43 = vrot.slane %v6830_v35, 2 }
 0x341   : > { %v1725_v60 = vpop.f32.mrb[32].mxu0  ;;  %2788 = vmatprep.mubr.f32.mxu1 %v6828_v16 }
 0x342   : > { %v2044_v62 = vmax.f32 %v1946_v1, 0.0  ;;  %v4712_v26 = vadd.f32 %v6646_v45, %v1725_v60  ;;  %v1727_v10 = vpop.f32.mrb[33].mxu0 }
 0x343   : > { %v6834_v34 = vld [vmem:[#allocation3 + $0xb0] sm:$0xff]  ;;  %v2171_v51 = vld [vmem:[#allocation3 + $0xb8] sm:$0x3] }
 0x344   : > { %2131 = vst [vmem:[#allocation3 + $0xc9] sm:$0xff] %v2044_v62  ;;  %v1951_v56 = vadd.f32 %v4712_v26, %v6606_v54  ;;  %2789 = vmatmul.mubr.f32.gmra.mrb[58].mxu1 %v6804_v37  ;;  %v2431_v20 = vrot.slane %v6834_v34, 1  ;;  %v2543_v46 = vrot.slane %v6834_v34, 2  ;;  %v2545_v1 = vrot.slane %v2171_v51, 2 }
 0x345   : > { %v1730_v16 = vpop.f32.mrb[34].mxu0  ;;  %v2433_v60 = vrot.slane %v2171_v51, 1 }
 0x346   : > { %v2045_v10 = vmax.f32 %v1951_v56, 0.0  ;;  %v4713_v14 = vadd.f32 %v6646_v45, %v1730_v16  ;;  %v1732_v48 = vpop.f32.mrb[35].mxu0  ;;  %v6844_v52 = vsel %vm638_vm0, %v2430_v61, %v2431_v20  ;;  %v6847_v62 = vsel %vm751_vm1, %v2542_v43, %v2543_v46 }
 0x347   : > { %7799 = vst [vmem:[#allocation34_spill] sm:$0xff] %v6844_v52  ;;  %2793 = vmatprep.mubr.f32.mxu1 %v6844_v52  ;;  %4199 = vmatprep.mubr.f32.mxu0 %v6847_v62  ;;  %v6852_v54 = vsel %vm751_vm1, %v2543_v46, %v2545_v1  ;;  %v6858_v48 = vsel %vm638_vm0, %v2431_v20, %v2433_v60  ;;  %v6860_v16 = vld [vmem:[#allocation3 + $0xc0] sm:$0xff] }
 0x348   : > { %2132 = vst [vmem:[#allocation3 + $0xd9] sm:$0xff] %v2045_v10  ;;  %v1956_v26 = vadd.f32 %v4713_v14, %v6604_v50  ;;  %2794 = vmatmul.mubr.f32.gmra.mrb[60].mxu1 %v6830_v35  ;;  %4200 = vmatmul.mubr.f32.gmra.mrb[74].mxu0 %v6852_v54  ;;  %7800 = vst [vmem:[#allocation35_spill] sm:$0xff] %v6858_v48  ;;  %v2435_v14 = vrot.slane %v6860_v16, 1  ;;  %v2547_v50 = vrot.slane %v6860_v16, 2 }
 0x349   : > { %v1735_v61 = vpop.f32.mrb[36].mxu0  ;;  %2798 = vmatprep.mubr.f32.mxu1 %v6858_v48 }
 0x34a   : > { %v2046_v43 = vmax.f32 %v1956_v26, 0.0  ;;  %v4714_v51 = vadd.f32 %v6646_v45, %v1735_v61  ;;  %v1737_v56 = vpop.f32.mrb[37].mxu0 }
 0x34b   : > { %v6864_v46 = vld [vmem:[#allocation3 + $0xc8] sm:$0xff]  ;;  %v2174_v1 = vld [vmem:[#allocation3 + $0xd0] sm:$0x3] }
 0x34c   : > { %2133 = vst [vmem:[#allocation3 + $0xe1] sm:$0xff] %v2046_v43  ;;  %v1961_v20 = vadd.f32 %v4714_v51, %v6611_v31  ;;  %2799 = vmatmul.mubr.f32.gmra.mrb[62].mxu1 %v6834_v34  ;;  %v2436_v60 = vrot.slane %v6864_v46, 1  ;;  %v2548_v10 = vrot.slane %v6864_v46, 2  ;;  %v2550_v26 = vrot.slane %v2174_v1, 2 }
 0x34d   : > { %v1740_v48 = vpop.f32.mrb[38].mxu0  ;;  %v2438_v61 = vrot.slane %v2174_v1, 1 }
 0x34e   : > { %v2047_v56 = vmax.f32 %v1961_v20, 0.0  ;;  %v4715_v52 = vadd.f32 %v6646_v45, %v1740_v48  ;;  %v1742_v5 = vpop.f32.mrb[39].mxu0  ;;  %v6874_v27 = vsel %vm638_vm0, %v2435_v14, %v2436_v60  ;;  %v6877_v43 = vsel %vm751_vm1, %v2547_v50, %v2548_v10 }
 0x34f   : > { %7801 = vst [vmem:[#allocation36_spill] sm:$0xff] %v6874_v27  ;;  %2803 = vmatprep.mubr.f32.mxu1 %v6874_v27  ;;  %4202 = vmatprep.mubr.f32.mxu0 %v6877_v43  ;;  %v6882_v31 = vsel %vm751_vm1, %v2548_v10, %v2550_v26  ;;  %v6888_v5 = vsel %vm638_vm0, %v2436_v60, %v2438_v61  ;;  %v6890_v48 = vld [vmem:[#allocation3 + $0xd8] sm:$0xff] }
 0x350   : > { %2134 = vst [vmem:[#allocation3 + $0xf1] sm:$0xff] %v2047_v56  ;;  %v1966_v51 = vadd.f32 %v4715_v52, %v6609_v18  ;;  %2804 = vmatmul.mubr.f32.gmra.mrb[64].mxu1 %v6860_v16  ;;  %4203 = vmatmul.mubr.f32.gmra.mrb[76].mxu0 %v6882_v31  ;;  %7802 = vst [vmem:[#allocation37_spill] sm:$0xff] %v6888_v5  ;;  %v2440_v52 = vrot.slane %v6890_v48, 1  ;;  %v2552_v18 = vrot.slane %v6890_v48, 2 }
 0x351   : > { %v1745_v14 = vpop.f32.mrb[40].mxu0  ;;  %2808 = vmatprep.mubr.f32.mxu1 %v6888_v5 }
 0x352   : > { %v2048_v50 = vmax.f32 %v1966_v51, 0.0  ;;  %v4716_v1 = vadd.f32 %v6646_v45, %v1745_v14  ;;  %v1747_v20 = vpop.f32.mrb[41].mxu0 }
 0x353   : > { %v6894_v10 = vld [vmem:[#allocation3 + $0xe0] sm:$0xff]  ;;  %v2177_v26 = vld [vmem:[#allocation3 + $0xe8] sm:$0x3] }
 0x354   : > { %2135 = vst [vmem:[#allocation3 + $0xf9] sm:$0xff] %v2048_v50  ;;  %v1971_v60 = vadd.f32 %v4716_v1, %v6616_v13  ;;  %2809 = vmatmul.mubr.f32.gmra.mrb[66].mxu1 %v6864_v46  ;;  %v2441_v61 = vrot.slane %v6894_v10, 1  ;;  %v2553_v56 = vrot.slane %v6894_v10, 2  ;;  %v2555_v51 = vrot.slane %v2177_v26, 2 }
 0x355   : > { %v1750_v5 = vpop.f32.mrb[42].mxu0  ;;  %v2443_v14 = vrot.slane %v2177_v26, 1 }
 0x356   : > { %v2049_v20 = vmax.f32 %v1971_v60, 0.0  ;;  %v4717_v27 = vadd.f32 %v6646_v45, %v1750_v5  ;;  %v1752_v30 = vpop.f32.mrb[43].mxu0  ;;  %v6904_v21 = vsel %vm638_vm0, %v2440_v52, %v2441_v61  ;;  %v6907_v50 = vsel %vm751_vm1, %v2552_v18, %v2553_v56 }
 0x357   : > { %7803 = vst [vmem:[#allocation38_spill] sm:$0xff] %v6904_v21  ;;  %2813 = vmatprep.mubr.f32.mxu1 %v6904_v21  ;;  %4205 = vmatprep.mubr.f32.mxu0 %v6907_v50  ;;  %v6912_v13 = vsel %vm751_vm1, %v2553_v56, %v2555_v51  ;;  %v6918_v30 = vsel %vm638_vm0, %v2441_v61, %v2443_v14  ;;  %v6920_v5 = vld [vmem:[#allocation3 + $0xf0] sm:$0xff] }
 0x358   : > { %2136 = vst [vmem:[#allocation3 + $0x109] sm:$0xff] %v2049_v20  ;;  %v1976_v1 = vadd.f32 %v4717_v27, %v6614_v22  ;;  %2814 = vmatmul.mubr.f32.gmra.mrb[68].mxu1 %v6890_v48  ;;  %4206 = vmatmul.mubr.f32.gmra.mrb[78].mxu0 %v6912_v13  ;;  %7804 = vst [vmem:[#allocation39_spill] sm:$0xff] %v6918_v30  ;;  %v2445_v22 = vrot.slane %v6920_v5, 1  ;;  %v2557_v27 = vrot.slane %v6920_v5, 2 }
 0x359   : > { %v1755_v52 = vpop.f32.mrb[44].mxu0  ;;  %2818 = vmatprep.mubr.f32.mxu1 %v6918_v30 }
 0x35a   : > { %v2050_v18 = vmax.f32 %v1976_v1, 0.0  ;;  %v4718_v26 = vadd.f32 %v6646_v45, %v1755_v52  ;;  %v1757_v60 = vpop.f32.mrb[45].mxu0 }
 0x35b   : > { %v6924_v56 = vld [vmem:[#allocation3 + $0xf8] sm:$0xff]  ;;  %v2180_v51 = vld [vmem:[#allocation3 + $0x100] sm:$0x3] }
 0x35c   : > { %2137 = vst [vmem:[#allocation3 + $0x111] sm:$0xff] %v2050_v18  ;;  %v1981_v61 = vadd.f32 %v4718_v26, %v6621_v36  ;;  %2819 = vmatmul.mubr.f32.gmra.mrb[70].mxu1 %v6894_v10  ;;  %v2446_v14 = vrot.slane %v6924_v56, 1  ;;  %v2558_v20 = vrot.slane %v6924_v56, 2  ;;  %v2560_v1 = vrot.slane %v2180_v51, 2 }
 0x35d   : > { %v1760_v30 = vpop.f32.mrb[46].mxu0  ;;  %v2448_v52 = vrot.slane %v2180_v51, 1 }
 0x35e   : > { %v2051_v60 = vmax.f32 %v1981_v61, 0.0  ;;  %v4719_v21 = vadd.f32 %v6646_v45, %v1760_v30  ;;  %v1762_v0 = vpop.f32.mrb[47].mxu0  ;;  %v6934_v55 = vsel %vm638_vm0, %v2445_v22, %v2446_v14  ;;  %v6937_v18 = vsel %vm751_vm1, %v2557_v27, %v2558_v20 }
 0x35f   : > { %7805 = vst [vmem:[#allocation40_spill] sm:$0xff] %v6934_v55  ;;  %7806 = vst [vmem:[#allocation41_spill] sm:$0xff] %v6937_v18  ;;  %2823 = vmatprep.mubr.f32.mxu1 %v6934_v55  ;;  %4208 = vmatprep.mubr.f32.mxu0 %v6937_v18  ;;  %v6942_v36 = vsel %vm751_vm1, %v2558_v20, %v2560_v1  ;;  %v6948_v0 = vsel %vm638_vm0, %v2446_v14, %v2448_v52  ;;  %v6950_v30 = vld [vmem:[#allocation3 + $0x108] sm:$0xff] }
 0x360   : > { %7807 = vst [vmem:[#allocation42_spill] sm:$0xff] %v6942_v36  ;;  %2138 = vst [vmem:[#allocation3 + $0x121] sm:$0xff] %v2051_v60  ;;  %v1986_v26 = vadd.f32 %v4719_v21, %v6619_v29  ;;  %2824 = vmatmul.mubr.f32.gmra.mrb[72].mxu1 %v6920_v5  ;;  %4209 = vmatmul.mubr.f32.gmra.mrb[80].mxu0 %v6942_v36  ;;  %v2450_v29 = vrot.slane %v6950_v30, 1  ;;  %v2562_v21 = vrot.slane %v6950_v30, 2 }
 0x361   : > { %7808 = vst [vmem:[#allocation43_spill] sm:$0xff] %v6948_v0  ;;  %v1765_v22 = vpop.f32.mrb[48].mxu0  ;;  %2828 = vmatprep.mubr.f32.mxu1 %v6948_v0 }
 0x362   : > { %v2052_v27 = vmax.f32 %v1986_v26, 0.0  ;;  %v4720_v51 = vadd.f32 %v6646_v45, %v1765_v22  ;;  %v1767_v61 = vpop.f32.mrb[49].mxu0 }
 0x363   : > { %v6954_v20 = vld [vmem:[#allocation3 + $0x110] sm:$0xff]  ;;  %v2183_v1 = vld [vmem:[#allocation3 + $0x118] sm:$0x3] }
 0x364   : > { %2139 = vst [vmem:[#allocation3 + $0x129] sm:$0xff] %v2052_v27  ;;  %v1991_v14 = vadd.f32 %v4720_v51, %v6626_v32  ;;  %2829 = vmatmul.mubr.f32.gmra.mrb[74].mxu1 %v6924_v56  ;;  %v2451_v52 = vrot.slane %v6954_v20, 1  ;;  %v2563_v60 = vrot.slane %v6954_v20, 2  ;;  %v2565_v26 = vrot.slane %v2183_v1, 2 }
 0x365   : > { %v1770_v0 = vpop.f32.mrb[50].mxu0  ;;  %v2453_v22 = vrot.slane %v2183_v1, 1 }
 0x366   : > { %v2053_v61 = vmax.f32 %v1991_v14, 0.0  ;;  %v4721_v55 = vadd.f32 %v6646_v45, %v1770_v0  ;;  %v1772_v36 = vpop.f32.mrb[51].mxu0  ;;  %v6964_v18 = vsel %vm638_vm0, %v2450_v29, %v2451_v52  ;;  %v6967_v27 = vsel %vm751_vm1, %v2562_v21, %v2563_v60 }
 0x367   : > { %7809 = vst [vmem:[#allocation44_spill] sm:$0xff] %v6964_v18  ;;  %7810 = vst [vmem:[#allocation45_spill] sm:$0xff] %v6967_v27  ;;  %2833 = vmatprep.mubr.f32.mxu1 %v6964_v18  ;;  %4211 = vmatprep.mubr.f32.mxu0 %v6967_v27  ;;  %v6972_v32 = vsel %vm751_vm1, %v2563_v60, %v2565_v26  ;;  %v6978_v36 = vsel %vm638_vm0, %v2451_v52, %v2453_v22  ;;  %v6980_v0 = vld [vmem:[#allocation3 + $0x120] sm:$0xff] }
 0x368   : > { %7811 = vst [vmem:[#allocation46_spill] sm:$0xff] %v6972_v32  ;;  %2140 = vst [vmem:[#allocation3 + $0x139] sm:$0xff] %v2053_v61  ;;  %v1996_v51 = vadd.f32 %v4721_v55, %v6624_v40  ;;  %2834 = vmatmul.mubr.f32.gmra.mrb[76].mxu1 %v6950_v30  ;;  %4212 = vmatmul.mubr.f32.gmra.mrb[82].mxu0 %v6972_v32  ;;  %v2455_v40 = vrot.slane %v6980_v0, 1  ;;  %v2567_v55 = vrot.slane %v6980_v0, 2 }
 0x369   : > { %7812 = vst [vmem:[#allocation47_spill] sm:$0xff] %v6978_v36  ;;  %v1775_v29 = vpop.f32.mrb[52].mxu0  ;;  %2838 = vmatprep.mubr.f32.mxu1 %v6978_v36 }
 0x36a   : > { %v2054_v21 = vmax.f32 %v1996_v51, 0.0  ;;  %v4722_v1 = vadd.f32 %v6646_v45, %v1775_v29  ;;  %v1777_v14 = vpop.f32.mrb[53].mxu0 }
 0x36b   : > { %v6984_v60 = vld [vmem:[#allocation3 + $0x128] sm:$0xff]  ;;  %v2186_v26 = vld [vmem:[#allocation3 + $0x130] sm:$0x3] }
 0x36c   : > { %2141 = vst [vmem:[#allocation3 + $0x141] sm:$0xff] %v2054_v21  ;;  %v2001_v52 = vadd.f32 %v4722_v1, %v6631_v9  ;;  %2839 = vmatmul.mubr.f32.gmra.mrb[78].mxu1 %v6954_v20  ;;  %v2456_v22 = vrot.slane %v6984_v60, 1  ;;  %v2568_v61 = vrot.slane %v6984_v60, 2  ;;  %v2570_v51 = vrot.slane %v2186_v26, 2 }
 0x36d   : > { %v1780_v36 = vpop.f32.mrb[54].mxu0  ;;  %v2458_v29 = vrot.slane %v2186_v26, 1 }
 0x36e   : > { %v2055_v14 = vmax.f32 %v2001_v52, 0.0  ;;  %v4723_v18 = vadd.f32 %v6646_v45, %v1780_v36  ;;  %v1782_v32 = vpop.f32.mrb[55].mxu0  ;;  %v6994_v27 = vsel %vm638_vm0, %v2455_v40, %v2456_v22  ;;  %v6997_v21 = vsel %vm751_vm1, %v2567_v55, %v2568_v61 }
 0x36f   : > { %7813 = vst [vmem:[#allocation48_spill] sm:$0xff] %v6994_v27  ;;  %7814 = vst [vmem:[#allocation49_spill] sm:$0xff] %v6997_v21  ;;  %2843 = vmatprep.mubr.f32.mxu1 %v6994_v27  ;;  %4214 = vmatprep.mubr.f32.mxu0 %v6997_v21  ;;  %v7002_v9 = vsel %vm751_vm1, %v2568_v61, %v2570_v51  ;;  %v7008_v32 = vsel %vm638_vm0, %v2456_v22, %v2458_v29  ;;  %v7010_v36 = vld [vmem:[#allocation3 + $0x138] sm:$0xff] }
 0x370   : > { %7815 = vst [vmem:[#allocation50_spill] sm:$0xff] %v7002_v9  ;;  %2142 = vst [vmem:[#allocation3 + $0x151] sm:$0xff] %v2055_v14  ;;  %v2006_v1 = vadd.f32 %v4723_v18, %v6629_v23  ;;  %2844 = vmatmul.mubr.f32.gmra.mrb[80].mxu1 %v6980_v0  ;;  %4215 = vmatmul.mubr.f32.gmra.mrb[84].mxu0 %v7002_v9  ;;  %v2460_v23 = vrot.slane %v7010_v36, 1  ;;  %v2572_v18 = vrot.slane %v7010_v36, 2 }
 0x371   : > { %7816 = vst [vmem:[#allocation51_spill] sm:$0xff] %v7008_v32  ;;  %v1785_v40 = vpop.f32.mrb[56].mxu0  ;;  %2848 = vmatprep.mubr.f32.mxu1 %v7008_v32 }
 0x372   : > { %v2056_v55 = vmax.f32 %v2006_v1, 0.0  ;;  %v4724_v26 = vadd.f32 %v6646_v45, %v1785_v40  ;;  %v1787_v52 = vpop.f32.mrb[57].mxu0 }
 0x373   : > { %v7014_v61 = vld [vmem:[#allocation3 + $0x140] sm:$0xff]  ;;  %v2189_v51 = vld [vmem:[#allocation3 + $0x148] sm:$0x3] }
 0x374   : > { %2143 = vst [vmem:[#allocation3 + $0x159] sm:$0xff] %v2056_v55  ;;  %v2011_v22 = vadd.f32 %v4724_v26, %v6636_v7  ;;  %2849 = vmatmul.mubr.f32.gmra.mrb[82].mxu1 %v6984_v60  ;;  %v2461_v29 = vrot.slane %v7014_v61, 1  ;;  %v2573_v14 = vrot.slane %v7014_v61, 2  ;;  %v2575_v1 = vrot.slane %v2189_v51, 2 }
 0x375   : > { %v1790_v32 = vpop.f32.mrb[58].mxu0  ;;  %v2463_v40 = vrot.slane %v2189_v51, 1 }
 0x376   : > { %v2057_v52 = vmax.f32 %v2011_v22, 0.0  ;;  %v4725_v27 = vadd.f32 %v6646_v45, %v1790_v32  ;;  %v1792_v9 = vpop.f32.mrb[59].mxu0  ;;  %v7024_v21 = vsel %vm638_vm0, %v2460_v23, %v2461_v29  ;;  %v7027_v55 = vsel %vm751_vm1, %v2572_v18, %v2573_v14 }
 0x377   : > { %7817 = vst [vmem:[#allocation52_spill] sm:$0xff] %v7024_v21  ;;  %2853 = vmatprep.mubr.f32.mxu1 %v7024_v21  ;;  %4217 = vmatprep.mubr.f32.mxu0 %v7027_v55  ;;  %v7032_v7 = vsel %vm751_vm1, %v2573_v14, %v2575_v1  ;;  %v7038_v9 = vsel %vm638_vm0, %v2461_v29, %v2463_v40  ;;  %v7041_v23 = vld [vmem:[#allocation3 + $0x150] sm:$0xff]  ;;  %v2269_v21 = vld [vmem:[#allocation9 + $0x218] sm:$0xff] }
 0x378   : > { %2144 = vst [vmem:[#allocation3 + $0x169] sm:$0xff] %v2057_v52  ;;  %v2016_v26 = vadd.f32 %v4725_v27, %v6634_v17  ;;  %2854 = vmatmul.mubr.f32.gmra.mrb[84].mxu1 %v7010_v36  ;;  %4218 = vmatmul.mubr.f32.gmra.mrb[86].mxu0 %v7032_v7  ;;  %7818 = vst [vmem:[#allocation53_spill] sm:$0xff] %v7038_v9  ;;  %v2465_v27 = vrot.slane %v7041_v23, 1 }
 0x379   : > { %v1795_v32 = vpop.f32.mrb[60].mxu0  ;;  %2858 = vmatprep.mubr.f32.mxu1 %v7038_v9 }
 0x37a   : > { %v2058_v18 = vmax.f32 %v2016_v26, 0.0  ;;  %v4726_v51 = vadd.f32 %v6646_v45, %v1795_v32  ;;  %v1797_v22 = vpop.f32.mrb[61].mxu0 }
 0x37b   : > { %v7044_v14 = vld [vmem:[#allocation3 + $0x158] sm:$0xff]  ;;  %v7046_v1 = vld [vmem:[#allocation3 + $0x160] sm:$0x3] }
 0x37c   : > { %2145 = vst [vmem:[#allocation3 + $0x171] sm:$0xff] %v2058_v18  ;;  %v2021_v17 = vadd.f32 %v4726_v51, %v6641_v3  ;;  %2859 = vmatmul.mubr.f32.gmra.mrb[86].mxu1 %v7014_v61  ;;  %v2466_v29 = vrot.slane %v7044_v14, 1  ;;  %v2468_v40 = vrot.slane %v7046_v1, 1 }
 0x37d   : > { %v1800_v52 = vpop.f32.mrb[62].mxu0 }
 0x37e   : > { %v2059_v26 = vmax.f32 %v2021_v17, 0.0  ;;  %v4727_v32 = vadd.f32 %v6646_v45, %v1800_v52  ;;  %v1802_v22 = vpop.f32.mrb[63].mxu0  ;;  %v7055_v9 = vsel %vm638_vm0, %v2465_v27, %v2466_v29  ;;  %v7061_v18 = vsel %vm638_vm0, %v2466_v29, %v2468_v40 }
 0x37f   : > { %7819 = vst [vmem:[#allocation54_spill] sm:$0xff] %v7055_v9  ;;  %2863 = vmatprep.mubr.f32.mxu1 %v7055_v9  ;;  %7820 = vst [vmem:[#allocation55_spill] sm:$0xff] %v7061_v18  ;;  %v7064_v51 = vld [vmem:[#allocation3 + $0x168] sm:$0xff]  ;;  %v2268_v9 = vld [vmem:[#allocation9 + $0x210] sm:$0xff] }
 0x380   : > { %2146 = vst [vmem:[#allocation3 + $0x181] sm:$0xff] %v2059_v26  ;;  %v2026_v3 = vadd.f32 %v4727_v32, %v6639_v39  ;;  %2864 = vmatmul.mubr.f32.gmra.mrb[88].mxu1 %v7041_v23  ;;  %v2470_v27 = vrot.slane %v7064_v51, 1  ;;  %v7083_v32 = vld [vmem:[#allocation2] sm:$0xff] }
 0x381   : > { %2868 = vmatprep.mubr.f32.mxu1 %v7061_v18  ;;  %7824 = vst [vmem:[#allocation59_spill] sm:$0xff] %v7083_v32  ;;  %v7086_v22 = vrot.slane %v7083_v32, 2  ;;  %v2270_v32 = vld [vmem:[#allocation9 + $0x220] sm:$0xff] }
 0x382   : > { %v2060_v17 = vmax.f32 %v2026_v3, 0.0  ;;  %v2266_v3 = vld [vmem:[#allocation9 + $0x200] sm:$0xff] }
 0x383   : > { %v7066_v45 = vld [vmem:[#allocation3 + $0x170] sm:$0xff]  ;;  %v7068_v52 = vld [vmem:[#allocation3 + $0x178] sm:$0x3] }
 0x384   : > { %7821 = vst [vmem:[#allocation56_spill] sm:$0xff] %v7068_v52  ;;  %2147 = vst [vmem:[#allocation3 + $0x189] sm:$0xff] %v2060_v17  ;;  %2869 = vmatmul.mubr.f32.gmra.mrb[90].mxu1 %v7044_v14  ;;  %v2471_v39 = vrot.slane %v7066_v45, 1  ;;  %v2473_v26 = vrot.slane %v7068_v52, 1  ;;  %v2267_v17 = vld [vmem:[#allocation9 + $0x208] sm:$0xff]  ;;  %v2513_v52 = vrot.slane %v6662_v25, 2 }
 0x386   : > { %v7075_v29 = vsel %vm638_vm0, %v2470_v27, %v2471_v39  ;;  %v7080_v40 = vsel %vm638_vm0, %v2471_v39, %v2473_v26  ;;  %v4553_v27 = vpack.c.bf16 %v2267_v17, %v2266_v3  ;;  %v4556_v26 = vpack.c.bf16 %v2269_v21, %v2268_v9  ;;  %v2272_v17 = vld [vmem:[#allocation9 + $0x230] sm:$0xff] }
 0x387   : > { %7822 = vst [vmem:[#allocation57_spill] sm:$0xff] %v7075_v29  ;;  %2873 = vmatprep.mubr.f32.mxu1 %v7075_v29  ;;  %7823 = vst [vmem:[#allocation58_spill] sm:$0xff] %v7080_v40  ;;  %v5248_v29 = vld [vmem:[#allocation3 + $0x10] sm:$0x3]  ;;  %v2515_v21 = vrot.slane %v6664_v44, 2  ;;  %v2276_v44 = vld [vmem:[#allocation9 + $0x250] sm:$0xff] }
 0x388   : > { %2874 = vmatmul.mubr.f32.gmra.mrb[92].mxu1 %v7064_v51  ;;  %v2510_v18 = vrot.slane %v5248_v29, 2  ;;  %v2512_v29 = vrot.slane %v6659_v28, 2 }
 0x389   : > { %2878 = vmatprep.mubr.f32.mxu1 %v7080_v40  ;;  %v2271_v40 = vld [vmem:[#allocation9 + $0x228] sm:$0xff]  ;;  %v7107_v9 = vsel %vm751_vm1, %v2513_v52, %v2515_v21  ;;  %v2285_v21 = vld [vmem:[#allocation9 + $0x298] sm:$0xff] }
 0x38a   : > { %v2511_v39 = vsel %vm751_vm1, %v7086_v22, %v2510_v18  ;;  %v4559_v3 = vpack.c.bf16 %v2271_v40, %v2270_v32  ;;  %v7100_v18 = vsel %vm751_vm1, %v2512_v29, %v2513_v52  ;;  %v2277_v32 = vld [vmem:[#allocation9 + $0x258] sm:$0xff]  ;;  %v2278_v52 = vld [vmem:[#allocation9 + $0x260] sm:$0xff] }
 0x38b   : > { %v2281_v29 = vld [vmem:[#allocation9 + $0x278] sm:$0xff] }
 0x38c   : > { %2879 = vmatmul.mubr.f32.gmra.mrb[94].mxu1 %v7066_v45 }
 0x38d   : > { %2948 = vmatprep.mubr.f32.mxu1 %v6659_v28  ;;  %v2274_v28 = vld [vmem:[#allocation9 + $0x240] sm:$0xff] }
 0x390   : > { %2949 = vmatmul.mubr.f32.vlgmr.msra.gmra.mrb[32].mxu1 %v7086_v22 }
 0x391   : > { %2953 = vmatprep.mubr.f32.mxu1 %v6662_v25  ;;  %4554 = vmatpush1.bf16.msra.mxu1 %v4553_v27  ;;  %v2273_v27 = vld [vmem:[#allocation9 + $0x238] sm:$0xff] }
 0x392   : > { %4555 = vmatprep.subr.bf16.mxu1 %v7751_v11  ;;  %v4562_v25 = vpack.c.bf16 %v2273_v27, %v2272_v17  ;;  %v2283_v17 = vld [vmem:[#allocation9 + $0x288] sm:$0xff]  ;;  %v2284_v27 = vld [vmem:[#allocation9 + $0x290] sm:$0xff] }
 0x394   : > { %2954 = vmatmul.mubr.f32.gmra.mrb[34].mxu1 %v2511_v39  ;;  %v2279_v39 = vld [vmem:[#allocation9 + $0x268] sm:$0xff] }
 0x395   : > { %2958 = vmatprep.mubr.f32.mxu1 %v6680_v59  ;;  %4557 = vmatpush1.bf16.msra.mxu1 %v4556_v26  ;;  %v2275_v59 = vld [vmem:[#allocation9 + $0x248] sm:$0xff]  ;;  %v2280_v26 = vld [vmem:[#allocation9 + $0x270] sm:$0xff] }
 0x396   : > { %4558 = vmatprep.subr.bf16.mxu1 %v7751_v11  ;;  %v4565_v40 = vpack.c.bf16 %v2275_v59, %v2274_v28  ;;  %v2287_v28 = vld [vmem:[#allocation9 + $0x2a8] sm:$0xff]  ;;  %v2288_v59 = vld [vmem:[#allocation9 + $0x2b0] sm:$0xff] }
 0x398   : > { %2959 = vmatmul.mubr.f32.gmra.mrb[36].mxu1 %v7100_v18 }
 0x399   : > { %2963 = vmatprep.mubr.f32.mxu1 %v6684_v57  ;;  %4560 = vmatpush1.bf16.msra.mxu1 %v4559_v3  ;;  %v4568_v57 = vpack.c.bf16 %v2277_v32, %v2276_v44  ;;  %v2282_v3 = vld [vmem:[#allocation9 + $0x280] sm:$0xff]  ;;  %v2291_v32 = vld [vmem:[#allocation9 + $0x2c8] sm:$0xff] }
 0x39a   : > { %4561 = vmatprep.subr.bf16.mxu1 %v7751_v11  ;;  %v2290_v44 = vld [vmem:[#allocation9 + $0x2c0] sm:$0xff] }
 0x39c   : > { %2964 = vmatmul.mubr.f32.gmra.mrb[38].mxu1 %v7107_v9 }
 0x39d   : > { %2968 = vmatprep.mubr.f32.mxu1 %v6710_v33  ;;  %4563 = vmatpush1.bf16.msra.mxu1 %v4562_v25  ;;  %v4571_v33 = vpack.c.bf16 %v2279_v39, %v2278_v52  ;;  %v2286_v25 = vld [vmem:[#allocation9 + $0x2a0] sm:$0xff]  ;;  %v2293_v52 = vld [vmem:[#allocation9 + $0x2d8] sm:$0xff] }
 0x39e   : > { %4564 = vmatprep.subr.bf16.mxu1 %v7751_v11  ;;  %v2294_v39 = vld [vmem:[#allocation9 + $0x2e0] sm:$0xff] }
 0x3a0   : > { %2969 = vmatmul.mubr.f32.gmra.mrb[40].mxu1 %v6697_v15 }
 0x3a1   : > { %2973 = vmatprep.mubr.f32.mxu1 %v6714_v38  ;;  %4566 = vmatpush1.bf16.msra.mxu1 %v4565_v40  ;;  %v4574_v38 = vpack.c.bf16 %v2281_v29, %v2280_v26  ;;  %v2289_v40 = vld [vmem:[#allocation9 + $0x2b8] sm:$0xff]  ;;  %v2296_v26 = vld [vmem:[#allocation9 + $0x2f0] sm:$0xff] }
 0x3a2   : > { %4567 = vmatprep.subr.bf16.mxu1 %v7751_v11  ;;  %v2297_v29 = vld [vmem:[#allocation9 + $0x2f8] sm:$0xff] }
 0x3a4   : > { %2974 = vmatmul.mubr.f32.gmra.mrb[42].mxu1 %v6702_v53 }
 0x3a5   : > { %2978 = vmatprep.mubr.f32.mxu1 %v6740_v12  ;;  %4569 = vmatpush1.bf16.msra.mxu1 %v4568_v57  ;;  %v4577_v12 = vpack.c.bf16 %v2283_v17, %v2282_v3  ;;  %v2292_v57 = vld [vmem:[#allocation9 + $0x2d0] sm:$0xff]  ;;  %v2578_v3 = vrot.slane %v7044_v14, 2 }
 0x3a6   : > { %4570 = vmatprep.subr.bf16.mxu1 %v7751_v11 }
 0x3a8   : > { %2979 = vmatmul.mubr.f32.gmra.mrb[44].mxu1 %v6727_v24 }
 0x3a9   : > { %2983 = vmatprep.mubr.f32.mxu1 %v6744_v2  ;;  %4572 = vmatpush1.bf16.msra.mxu1 %v4571_v33  ;;  %v4580_v2 = vpack.c.bf16 %v2285_v21, %v2284_v27  ;;  %v2295_v33 = vld [vmem:[#allocation9 + $0x2e8] sm:$0xff]  ;;  %v2580_v21 = vrot.slane %v7046_v1, 2  ;;  %v2582_v1 = vrot.slane %v7064_v51, 2 }
 0x3aa   : > { %4573 = vmatprep.subr.bf16.mxu1 %v7751_v11 }
 0x3ac   : > { %2984 = vmatmul.mubr.f32.gmra.mrb[46].mxu1 %v6732_v42 }
 0x3ad   : > { %2988 = vmatprep.mubr.f32.mxu1 %v6770_v49  ;;  %4575 = vmatpush1.bf16.msra.mxu1 %v4574_v38  ;;  %v4583_v49 = vpack.c.bf16 %v2287_v28, %v2286_v25  ;;  %v7191_v25 = vsel %vm751_vm1, %v2578_v3, %v2580_v21  ;;  %v2583_v28 = vrot.slane %v7066_v45, 2 }
 0x3ae   : > { %4576 = vmatprep.subr.bf16.mxu1 %v7751_v11 }
 0x3b0   : > { %2989 = vmatmul.mubr.f32.gmra.mrb[48].mxu1 %v6757_v19 }
 0x3b1   : > { %2993 = vmatprep.mubr.f32.mxu1 %v6774_v6  ;;  %4578 = vmatpush1.bf16.msra.mxu1 %v4577_v12  ;;  %v4586_v6 = vpack.c.bf16 %v2289_v40, %v2288_v59  ;;  %v2577_v12 = vrot.slane %v7041_v23, 2  ;;  %v7197_v59 = vld [vmem:[#allocation3 + $0x180] sm:$0xff]  ;;  %v7202_v40 = vsel %vm751_vm1, %v2582_v1, %v2583_v28 }
 0x3b2   : > { %4579 = vmatprep.subr.bf16.mxu1 %v7751_v11 }
 0x3b3   : > { %v7183_v27 = vsel %vm751_vm1, %v2577_v12, %v2578_v3  ;;  %v2302_v3 = vld [vmem:[#allocation9 + $0x320] sm:$0xff]  ;;  %v2303_v12 = vld [vmem:[#allocation9 + $0x328] sm:$0xff] }
 0x3b4   : > { %2994 = vmatmul.mubr.f32.gmra.mrb[50].mxu1 %v6762_v47 }
 0x3b5   : > { %2998 = vmatprep.mubr.f32.mxu1 %v6800_v4  ;;  %4581 = vmatpush1.bf16.msra.mxu1 %v4580_v2  ;;  %v4589_v4 = vpack.c.bf16 %v2291_v32, %v2290_v44  ;;  %v7206_v32 = vld [vmem:[#allocation3 + $0x188] sm:$0xff] }
 0x3b6   : > { %4582 = vmatprep.subr.bf16.mxu1 %v7751_v11 }
 0x3b8   : > { %2999 = vmatmul.mubr.f32.gmra.mrb[52].mxu1 %v6787_v8 }
 0x3b9   : > { %3003 = vmatprep.mubr.f32.mxu1 %v6804_v37  ;;  %4584 = vmatpush1.bf16.msra.mxu1 %v4583_v49  ;;  %v4592_v37 = vpack.c.bf16 %v2293_v52, %v2292_v57  ;;  %v2299_v57 = vld [vmem:[#allocation9 + $0x308] sm:$0xff] }
 0x3ba   : > { %4585 = vmatprep.subr.bf16.mxu1 %v7751_v11 }
 0x3bc   : > { %3004 = vmatmul.mubr.f32.gmra.mrb[54].mxu1 %v6792_v58 }
 0x3bd   : > { %3008 = vmatprep.mubr.f32.mxu1 %v6830_v35  ;;  %4587 = vmatpush1.bf16.msra.mxu1 %v4586_v6  ;;  %v4595_v35 = vpack.c.bf16 %v2295_v33, %v2294_v39  ;;  %v7831_v6 = vld [vmem:[#allocation56_spill] sm:$0xff] }
 0x3be   : > { %4588 = vmatprep.subr.bf16.mxu1 %v7751_v11  ;;  %v2585_v44 = vrot.slane %v7831_v6, 2  ;;  %v2304_v6 = vld [vmem:[#allocation9 + $0x330] sm:$0xff] }
 0x3c0   : > { %3009 = vmatmul.mubr.f32.gmra.mrb[56].mxu1 %v6817_v63 }
 0x3c1   : > { %3013 = vmatprep.mubr.f32.mxu1 %v6834_v34  ;;  %4590 = vmatpush1.bf16.msra.mxu1 %v4589_v4  ;;  %v4598_v34 = vpack.c.bf16 %v2297_v29, %v2296_v26  ;;  %v2298_v4 = vld [vmem:[#allocation9 + $0x300] sm:$0xff]  ;;  %v2301_v26 = vld [vmem:[#allocation9 + $0x318] sm:$0xff] }
 0x3c2   : > { %4591 = vmatprep.subr.bf16.mxu1 %v7751_v11  ;;  %v4601_v33 = vpack.c.bf16 %v2299_v57, %v2298_v4  ;;  %v7832_v29 = vld [vmem:[#allocation22_spill] sm:$0xff] }
 0x3c3   : > { %v2306_v57 = vld [vmem:[#allocation9 + $0x340] sm:$0xff] }
 0x3c4   : > { %3014 = vmatmul.mubr.f32.gmra.mrb[58].mxu1 %v6822_v41 }
 0x3c5   : > { %3018 = vmatprep.mubr.f32.mxu1 %v6860_v16  ;;  %4593 = vmatpush1.bf16.msra.mxu1 %v4592_v37  ;;  %v7825_v16 = vld [vmem:[#allocation41_spill] sm:$0xff]  ;;  %v7212_v37 = vsel %vm751_vm1, %v2583_v28, %v2585_v44  ;;  %v7834_v28 = vld [vmem:[#allocation23_spill] sm:$0xff]  ;;  %v7835_v44 = vld [vmem:[#allocation24_spill] sm:$0xff] }
 0x3c6   : > { %4594 = vmatprep.subr.bf16.mxu1 %v7751_v11 }
 0x3c8   : > { %3019 = vmatmul.mubr.f32.gmra.mrb[60].mxu1 %v6847_v62 }
 0x3c9   : > { %3023 = vmatprep.mubr.f32.mxu1 %v6864_v46  ;;  %4596 = vmatpush1.bf16.msra.mxu1 %v4595_v35  ;;  %v7826_v46 = vld [vmem:[#allocation42_spill] sm:$0xff]  ;;  %v2300_v35 = vld [vmem:[#allocation9 + $0x310] sm:$0xff] }
 0x3ca   : > { %4597 = vmatprep.subr.bf16.mxu1 %v7751_v11 }
 0x3cc   : > { %3024 = vmatmul.mubr.f32.gmra.mrb[62].mxu1 %v6852_v54 }
 0x3cd   : > { %3028 = vmatprep.mubr.f32.mxu1 %v6890_v48  ;;  %4599 = vmatpush1.bf16.msra.mxu1 %v4598_v34  ;;  %v7827_v48 = vld [vmem:[#allocation45_spill] sm:$0xff]  ;;  %v4604_v34 = vpack.c.bf16 %v2301_v26, %v2300_v35 }
 0x3ce   : > { %4600 = vmatprep.subr.bf16.mxu1 %v7751_v11  ;;  %v7837_v26 = vld [vmem:[#allocation25_spill] sm:$0xff] }
 0x3d0   : > { %3029 = vmatmul.mubr.f32.gmra.mrb[64].mxu1 %v6877_v43 }
 0x3d1   : > { %3033 = vmatprep.mubr.f32.mxu1 %v6894_v10  ;;  %v7828_v10 = vld [vmem:[#allocation46_spill] sm:$0xff] }
 0x3d4   : > { %3034 = vmatmul.mubr.f32.gmra.mrb[66].mxu1 %v6882_v31 }
 0x3d5   : > { %3038 = vmatprep.mubr.f32.mxu1 %v6920_v5  ;;  %v7829_v5 = vld [vmem:[#allocation49_spill] sm:$0xff] }
 0x3d8   : > { %3039 = vmatmul.mubr.f32.gmra.mrb[68].mxu1 %v6907_v50 }
 0x3d9   : > { %3043 = vmatprep.mubr.f32.mxu1 %v6924_v56 }
 0x3dc   : > { %3044 = vmatmul.mubr.f32.gmra.mrb[70].mxu1 %v6912_v13 }
 0x3dd   : > { %3048 = vmatprep.mubr.f32.mxu1 %v6950_v30  ;;  %v7830_v30 = vld [vmem:[#allocation50_spill] sm:$0xff] }
 0x3e0   : > { %3049 = vmatmul.mubr.f32.gmra.mrb[72].mxu1 %v7825_v16 }
 0x3e1   : > { %3053 = vmatprep.mubr.f32.mxu1 %v6954_v20 }
 0x3e4   : > { %3054 = vmatmul.mubr.f32.gmra.mrb[74].mxu1 %v7826_v46 }
 0x3e5   : > { %3058 = vmatprep.mubr.f32.mxu1 %v6980_v0 }
 0x3e8   : > { %3059 = vmatmul.mubr.f32.gmra.mrb[76].mxu1 %v7827_v48 }
 0x3e9   : > { %3063 = vmatprep.mubr.f32.mxu1 %v6984_v60 }
 0x3ec   : > { %3064 = vmatmul.mubr.f32.gmra.mrb[78].mxu1 %v7828_v10 }
 0x3ed   : > { %3068 = vmatprep.mubr.f32.mxu1 %v7010_v36 }
 0x3f0   : > { %3069 = vmatmul.mubr.f32.gmra.mrb[80].mxu1 %v7829_v5 }
 0x3f1   : > { %3073 = vmatprep.mubr.f32.mxu1 %v7014_v61 }
 0x3f3   : > { %v7166_v56 = vpop.f32.mrb[64].mxu0 }
 0x3f4   : > { %3074 = vmatmul.mubr.f32.gmra.mrb[82].mxu1 %v7830_v30  ;;  %v7169_v20 = vpop.f32.mrb[65].mxu0 }
 0x3f5   : > { %3078 = vmatprep.mubr.f32.mxu1 %v7041_v23 }
 0x3f8   : > { %3079 = vmatmul.mubr.f32.gmra.mrb[84].mxu1 %v7027_v55 }
 0x3f9   : > { %3083 = vmatprep.mubr.f32.mxu1 %v7044_v14 }
 0x3fb   : > { %v7174_v38 = vpop.f32.mrb[66].mxu0 }
 0x3fc   : > { %3084 = vmatmul.mubr.f32.gmra.mrb[86].mxu1 %v7032_v7  ;;  %v7178_v17 = vpop.f32.mrb[67].mxu0 }
 0x3fd   : > { %3088 = vmatprep.mubr.f32.mxu1 %v7064_v51 }
 0x400   : > { %3089 = vmatmul.mubr.f32.gmra.mrb[88].mxu1 %v7183_v27 }
 0x401   : > { %3093 = vmatprep.mubr.f32.mxu1 %v7066_v45 }
 0x403   : > { %v7188_v2 = vpop.f32.mrb[68].mxu0 }
 0x404   : > { %3094 = vmatmul.mubr.f32.gmra.mrb[90].mxu1 %v7191_v25  ;;  %v7195_v49 = vpop.f32.mrb[69].mxu0 }
 0x405   : > { %3098 = vmatprep.mubr.f32.mxu1 %v7197_v59 }
 0x408   : > { %3099 = vmatmul.mubr.f32.gmra.mrb[92].mxu1 %v7202_v40 }
 0x409   : > { %3103 = vmatprep.mubr.f32.mxu1 %v7206_v32 }
 0x40b   : > { %v7209_v52 = vpop.f32.mrb[70].mxu0 }
 0x40c   : > { %3104 = vmatmul.mubr.f32.gmra.mrb[94].mxu1 %v7212_v37  ;;  %v7215_v39 = vpop.f32.mrb[71].mxu0 }
 0x40d   : > { %3173 = vmatprep.mubr.f32.mxu1 %v7100_v18  ;;  %v4607_v18 = vpack.c.bf16 %v2303_v12, %v2302_v3  ;;  %v7839_v3 = vld [vmem:[#allocation26_spill] sm:$0xff] }
 0x410   : > { %3174 = vmatmul.mubr.f32.vlgmr.msra.gmra.mrb[32].mxu1 %v7832_v29 }
 0x411   : > { %3178 = vmatprep.mubr.f32.mxu1 %v7107_v9  ;;  %4602 = vmatpush1.bf16.msra.mxu1 %v4601_v33  ;;  %v2305_v9 = vld [vmem:[#allocation9 + $0x338] sm:$0xff]  ;;  %v2307_v33 = vld [vmem:[#allocation9 + $0x348] sm:$0xff] }
 0x412   : > { %4603 = vmatprep.subr.bf16.mxu1 %v7751_v11  ;;  %v4610_v4 = vpack.c.bf16 %v2305_v9, %v2304_v6  ;;  %v4613_v29 = vpack.c.bf16 %v2307_v33, %v2306_v57  ;;  %v7841_v9 = vld [vmem:[#allocation27_spill] sm:$0xff]  ;;  %v2312_v57 = vld [vmem:[#allocation9 + $0x370] sm:$0xff] }
 0x413   : > { %v7221_v21 = vpop.f32.mrb[72].mxu0  ;;  %v7843_v33 = vld [vmem:[#allocation28_spill] sm:$0xff] }
 0x414   : > { %7833 = vst [vmem:[#allocation41_spill] sm:$0xff] %v7221_v21  ;;  %3179 = vmatmul.mubr.f32.gmra.mrb[34].mxu1 %v7834_v28  ;;  %v7224_v1 = vpop.f32.mrb[73].mxu0  ;;  %v2310_v28 = vld [vmem:[#allocation9 + $0x360] sm:$0xff] }
 0x415   : > { %3183 = vmatprep.mubr.f32.mxu1 %v6697_v15  ;;  %4605 = vmatpush1.bf16.msra.mxu1 %v4604_v34  ;;  %v2308_v34 = vld [vmem:[#allocation9 + $0x350] sm:$0xff] }
 0x416   : > { %4606 = vmatprep.subr.bf16.mxu1 %v7751_v11 }
 0x418   : > { %3184 = vmatmul.mubr.f32.gmra.mrb[36].mxu1 %v7835_v44 }
 0x419   : > { %3188 = vmatprep.mubr.f32.mxu1 %v6702_v53  ;;  %4608 = vmatpush1.bf16.msra.mxu1 %v4607_v18  ;;  %v2309_v53 = vld [vmem:[#allocation9 + $0x358] sm:$0xff]  ;;  %v2311_v18 = vld [vmem:[#allocation9 + $0x368] sm:$0xff] }
 0x41a   : > { %4609 = vmatprep.subr.bf16.mxu1 %v7751_v11  ;;  %v4616_v12 = vpack.c.bf16 %v2309_v53, %v2308_v34  ;;  %v2314_v34 = vld [vmem:[#allocation9 + $0x380] sm:$0xff]  ;;  %v2315_v53 = vld [vmem:[#allocation9 + $0x388] sm:$0xff] }
 0x41b   : > { %v7231_v35 = vpop.f32.mrb[74].mxu0 }
 0x41c   : > { %7836 = vst [vmem:[#allocation42_spill] sm:$0xff] %v7231_v35  ;;  %3189 = vmatmul.mubr.f32.gmra.mrb[38].mxu1 %v7837_v26  ;;  %v7234_v15 = vpop.f32.mrb[75].mxu0 }
 0x41d   : > { %7838 = vst [vmem:[#allocation45_spill] sm:$0xff] %v7234_v15  ;;  %3193 = vmatprep.mubr.f32.mxu1 %v6727_v24  ;;  %4611 = vmatpush1.bf16.msra.mxu1 %v4610_v4  ;;  %v4619_v4 = vpack.c.bf16 %v2311_v18, %v2310_v28  ;;  %v2316_v28 = vld [vmem:[#allocation9 + $0x390] sm:$0xff]  ;;  %v7847_v18 = vld [vmem:[#allocation30_spill] sm:$0xff] }
 0x41e   : > { %4612 = vmatprep.subr.bf16.mxu1 %v7751_v11 }
 0x420   : > { %3194 = vmatmul.mubr.f32.gmra.mrb[40].mxu1 %v7839_v3 }
 0x421   : > { %3198 = vmatprep.mubr.f32.mxu1 %v6732_v42  ;;  %4614 = vmatpush1.bf16.msra.mxu1 %v4613_v29  ;;  %v2313_v42 = vld [vmem:[#allocation9 + $0x378] sm:$0xff] }
 0x422   : > { %4615 = vmatprep.subr.bf16.mxu1 %v7751_v11  ;;  %v4622_v29 = vpack.c.bf16 %v2313_v42, %v2312_v57  ;;  %v2318_v57 = vld [vmem:[#allocation9 + $0x3a0] sm:$0xff]  ;;  %v2319_v42 = vld [vmem:[#allocation9 + $0x3a8] sm:$0xff] }
 0x423   : > { %v7241_v6 = vpop.f32.mrb[76].mxu0 }
 0x424   : > { %7840 = vst [vmem:[#allocation46_spill] sm:$0xff] %v7241_v6  ;;  %3199 = vmatmul.mubr.f32.gmra.mrb[42].mxu1 %v7841_v9  ;;  %v7244_v24 = vpop.f32.mrb[77].mxu0 }
 0x425   : > { %7842 = vst [vmem:[#allocation49_spill] sm:$0xff] %v7244_v24  ;;  %3203 = vmatprep.mubr.f32.mxu1 %v6757_v19  ;;  %4617 = vmatpush1.bf16.msra.mxu1 %v4616_v12  ;;  %v7845_v24 = vld [vmem:[#allocation29_spill] sm:$0xff]  ;;  %v4625_v12 = vpack.c.bf16 %v2315_v53, %v2314_v34  ;;  %v2320_v34 = vld [vmem:[#allocation9 + $0x3b0] sm:$0xff] }
 0x426   : > { %4618 = vmatprep.subr.bf16.mxu1 %v7751_v11  ;;  %v7851_v53 = vld [vmem:[#allocation32_spill] sm:$0xff] }
 0x428   : > { %3204 = vmatmul.mubr.f32.gmra.mrb[44].mxu1 %v7843_v33 }
 0x429   : > { %3208 = vmatprep.mubr.f32.mxu1 %v6762_v47  ;;  %4620 = vmatpush1.bf16.msra.mxu1 %v4619_v4  ;;  %v2317_v47 = vld [vmem:[#allocation9 + $0x398] sm:$0xff] }
 0x42a   : > { %4621 = vmatprep.subr.bf16.mxu1 %v7751_v11  ;;  %v4628_v4 = vpack.c.bf16 %v2317_v47, %v2316_v28  ;;  %v2322_v28 = vld [vmem:[#allocation9 + $0x3c0] sm:$0xff]  ;;  %v2323_v47 = vld [vmem:[#allocation9 + $0x3c8] sm:$0xff] }
 0x42b   : > { %v7251_v6 = vpop.f32.mrb[78].mxu0 }
 0x42c   : > { %7844 = vst [vmem:[#allocation50_spill] sm:$0xff] %v7251_v6  ;;  %3209 = vmatmul.mubr.f32.gmra.mrb[46].mxu1 %v7845_v24  ;;  %v7254_v19 = vpop.f32.mrb[79].mxu0 }
 0x42d   : > { %7846 = vst [vmem:[#allocation56_spill] sm:$0xff] %v7254_v19  ;;  %3213 = vmatprep.mubr.f32.mxu1 %v6787_v8  ;;  %4623 = vmatpush1.bf16.msra.mxu1 %v4622_v29  ;;  %v7849_v19 = vld [vmem:[#allocation31_spill] sm:$0xff]  ;;  %v4631_v29 = vpack.c.bf16 %v2319_v42, %v2318_v57  ;;  %v2324_v57 = vld [vmem:[#allocation9 + $0x3d0] sm:$0xff]  ;;  %v7855_v42 = vld [vmem:[#allocation34_spill] sm:$0xff] }
 0x42e   : > { %4624 = vmatprep.subr.bf16.mxu1 %v7751_v11 }
 0x430   : > { %3214 = vmatmul.mubr.f32.gmra.mrb[48].mxu1 %v7847_v18 }
 0x431   : > { %3218 = vmatprep.mubr.f32.mxu1 %v6792_v58  ;;  %4626 = vmatpush1.bf16.msra.mxu1 %v4625_v12  ;;  %v2321_v58 = vld [vmem:[#allocation9 + $0x3b8] sm:$0xff] }
 0x432   : > { %4627 = vmatprep.subr.bf16.mxu1 %v7751_v11  ;;  %v4634_v12 = vpack.c.bf16 %v2321_v58, %v2320_v34  ;;  %v2326_v34 = vld [vmem:[#allocation9 + $0x3e0] sm:$0xff]  ;;  %v2327_v58 = vld [vmem:[#allocation9 + $0x3e8] sm:$0xff] }
 0x433   : > { %v7261_v6 = vpop.f32.mrb[80].mxu0 }
 0x434   : > { %7848 = vst [vmem:[#allocation22_spill] sm:$0xff] %v7261_v6  ;;  %3219 = vmatmul.mubr.f32.gmra.mrb[50].mxu1 %v7849_v19  ;;  %v7264_v8 = vpop.f32.mrb[81].mxu0 }
 0x435   : > { %7850 = vst [vmem:[#allocation23_spill] sm:$0xff] %v7264_v8  ;;  %3223 = vmatprep.mubr.f32.mxu1 %v6817_v63  ;;  %4629 = vmatpush1.bf16.msra.mxu1 %v4628_v4  ;;  %v7853_v8 = vld [vmem:[#allocation33_spill] sm:$0xff]  ;;  %v4637_v4 = vpack.c.bf16 %v2323_v47, %v2322_v28  ;;  %v2328_v28 = vld [vmem:[#allocation9 + $0x3f0] sm:$0xff] }
 0x436   : > { %4630 = vmatprep.subr.bf16.mxu1 %v7751_v11  ;;  %v7859_v47 = vld [vmem:[#allocation36_spill] sm:$0xff] }
 0x438   : > { %3224 = vmatmul.mubr.f32.gmra.mrb[52].mxu1 %v7851_v53 }
 0x439   : > { %3228 = vmatprep.mubr.f32.mxu1 %v6822_v41  ;;  %4632 = vmatpush1.bf16.msra.mxu1 %v4631_v29  ;;  %v2325_v41 = vld [vmem:[#allocation9 + $0x3d8] sm:$0xff] }
 0x43a   : > { %4633 = vmatprep.subr.bf16.mxu1 %v7751_v11  ;;  %v4640_v29 = vpack.c.bf16 %v2325_v41, %v2324_v57  ;;  %v7861_v41 = vld [vmem:[#allocation37_spill] sm:$0xff] }
 0x43b   : > { %v7271_v6 = vpop.f32.mrb[82].mxu0 }
 0x43c   : > { %7852 = vst [vmem:[#allocation24_spill] sm:$0xff] %v7271_v6  ;;  %3229 = vmatmul.mubr.f32.gmra.mrb[54].mxu1 %v7853_v8  ;;  %v7274_v63 = vpop.f32.mrb[83].mxu0 }
 0x43d   : > { %7854 = vst [vmem:[#allocation25_spill] sm:$0xff] %v7274_v63  ;;  %3233 = vmatprep.mubr.f32.mxu1 %v6847_v62  ;;  %4635 = vmatpush1.bf16.msra.mxu1 %v4634_v12  ;;  %v7857_v63 = vld [vmem:[#allocation35_spill] sm:$0xff]  ;;  %v4643_v12 = vpack.c.bf16 %v2327_v58, %v2326_v34 }
 0x43e   : > { %4636 = vmatprep.subr.bf16.mxu1 %v7751_v11  ;;  %v7867_v34 = vld [vmem:[#allocation43_spill] sm:$0xff] }
 0x43f   : > { %v7869_v58 = vld [vmem:[#allocation47_spill] sm:$0xff] }
 0x440   : > { %3234 = vmatmul.mubr.f32.gmra.mrb[56].mxu1 %v7855_v42 }
 0x441   : > { %3238 = vmatprep.mubr.f32.mxu1 %v6852_v54  ;;  %4638 = vmatpush1.bf16.msra.mxu1 %v4637_v4  ;;  %v2329_v54 = vld [vmem:[#allocation9 + $0x3f8] sm:$0xff] }
 0x442   : > { %4639 = vmatprep.subr.bf16.mxu1 %v7751_v11  ;;  %v4646_v4 = vpack.c.bf16 %v2329_v54, %v2328_v28  ;;  %v2623_v28 = vrot.slane %v7206_v32, 1  ;;  %v7877_v54 = vld [vmem:[#allocation58_spill] sm:$0xff] }
 0x443   : > { %v7281_v6 = vpop.f32.mrb[84].mxu0 }
 0x444   : > { %7856 = vst [vmem:[#allocation26_spill] sm:$0xff] %v7281_v6  ;;  %3239 = vmatmul.mubr.f32.gmra.mrb[58].mxu1 %v7857_v63  ;;  %v7284_v62 = vpop.f32.mrb[85].mxu0 }
 0x445   : > { %7858 = vst [vmem:[#allocation27_spill] sm:$0xff] %v7284_v62  ;;  %3243 = vmatprep.mubr.f32.mxu1 %v6877_v43  ;;  %4641 = vmatpush1.bf16.msra.mxu1 %v4640_v29  ;;  %v7863_v43 = vld [vmem:[#allocation14_spill] sm:$0xff] }
 0x446   : > { %4642 = vmatprep.subr.bf16.mxu1 %v7751_v11  ;;  %v7864_v29 = vld [vmem:[#allocation38_spill] sm:$0xff] }
 0x448   : > { %3244 = vmatmul.mubr.f32.gmra.mrb[60].mxu1 %v7859_v47 }
 0x449   : > { %3248 = vmatprep.mubr.f32.mxu1 %v6882_v31  ;;  %4644 = vmatpush1.bf16.msra.mxu1 %v4643_v12  ;;  %v7865_v31 = vld [vmem:[#allocation39_spill] sm:$0xff]  ;;  %v2198_v12 = vld [vmem:[#allocation3 + $0x190] sm:$0x3] }
 0x44a   : > { %4645 = vmatprep.subr.bf16.mxu1 %v7751_v11  ;;  %v7866_v11 = vld [vmem:[#allocation40_spill] sm:$0xff]  ;;  %v2625_v35 = vrot.slane %v2198_v12, 1 }
 0x44b   : > { %v7291_v57 = vpop.f32.mrb[86].mxu0 }
 0x44c   : > { %7860 = vst [vmem:[#allocation28_spill] sm:$0xff] %v7291_v57  ;;  %3249 = vmatmul.mubr.f32.gmra.mrb[62].mxu1 %v7861_v41  ;;  %v7294_v6 = vpop.f32.mrb[87].mxu0  ;;  %v2632_v57 = vrot.slane %v2198_v12, 2  ;;  %v7342_v21 = vsel %vm638_vm0, %v2623_v28, %v2625_v35  ;;  %v5250_v12 = vld [vmem:[#allocation3 + $0x38] sm:$0xff]  ;;  %v7879_v35 = vld [vmem:[#allocation16_spill] sm:$0xff] }
 0x44d   : > { %7862 = vst [vmem:[#allocation29_spill] sm:$0xff] %v7294_v6  ;;  %3253 = vmatprep.mubr.f32.mxu1 %v6907_v50  ;;  %4647 = vmatpush1.bf16.msra.mxu1 %v4646_v4  ;;  %v7868_v50 = vld [vmem:[#allocation44_spill] sm:$0xff]  ;;  %v2622_v6 = vrot.slane %v7197_v59, 1 }
 0x44e   : > { %4680 = vmatprep.subr.bf16.mxu1 %v7863_v43 }
 0x44f   : > { %v7334_v62 = vsel %vm638_vm0, %v2622_v6, %v2623_v28  ;;  %v7878_v6 = vld [vmem:[#allocation15_spill] sm:$0xff]  ;;  %v7883_v28 = vld [vmem:[#allocation20_spill] sm:$0xff] }
 0x450   : > { %3254 = vmatmul.mubr.f32.gmra.mrb[64].mxu1 %v7864_v29 }
 0x451   : > { %3258 = vmatprep.mubr.f32.mxu1 %v6912_v13  ;;  %v7870_v13 = vld [vmem:[#allocation48_spill] sm:$0xff] }
 0x454   : > { %3259 = vmatmul.mubr.f32.gmra.mrb[66].mxu1 %v7865_v31 }
 0x455   : > { %3263 = vmatprep.mubr.f32.mxu1 %v7825_v16  ;;  %v7871_v16 = vld [vmem:[#allocation51_spill] sm:$0xff] }
 0x458   : > { %3264 = vmatmul.mubr.f32.gmra.mrb[68].mxu1 %v7866_v11 }
 0x459   : > { %3268 = vmatprep.mubr.f32.mxu1 %v7826_v46  ;;  %v7872_v46 = vld [vmem:[#allocation52_spill] sm:$0xff] }
 0x45c   : > { %3269 = vmatmul.mubr.f32.gmra.mrb[70].mxu1 %v7867_v34 }
 0x45d   : > { %3273 = vmatprep.mubr.f32.mxu1 %v7827_v48  ;;  %v7873_v48 = vld [vmem:[#allocation53_spill] sm:$0xff] }
 0x460   : > { %3274 = vmatmul.mubr.f32.gmra.mrb[72].mxu1 %v7868_v50 }
 0x461   : > { %3278 = vmatprep.mubr.f32.mxu1 %v7828_v10  ;;  %v7874_v10 = vld [vmem:[#allocation54_spill] sm:$0xff] }
 0x464   : > { %3279 = vmatmul.mubr.f32.gmra.mrb[74].mxu1 %v7869_v58 }
 0x465   : > { %3283 = vmatprep.mubr.f32.mxu1 %v7829_v5  ;;  %v7875_v5 = vld [vmem:[#allocation55_spill] sm:$0xff] }
 0x468   : > { %3284 = vmatmul.mubr.f32.gmra.mrb[76].mxu1 %v7870_v13 }
 0x469   : > { %3288 = vmatprep.mubr.f32.mxu1 %v7830_v30  ;;  %v7876_v30 = vld [vmem:[#allocation57_spill] sm:$0xff] }
 0x46c   : > { %3289 = vmatmul.mubr.f32.gmra.mrb[78].mxu1 %v7871_v16 }
 0x46d   : > { %3293 = vmatprep.mubr.f32.mxu1 %v7027_v55  ;;  %v2630_v55 = vrot.slane %v7206_v32, 2 }
 0x46f   : > { %v7338_v15 = vsel %vm751_vm1, %v2630_v55, %v2632_v57  ;;  %v5251_v57 = vld [vmem:[#allocation3 + $0x48] sm:$0xff] }
 0x470   : > { %3294 = vmatmul.mubr.f32.gmra.mrb[80].mxu1 %v7872_v46 }
 0x471   : > { %3298 = vmatprep.mubr.f32.mxu1 %v7032_v7  ;;  %v2629_v7 = vrot.slane %v7197_v59, 2 }
 0x473   : > { %v7329_v4 = vsel %vm751_vm1, %v2629_v7, %v2630_v55  ;;  %v5249_v7 = vld [vmem:[#allocation3 + $0x30] sm:$0xff]  ;;  %v7882_v55 = vld [vmem:[#allocation19_spill] sm:$0xff] }
 0x474   : > { %3299 = vmatmul.mubr.f32.gmra.mrb[82].mxu1 %v7873_v48 }
 0x475   : > { %3303 = vmatprep.mubr.f32.mxu1 %v7183_v27 }
 0x478   : > { %3304 = vmatmul.mubr.f32.gmra.mrb[84].mxu1 %v7874_v10 }
 0x479   : > { %3308 = vmatprep.mubr.f32.mxu1 %v7191_v25 }
 0x47c   : > { %3309 = vmatmul.mubr.f32.gmra.mrb[86].mxu1 %v7875_v5 }
 0x47d   : > { %3313 = vmatprep.mubr.f32.mxu1 %v7202_v40 }
 0x480   : > { %3314 = vmatmul.mubr.f32.gmra.mrb[88].mxu1 %v7876_v30 }
 0x481   : > { %3318 = vmatprep.mubr.f32.mxu1 %v7212_v37 }
 0x484   : > { %3319 = vmatmul.mubr.f32.gmra.mrb[90].mxu1 %v7877_v54 }
 0x485   : > { %3323 = vmatprep.mubr.f32.mxu1 %v7329_v4 }
 0x488   : > { %3324 = vmatmul.mubr.f32.gmra.mrb[92].mxu1 %v7334_v62 }
 0x489   : > { %3328 = vmatprep.mubr.f32.mxu1 %v7338_v15 }
 0x48c   : > { %3329 = vmatmul.mubr.f32.gmra.mrb[94].mxu1 %v7342_v21 }
 0x48d   : > { %3398 = vmatprep.mubr.f32.mxu1 %v7835_v44  ;;  %v7880_v44 = vld [vmem:[#allocation17_spill] sm:$0xff] }
 0x490   : > { %3399 = vmatmul.mubr.f32.vlgmr.msra.gmra.mrb[32].mxu1 %v5249_v7  ;;  %v7884_v7 = vld [vmem:[#allocation21_spill] sm:$0xff] }
 0x491   : > { %3403 = vmatprep.mubr.f32.mxu1 %v7837_v26  ;;  %4688 = vmatpush3.bf16.msra.mxu1 %v7863_v43  ;;  %v5252_v26 = vld [vmem:[#allocation3 + $0x50] sm:$0xff] }
 0x492   : > { %4681 = vmatprep.subr.bf16.mxu1 %v7878_v6  ;;  %v7881_v43 = vld [vmem:[#allocation18_spill] sm:$0xff] }
 0x494   : > { %3404 = vmatmul.mubr.f32.gmra.mrb[34].mxu1 %v5250_v12  ;;  %v5259_v12 = vld [vmem:[#allocation3 + $0xa8] sm:$0xff] }
 0x495   : > { %3408 = vmatprep.mubr.f32.mxu1 %v7839_v3  ;;  %4689 = vmatpush3.bf16.msra.mxu1 %v7878_v6  ;;  %v5253_v3 = vld [vmem:[#allocation3 + $0x60] sm:$0xff]  ;;  %v5257_v6 = vld [vmem:[#allocation3 + $0x90] sm:$0xff] }
 0x496   : > { %4682 = vmatprep.subr.bf16.mxu1 %v7879_v35 }
 0x498   : > { %3409 = vmatmul.mubr.f32.gmra.mrb[36].mxu1 %v5251_v57 }
 0x499   : > { %3413 = vmatprep.mubr.f32.mxu1 %v7841_v9  ;;  %4690 = vmatpush3.bf16.msra.mxu1 %v7879_v35  ;;  %v5254_v9 = vld [vmem:[#allocation3 + $0x68] sm:$0xff]  ;;  %v5261_v35 = vld [vmem:[#allocation3 + $0xc0] sm:$0xff] }
 0x49a   : > { %4683 = vmatprep.subr.bf16.mxu1 %v7880_v44 }
 0x49c   : > { %3414 = vmatmul.mubr.f32.gmra.mrb[38].mxu1 %v5252_v26 }
 0x49d   : > { %3418 = vmatprep.mubr.f32.mxu1 %v7843_v33  ;;  %4691 = vmatpush3.bf16.msra.mxu1 %v7880_v44  ;;  %v5255_v33 = vld [vmem:[#allocation3 + $0x78] sm:$0xff] }
 0x49e   : > { %4684 = vmatprep.subr.bf16.mxu1 %v7881_v43 }
 0x4a0   : > { %3419 = vmatmul.mubr.f32.gmra.mrb[40].mxu1 %v5253_v3 }
 0x4a1   : > { %3423 = vmatprep.mubr.f32.mxu1 %v7845_v24  ;;  %4692 = vmatpush3.bf16.msra.mxu1 %v7881_v43  ;;  %v5256_v24 = vld [vmem:[#allocation3 + $0x80] sm:$0xff] }
 0x4a2   : > { %4685 = vmatprep.subr.bf16.mxu1 %v7882_v55 }
 0x4a4   : > { %3424 = vmatmul.mubr.f32.gmra.mrb[42].mxu1 %v5254_v9 }
 0x4a5   : > { %3428 = vmatprep.mubr.f32.mxu1 %v7847_v18  ;;  %4693 = vmatpush3.bf16.msra.mxu1 %v7882_v55  ;;  %v5258_v18 = vld [vmem:[#allocation3 + $0x98] sm:$0xff] }
 0x4a6   : > { %4686 = vmatprep.subr.bf16.mxu1 %v7883_v28 }
 0x4a8   : > { %3429 = vmatmul.mubr.f32.gmra.mrb[44].mxu1 %v5255_v33 }
 0x4a9   : > { %3433 = vmatprep.mubr.f32.mxu1 %v7849_v19  ;;  %4694 = vmatpush3.bf16.msra.mxu1 %v7883_v28  ;;  %v5260_v19 = vld [vmem:[#allocation3 + $0xb0] sm:$0xff] }
 0x4aa   : > { %4687 = vmatprep.subr.bf16.mxu1 %v7884_v7 }
 0x4ac   : > { %3434 = vmatmul.mubr.f32.gmra.mrb[46].mxu1 %v5256_v24 }
 0x4ad   : > { %3438 = vmatprep.mubr.f32.mxu1 %v7851_v53  ;;  %4695 = vmatpush3.bf16.msra.mxu1 %v7884_v7  ;;  %v5262_v53 = vld [vmem:[#allocation3 + $0xc8] sm:$0xff] }
 0x4b0   : > { %3439 = vmatmul.mubr.f32.gmra.mrb[48].mxu1 %v5257_v6 }
 0x4b1   : > { %3443 = vmatprep.mubr.f32.mxu1 %v7853_v8  ;;  %v5263_v8 = vld [vmem:[#allocation3 + $0xd8] sm:$0xff] }
 0x4b4   : > { %3444 = vmatmul.mubr.f32.gmra.mrb[50].mxu1 %v5258_v18 }
 0x4b5   : > { %3448 = vmatprep.mubr.f32.mxu1 %v7855_v42  ;;  %v5264_v42 = vld [vmem:[#allocation3 + $0xe0] sm:$0xff] }
 0x4b8   : > { %3449 = vmatmul.mubr.f32.gmra.mrb[52].mxu1 %v5259_v12 }
 0x4b9   : > { %3453 = vmatprep.mubr.f32.mxu1 %v7857_v63  ;;  %v5265_v63 = vld [vmem:[#allocation3 + $0xf0] sm:$0xff] }
 0x4bc   : > { %3454 = vmatmul.mubr.f32.gmra.mrb[54].mxu1 %v5260_v19 }
 0x4bd   : > { %3458 = vmatprep.mubr.f32.mxu1 %v7859_v47  ;;  %v5266_v47 = vld [vmem:[#allocation3 + $0xf8] sm:$0xff] }
 0x4c0   : > { %3459 = vmatmul.mubr.f32.gmra.mrb[56].mxu1 %v5261_v35 }
 0x4c1   : > { %3463 = vmatprep.mubr.f32.mxu1 %v7861_v41  ;;  %v5267_v41 = vld [vmem:[#allocation3 + $0x108] sm:$0xff] }
 0x4c4   : > { %3464 = vmatmul.mubr.f32.gmra.mrb[58].mxu1 %v5262_v53 }
 0x4c5   : > { %3468 = vmatprep.mubr.f32.mxu1 %v7864_v29  ;;  %v5268_v29 = vld [vmem:[#allocation3 + $0x110] sm:$0xff] }
 0x4c8   : > { %3469 = vmatmul.mubr.f32.gmra.mrb[60].mxu1 %v5263_v8  ;;  %v7886_v8 = vld [vmem:[#allocation41_spill] sm:$0xff] }
 0x4c9   : > { %3473 = vmatprep.mubr.f32.mxu1 %v7865_v31 }
 0x4cc   : > { %3474 = vmatmul.mubr.f32.gmra.mrb[62].mxu1 %v5264_v42 }
 0x4cd   : > { %3478 = vmatprep.mubr.f32.mxu1 %v7866_v11 }
 0x4d0   : > { %3479 = vmatmul.mubr.f32.gmra.mrb[64].mxu1 %v5265_v63 }
 0x4d1   : > { %3483 = vmatprep.mubr.f32.mxu1 %v7867_v34 }
 0x4d4   : > { %3484 = vmatmul.mubr.f32.gmra.mrb[66].mxu1 %v5266_v47 }
 0x4d5   : > { %3488 = vmatprep.mubr.f32.mxu1 %v7868_v50 }
 0x4d8   : > { %3489 = vmatmul.mubr.f32.gmra.mrb[68].mxu1 %v5267_v41 }
 0x4d9   : > { %3493 = vmatprep.mubr.f32.mxu1 %v7869_v58 }
 0x4dc   : > { %3494 = vmatmul.mubr.f32.gmra.mrb[70].mxu1 %v5268_v29  ;;  %v7887_v29 = vld [vmem:[#allocation45_spill] sm:$0xff] }
 0x4dd   : > { %3498 = vmatprep.mubr.f32.mxu1 %v7870_v13 }
 0x4e0   : > { %3499 = vmatmul.mubr.f32.gmra.mrb[72].mxu1 %v6980_v0  ;;  %v7885_v0 = vld [vmem:[#allocation59_spill] sm:$0xff] }
 0x4e1   : > { %3503 = vmatprep.mubr.f32.mxu1 %v7871_v16 }
 0x4e4   : > { %3504 = vmatmul.mubr.f32.gmra.mrb[74].mxu1 %v6984_v60  ;;  %v2639_v60 = vrot.slane %v7885_v0, 1 }
 0x4e5   : > { %3508 = vmatprep.mubr.f32.mxu1 %v7872_v46 }
 0x4e8   : > { %3509 = vmatmul.mubr.f32.gmra.mrb[76].mxu1 %v7010_v36  ;;  %v2201_v36 = vld [vmem:[#allocation3 + $0x1a8] sm:$0x3] }
 0x4e9   : > { %3513 = vmatprep.mubr.f32.mxu1 %v7873_v48 }
 0x4ec   : > { %3514 = vmatmul.mubr.f32.gmra.mrb[78].mxu1 %v7014_v61  ;;  %v2642_v61 = vrot.slane %v2201_v36, 1 }
 0x4ed   : > { %3518 = vmatprep.mubr.f32.mxu1 %v7874_v10 }
 0x4f0   : > { %3519 = vmatmul.mubr.f32.gmra.mrb[80].mxu1 %v7041_v23  ;;  %v2643_v23 = vsel %vm638_vm0, %v2639_v60, %v2642_v61 }
 0x4f1   : > { %3523 = vmatprep.mubr.f32.mxu1 %v7875_v5 }
 0x4f4   : > { %3524 = vmatmul.mubr.f32.gmra.mrb[82].mxu1 %v7044_v14  ;;  %v2649_v14 = vrot.slane %v2201_v36, 2 }
 0x4f5   : > { %3528 = vmatprep.mubr.f32.mxu1 %v7876_v30 }
 0x4f8   : > { %3529 = vmatmul.mubr.f32.gmra.mrb[84].mxu1 %v7064_v51  ;;  %v2650_v51 = vsel %vm751_vm1, %v7086_v22, %v2649_v14 }
 0x4f9   : > { %3533 = vmatprep.mubr.f32.mxu1 %v7877_v54 }
 0x4fc   : > { %3534 = vmatmul.mubr.f32.gmra.mrb[86].mxu1 %v7066_v45  ;;  %v7416_v45 = vld [vmem:[%s7565_s4] ss:$0 sm:$0xff] }
 0x4fd   : > { %3538 = vmatprep.mubr.f32.mxu1 %v7334_v62 }
 0x500   : > { %3539 = vmatmul.mubr.f32.gmra.mrb[88].mxu1 %v7197_v59 }
 0x501   : > { %3543 = vmatprep.mubr.f32.mxu1 %v7342_v21 }
 0x504   : > { %3544 = vmatmul.mubr.f32.gmra.mrb[90].mxu1 %v7206_v32 }
 0x505   : > { %3548 = vmatprep.mubr.f32.mxu1 %v2639_v60 }
 0x508   : > { %3549 = vmatmul.mubr.f32.gmra.mrb[92].mxu1 %v7885_v0 }
 0x509   : > { %3553 = vmatprep.mubr.f32.mxu1 %v2643_v23  ;;  %v7888_v23 = vld [vmem:[#allocation42_spill] sm:$0xff] }
 0x50c   : > { %3554 = vmatmul.mubr.f32.gmra.mrb[94].mxu1 %v7885_v0 }
 0x50d   : > { %4220 = vmatprep.mubr.f32.mxu1 %v7183_v27 }
 0x510   : > { %4221 = vmatmul.mubr.f32.vlgmr.msra.gmra.mrb[96].mxu1 %v7191_v25 }
 0x511   : > { %4223 = vmatprep.mubr.f32.mxu1 %v7202_v40 }
 0x514   : > { %4224 = vmatmul.mubr.f32.gmra.mrb[98].mxu1 %v7212_v37 }
 0x515   : > { %4226 = vmatprep.mubr.f32.mxu1 %v7329_v4 }
 0x518   : > { %4227 = vmatmul.mubr.f32.gmra.mrb[100].mxu1 %v7338_v15 }
 0x519   : > { %4229 = vmatprep.mubr.f32.mxu1 %v7086_v22 }
 0x51c   : > { %4230 = vmatmul.mubr.f32.gmra.mrb[102].mxu1 %v2650_v51 }
 0x563   : > { %v3400_v27 = vpop.f32.mrb[32].mxu1 }
 0x564   : > { %v4728_v25 = vadd.f32 %v7416_v45, %v3400_v27  ;;  %v3402_v59 = vpop.f32.mrb[33].mxu1 }
 0x566   : > { %v3626_v40 = vadd.f32 %v4728_v25, %v7169_v20 }
 0x567   : > { %v3405_v32 = vpop.f32.mrb[34].mxu1 }
 0x568   : > { %v3784_v37 = vmax.f32 %v3626_v40, 0.0  ;;  %v4729_v21 = vadd.f32 %v7416_v45, %v3405_v32  ;;  %v3407_v15 = vpop.f32.mrb[35].mxu1  ;;  %v7889_v40 = vld [vmem:[#allocation49_spill] sm:$0xff] }
 0x56a   : > { %3816 = vst [vmem:[%s7423_s10] sm:$0xff] %v3784_v37  ;;  %v3631_v22 = vadd.f32 %v4729_v21, %v7166_v56 }
 0x56b   : > { %v3410_v62 = vpop.f32.mrb[36].mxu1 }
 0x56c   : > { %v3785_v31 = vmax.f32 %v3631_v22, 0.0  ;;  %v4730_v11 = vadd.f32 %v7416_v45, %v3410_v62  ;;  %v3412_v20 = vpop.f32.mrb[37].mxu1  ;;  %v7890_v62 = vld [vmem:[#allocation46_spill] sm:$0xff] }
 0x56e   : > { %3817 = vst [vmem:[%s7423_s10 + $0x8] sm:$0xff] %v3785_v31  ;;  %v3636_v34 = vadd.f32 %v4730_v11, %v7178_v17 }
 0x56f   : > { %v3415_v50 = vpop.f32.mrb[38].mxu1 }
 0x570   : > { %v3786_v58 = vmax.f32 %v3636_v34, 0.0  ;;  %v4731_v13 = vadd.f32 %v7416_v45, %v3415_v50  ;;  %v3417_v16 = vpop.f32.mrb[39].mxu1 }
 0x572   : > { %3818 = vst [vmem:[%s7423_s10 + $0x10] sm:$0xff] %v3786_v58  ;;  %v3641_v46 = vadd.f32 %v4731_v13, %v7174_v38  ;;  %v7891_v58 = vld [vmem:[#allocation56_spill] sm:$0xff] }
 0x573   : > { %v3420_v48 = vpop.f32.mrb[40].mxu1 }
 0x574   : > { %v3787_v56 = vmax.f32 %v3641_v46, 0.0  ;;  %v4732_v10 = vadd.f32 %v7416_v45, %v3420_v48  ;;  %v3422_v5 = vpop.f32.mrb[41].mxu1 }
 0x576   : > { %3819 = vst [vmem:[%s7423_s10 + $0x18] sm:$0xff] %v3787_v56  ;;  %v3646_v30 = vadd.f32 %v4732_v10, %v7195_v49  ;;  %v7892_v10 = vld [vmem:[#allocation50_spill] sm:$0xff] }
 0x577   : > { %v3425_v54 = vpop.f32.mrb[42].mxu1 }
 0x578   : > { %v3788_v17 = vmax.f32 %v3646_v30, 0.0  ;;  %v4733_v4 = vadd.f32 %v7416_v45, %v3425_v54  ;;  %v3427_v57 = vpop.f32.mrb[43].mxu1 }
 0x579   : > { %v7893_v57 = vld [vmem:[#allocation23_spill] sm:$0xff] }
 0x57a   : > { %3820 = vst [vmem:[%s7423_s10 + $0x20] sm:$0xff] %v3788_v17  ;;  %v3651_v44 = vadd.f32 %v4733_v4, %v7188_v2 }
 0x57b   : > { %v3430_v26 = vpop.f32.mrb[44].mxu1 }
 0x57c   : > { %v3789_v38 = vmax.f32 %v3651_v44, 0.0  ;;  %v4734_v43 = vadd.f32 %v7416_v45, %v3430_v26  ;;  %v3432_v3 = vpop.f32.mrb[45].mxu1 }
 0x57e   : > { %3821 = vst [vmem:[%s7423_s10 + $0x28] sm:$0xff] %v3789_v38  ;;  %v3656_v55 = vadd.f32 %v4734_v43, %v7215_v39 }
 0x57f   : > { %v3435_v9 = vpop.f32.mrb[46].mxu1 }
 0x580   : > { %v3790_v49 = vmax.f32 %v3656_v55, 0.0  ;;  %v4735_v28 = vadd.f32 %v7416_v45, %v3435_v9  ;;  %v3437_v33 = vpop.f32.mrb[47].mxu1  ;;  %v7894_v55 = vld [vmem:[#allocation22_spill] sm:$0xff] }
 0x582   : > { %3822 = vst [vmem:[%s7423_s10 + $0x30] sm:$0xff] %v3790_v49  ;;  %v3661_v7 = vadd.f32 %v4735_v28, %v7209_v52 }
 0x583   : > { %v3440_v24 = vpop.f32.mrb[48].mxu1 }
 0x584   : > { %v3791_v2 = vmax.f32 %v3661_v7, 0.0  ;;  %v4736_v6 = vadd.f32 %v7416_v45, %v3440_v24  ;;  %v3442_v18 = vpop.f32.mrb[49].mxu1  ;;  %v7895_v24 = vld [vmem:[#allocation25_spill] sm:$0xff] }
 0x586   : > { %3823 = vst [vmem:[%s7423_s10 + $0x38] sm:$0xff] %v3791_v2  ;;  %v3666_v12 = vadd.f32 %v4736_v6, %v7224_v1 }
 0x587   : > { %v3445_v19 = vpop.f32.mrb[50].mxu1 }
 0x588   : > { %v3792_v39 = vmax.f32 %v3666_v12, 0.0  ;;  %v4737_v35 = vadd.f32 %v7416_v45, %v3445_v19  ;;  %v3447_v53 = vpop.f32.mrb[51].mxu1 }
 0x58a   : > { %3824 = vst [vmem:[%s7423_s10 + $0x40] sm:$0xff] %v3792_v39  ;;  %v3671_v42 = vadd.f32 %v4737_v35, %v7886_v8  ;;  %v7896_v39 = vld [vmem:[#allocation24_spill] sm:$0xff] }
 0x58b   : > { %v3450_v63 = vpop.f32.mrb[52].mxu1 }
 0x58c   : > { %v3793_v52 = vmax.f32 %v3671_v42, 0.0  ;;  %v4738_v47 = vadd.f32 %v7416_v45, %v3450_v63  ;;  %v3452_v41 = vpop.f32.mrb[53].mxu1 }
 0x58e   : > { %3825 = vst [vmem:[%s7423_s10 + $0x48] sm:$0xff] %v3793_v52  ;;  %v3676_v0 = vadd.f32 %v4738_v47, %v7887_v29  ;;  %v7897_v52 = vld [vmem:[#allocation27_spill] sm:$0xff] }
 0x58f   : > { %v3455_v60 = vpop.f32.mrb[54].mxu1 }
 0x590   : > { %v3794_v1 = vmax.f32 %v3676_v0, 0.0  ;;  %v4739_v36 = vadd.f32 %v7416_v45, %v3455_v60  ;;  %v3457_v61 = vpop.f32.mrb[55].mxu1 }
 0x592   : > { %3826 = vst [vmem:[%s7423_s10 + $0x50] sm:$0xff] %v3794_v1  ;;  %v3681_v14 = vadd.f32 %v4739_v36, %v7888_v23  ;;  %v7898_v1 = vld [vmem:[#allocation26_spill] sm:$0xff] }
 0x593   : > { %v3460_v51 = vpop.f32.mrb[56].mxu1 }
 0x594   : > { %v3795_v27 = vmax.f32 %v3681_v14, 0.0  ;;  %v4740_v25 = vadd.f32 %v7416_v45, %v3460_v51  ;;  %v3462_v59 = vpop.f32.mrb[57].mxu1 }
 0x596   : > { %3827 = vst [vmem:[%s7423_s10 + $0x58] sm:$0xff] %v3795_v27  ;;  %v3686_v32 = vadd.f32 %v4740_v25, %v7889_v40  ;;  %v7899_v27 = vld [vmem:[#allocation29_spill] sm:$0xff] }
 0x597   : > { %v3465_v37 = vpop.f32.mrb[58].mxu1 }
 0x598   : > { %v3796_v21 = vmax.f32 %v3686_v32, 0.0  ;;  %v4741_v15 = vadd.f32 %v7416_v45, %v3465_v37  ;;  %v3467_v22 = vpop.f32.mrb[59].mxu1 }
 0x59a   : > { %3828 = vst [vmem:[%s7423_s10 + $0x60] sm:$0xff] %v3796_v21  ;;  %v3691_v31 = vadd.f32 %v4741_v15, %v7890_v62  ;;  %v7900_v21 = vld [vmem:[#allocation28_spill] sm:$0xff] }
 0x59b   : > { %v3470_v11 = vpop.f32.mrb[60].mxu1 }
 0x59c   : > { %v3797_v20 = vmax.f32 %v3691_v31, 0.0  ;;  %v4742_v34 = vadd.f32 %v7416_v45, %v3470_v11  ;;  %v3472_v50 = vpop.f32.mrb[61].mxu1 }
 0x59e   : > { %3829 = vst [vmem:[%s7423_s10 + $0x68] sm:$0xff] %v3797_v20  ;;  %v3696_v13 = vadd.f32 %v4742_v34, %v7891_v58 }
 0x59f   : > { %v3475_v16 = vpop.f32.mrb[62].mxu1 }
 0x5a0   : > { %v3798_v46 = vmax.f32 %v3696_v13, 0.0  ;;  %v4743_v48 = vadd.f32 %v7416_v45, %v3475_v16  ;;  %v3477_v56 = vpop.f32.mrb[63].mxu1 }
 0x5a2   : > { %3830 = vst [vmem:[%s7423_s10 + $0x70] sm:$0xff] %v3798_v46  ;;  %v3701_v5 = vadd.f32 %v4743_v48, %v7892_v10 }
 0x5a3   : > { %v3480_v30 = vpop.f32.mrb[64].mxu1 }
 0x5a4   : > { %v3799_v54 = vmax.f32 %v3701_v5, 0.0  ;;  %v4744_v17 = vadd.f32 %v7416_v45, %v3480_v30  ;;  %v3482_v4 = vpop.f32.mrb[65].mxu1 }
 0x5a6   : > { %3831 = vst [vmem:[%s7423_s10 + $0x78] sm:$0xff] %v3799_v54  ;;  %v3706_v44 = vadd.f32 %v4744_v17, %v7893_v57 }
 0x5a7   : > { %v3485_v26 = vpop.f32.mrb[66].mxu1 }
 0x5a8   : > { %v3800_v38 = vmax.f32 %v3706_v44, 0.0  ;;  %v4745_v43 = vadd.f32 %v7416_v45, %v3485_v26  ;;  %v3487_v3 = vpop.f32.mrb[67].mxu1 }
 0x5aa   : > { %3832 = vst [vmem:[%s7423_s10 + $0x80] sm:$0xff] %v3800_v38  ;;  %v3711_v9 = vadd.f32 %v4745_v43, %v7894_v55 }
 0x5ab   : > { %v3490_v49 = vpop.f32.mrb[68].mxu1 }
 0x5ac   : > { %v3801_v28 = vmax.f32 %v3711_v9, 0.0  ;;  %v4746_v33 = vadd.f32 %v7416_v45, %v3490_v49  ;;  %v3492_v7 = vpop.f32.mrb[69].mxu1 }
 0x5ae   : > { %3833 = vst [vmem:[%s7423_s10 + $0x88] sm:$0xff] %v3801_v28  ;;  %v3716_v2 = vadd.f32 %v4746_v33, %v7895_v24 }
 0x5af   : > { %v3495_v6 = vpop.f32.mrb[70].mxu1 }
 0x5b0   : > { %v3802_v18 = vmax.f32 %v3716_v2, 0.0  ;;  %v4747_v12 = vadd.f32 %v7416_v45, %v3495_v6  ;;  %v3497_v19 = vpop.f32.mrb[71].mxu1 }
 0x5b2   : > { %3834 = vst [vmem:[%s7423_s10 + $0x90] sm:$0xff] %v3802_v18  ;;  %v3721_v35 = vadd.f32 %v4747_v12, %v7896_v39 }
 0x5b3   : > { %v3500_v53 = vpop.f32.mrb[72].mxu1 }
 0x5b4   : > { %v3803_v8 = vmax.f32 %v3721_v35, 0.0  ;;  %v4748_v42 = vadd.f32 %v7416_v45, %v3500_v53  ;;  %v3502_v63 = vpop.f32.mrb[73].mxu1 }
 0x5b6   : > { %3835 = vst [vmem:[%s7423_s10 + $0x98] sm:$0xff] %v3803_v8  ;;  %v3726_v47 = vadd.f32 %v4748_v42, %v7897_v52 }
 0x5b7   : > { %v3505_v41 = vpop.f32.mrb[74].mxu1 }
 0x5b8   : > { %v3804_v29 = vmax.f32 %v3726_v47, 0.0  ;;  %v4749_v0 = vadd.f32 %v7416_v45, %v3505_v41  ;;  %v3507_v60 = vpop.f32.mrb[75].mxu1 }
 0x5ba   : > { %3836 = vst [vmem:[%s7423_s10 + $0xa0] sm:$0xff] %v3804_v29  ;;  %v3731_v36 = vadd.f32 %v4749_v0, %v7898_v1 }
 0x5bb   : > { %v3510_v61 = vpop.f32.mrb[76].mxu1 }
 0x5bc   : > { %v3805_v23 = vmax.f32 %v3731_v36, 0.0  ;;  %v4750_v14 = vadd.f32 %v7416_v45, %v3510_v61  ;;  %v3512_v51 = vpop.f32.mrb[77].mxu1 }
 0x5be   : > { %3837 = vst [vmem:[%s7423_s10 + $0xa8] sm:$0xff] %v3805_v23  ;;  %v3736_v25 = vadd.f32 %v4750_v14, %v7899_v27 }
 0x5bf   : > { %v3515_v59 = vpop.f32.mrb[78].mxu1 }
 0x5c0   : > { %v3806_v40 = vmax.f32 %v3736_v25, 0.0  ;;  %v4751_v32 = vadd.f32 %v7416_v45, %v3515_v59  ;;  %v3517_v37 = vpop.f32.mrb[79].mxu1 }
 0x5c2   : > { %3838 = vst [vmem:[%s7423_s10 + $0xb0] sm:$0xff] %v3806_v40  ;;  %v3741_v15 = vadd.f32 %v4751_v32, %v7900_v21 }
 0x5c3   : > { %v3520_v22 = vpop.f32.mrb[80].mxu1 }
 0x5c4   : > { %v3807_v62 = vmax.f32 %v3741_v15, 0.0  ;;  %v3522_v31 = vpop.f32.mrb[81].mxu1  ;;  %v4752_v4 = vadd.f32 %v7416_v45, %v3520_v22 }
 0x5c6   : > { %3839 = vst [vmem:[%s7423_s10 + $0xb8] sm:$0xff] %v3807_v62 }
 0x5c7   : > { %v3525_v11 = vpop.f32.mrb[82].mxu1 }
 0x5c8   : > { %v3527_v20 = vpop.f32.mrb[83].mxu1  ;;  %v4753_v17 = vadd.f32 %v7416_v45, %v3525_v11 }
 0x5cb   : > { %v3530_v34 = vpop.f32.mrb[84].mxu1 }
 0x5cc   : > { %v3532_v50 = vpop.f32.mrb[85].mxu1  ;;  %v4754_v55 = vadd.f32 %v7416_v45, %v3530_v34 }
 0x5cf   : > { %v3535_v58 = vpop.f32.mrb[86].mxu1 }
 0x5d0   : > { %v3537_v13 = vpop.f32.mrb[87].mxu1  ;;  %v4755_v43 = vadd.f32 %v7416_v45, %v3535_v58 }
 0x5d3   : > { %v3540_v16 = vpop.f32.mrb[88].mxu1 }
 0x5d4   : > { %v3542_v46 = vpop.f32.mrb[89].mxu1  ;;  %v4756_v6 = vadd.f32 %v7416_v45, %v3540_v16 }
 0x5d7   : > { %v3545_v48 = vpop.f32.mrb[90].mxu1 }
 0x5d8   : > { %v3547_v56 = vpop.f32.mrb[91].mxu1  ;;  %v4757_v24 = vadd.f32 %v7416_v45, %v3545_v48 }
 0x5db   : > { %v3550_v10 = vpop.f32.mrb[92].mxu1 }
 0x5dc   : > { %v3552_v5 = vpop.f32.mrb[93].mxu1  ;;  %v4758_v42 = vadd.f32 %v7416_v45, %v3550_v10 }
 0x5df   : > { %v3555_v30 = vpop.f32.mrb[94].mxu1 }
 0x5e0   : > { %v3557_v54 = vpop.f32.mrb[95].mxu1  ;;  %v4759_v53 = vadd.f32 %v7416_v45, %v3555_v30 }
 0x5e3   : > { %v4222_v57 = vpop.f32.mrb[96].mxu1 }
 0x5e4   : > { %v3751_v44 = vadd.f32 %v4753_v17, %v4222_v57  ;;  %v3745_v26 = vpop.f32.mrb[97].mxu1 }
 0x5e5   : > { %v3746_v38 = vadd.f32 %v4752_v4, %v3745_v26 }
 0x5e6   : > { %v3809_v3 = vmax.f32 %v3751_v44, 0.0 }
 0x5e7   : > { %v3808_v9 = vmax.f32 %v3746_v38, 0.0  ;;  %v4225_v49 = vpop.f32.mrb[98].mxu1 }
 0x5e8   : > { %3841 = vst [vmem:[%s7423_s10 + $0xc8] sm:$0xff] %v3809_v3  ;;  %v3761_v28 = vadd.f32 %v4755_v43, %v4225_v49  ;;  %v3755_v33 = vpop.f32.mrb[99].mxu1 }
 0x5e9   : > { %3840 = vst [vmem:[%s7423_s10 + $0xc0] sm:$0xff] %v3808_v9  ;;  %v3756_v7 = vadd.f32 %v4754_v55, %v3755_v33 }
 0x5ea   : > { %v3811_v2 = vmax.f32 %v3761_v28, 0.0 }
 0x5eb   : > { %v3810_v18 = vmax.f32 %v3756_v7, 0.0  ;;  %v4228_v12 = vpop.f32.mrb[100].mxu1 }
 0x5ec   : > { %3843 = vst [vmem:[%s7423_s10 + $0xd8] sm:$0xff] %v3811_v2  ;;  %v3771_v19 = vadd.f32 %v4757_v24, %v4228_v12  ;;  %v3765_v39 = vpop.f32.mrb[101].mxu1 }
 0x5ed   : > { %3842 = vst [vmem:[%s7423_s10 + $0xd0] sm:$0xff] %v3810_v18  ;;  %v3766_v35 = vadd.f32 %v4756_v6, %v3765_v39 }
 0x5ee   : > { %v3813_v8 = vmax.f32 %v3771_v19, 0.0 }
 0x5ef   : > { %v3812_v63 = vmax.f32 %v3766_v35, 0.0  ;;  %v4231_v52 = vpop.f32.mrb[102].mxu1 }
 0x5f0   : > { %3845 = vst [vmem:[%s7423_s10 + $0xe8] sm:$0xff] %v3813_v8  ;;  %v3781_v47 = vadd.f32 %v4759_v53, %v4231_v52  ;;  %v3775_v41 = vpop.f32.mrb[103].mxu1 }
 0x5f1   : > { %3844 = vst [vmem:[%s7423_s10 + $0xe0] sm:$0xff] %v3812_v63  ;;  %v3776_v29 = vadd.f32 %v4758_v42, %v3775_v41 }
 0x5f2   : > { %v3815_v0 = vmax.f32 %v3781_v47, 0.0 }
 0x5f3   : > { %v3814_v45 = vmax.f32 %v3776_v29, 0.0 }
 0x5f4   : > { %3847 = vst [vmem:[%s7423_s10 + $0xf8] sm:$0xff] %v3815_v0 }
 0x5f5   : > { %3846 = vst [vmem:[%s7423_s10 + $0xf0] sm:$0xff] %v3814_v45 }
 0x5f6   : > { %5368 = shalt.err (!%p5365_p1)
}
 0x5f7   : > { %s5369_s12 = scalar_lea.hbm %s7513_s11, 4096  ;;  %s5373_s15 = scalar_lea.hbm %s7566_s5, 8192 }
 0x5f8   : > { %p5370_p13 = scmp.ne.s32.totalorder %s7513_s11, %s5369_s12  ;;  %p5374_p4 = scmp.lt.u32.totalorder %s7513_s11, %s7566_s5 }
 0x5f9   : > { %p5375_p5 = scmp.lt.u32.totalorder %s5373_s15, %s5369_s12  ;;  %p5377_p11 = scmp.lt.u32.totalorder %s5369_s12, %s7513_s11 }
 0x5fa   : > { %p5371_p6 = pnand %p5370_p13, %p7901_p0 }
 0x5fb   : > { %p5376_p8 = por %p5375_p5, %p5374_p4 }
 0x5fc   : > { %p5372_p10 = pneg %p5371_p6 }
 0x5fd   : > { %p5378_p2 = por %p5377_p11, %p5376_p8 }
 0x5ff   : > { %p5379_p3 = pnand %p5378_p2, %p5372_p10 }
 0x601   : > { %5382 = shalt.err (!%p5379_p3)
}
 0x602   : > { %s5435_s28 = smov 128   ;;  %s5436_s9 = smov 8  }
 0x603   : > { %5154 = dma.vmem_to_hbm [thread:$0]  (%p7901_p0), %s7515_s13, 4096, %s7513_s11, %s3849_s22, %s5435_s28, %s5435_s28, %s5436_s9  }
 0x604 PF: > { %s3877_s30 = sand.u32 1, %s5413_s18   ;;  %p7902_p7 = scmp.ne.s32.totalorder %s7715_s25, 0 }
 0x605   : > { %p7903_p9 = scmp.ge.s32.totalorder %s5425_s21, 2  ;;  %s3878_s17 = scalar_lea.sflag [#allocation6], %s3877_s30 }
 0x607   : > { %p5168_p12 = pnand %p7903_p9, %p7902_p7 }
 0x609   : > { %5408 = dma.done.wait (!%p5168_p12), %s3878_s17, 4096  }
 0x60a   : > { %5410 = vsyncadd (!%p5168_p12), %s3878_s17, 4294963200  ;;  %p19_p1 = scmp.ge.s32.totalorder %s5583_s29, 4   ;;  %s7904_s18 = smov %s5417_s19 }
 0x60b   : > { %s7905_s19 = smov %s5421_s20  ;;  %s7906_s20 = smov %s5599_s27 }
 0x60c   : > { %s7907_s21 = smov %s5583_s29  ;;  %21 = sbr.rel (!%p19_p1) target bundleno = 6 (0x6), region = 95 }
 0x613   :  { %3883 = vsyncpa [#allocation5], 1 }
 0x614   :  { %3885 = vsyncpa [#allocation5 + $0x1], 1 }
 0x615   :  { %3886 = vsyncpa [#allocation8], 1 }
 0x616   :  { %3887 = vsyncpa [#allocation6], 1 }
 0x617   :  { %3889 = vsyncpa [#allocation6 + $0x1], 1 }

</bundles_post_ra>
